<compile_context>
chip_gen: v7x
topology: tpu7x:2x2x1
jax: 0.10.0
libtpu: 0.0.40
codegen_flags: <defaults>
</compile_context>

<pallas_src>
import numpy as np

import jax
import jax.numpy as jnp
from jax.experimental import pallas as pl
from jax.experimental.pallas import tpu as pltpu


# ---------------------------------------------------------------------------
# Fused LeNet kernel (one program per batch element)
# ---------------------------------------------------------------------------
def _lenet_kernel(x_ref,                                   # [1, Cin*H, W]
                  a1_ref, b1_ref, cw1_ref, rh1_ref,        # conv1 + pool1
                  a2_ref, b2_ref, cw2_ref, rh2_ref,        # conv2 + pool2
                  fc1w_ref, fc1b_ref, fc2w_ref, fc2b_ref, fc3w_ref, fc3b_ref,
                  out_ref,                                  # [1, 10, 1]
                  p1_ref, p2_ref):                          # VMEM scratch
    f32 = jnp.float32
    kw = a1_ref.shape[0]          # 5 (conv kernel width)
    wo1 = cw1_ref.shape[1]        # 28 (conv1 output width)
    wo2 = cw2_ref.shape[1]        # 10 (conv2 output width)

    # ---- conv1 + bias + ReLU : [6*28, 28] -------------------------------
    acc = None
    for j in range(kw):
        t = jnp.dot(a1_ref[j], x_ref[0, :, j:j + wo1],
                    preferred_element_type=f32)
        acc = t if acc is None else acc + t
    y1 = jnp.maximum(acc + b1_ref[...], 0.0)               # [168, 28]

    # ---- max-pool 2x2 -> [6*14, 14] (stored to VMEM scratch) ------------
    cm = jnp.maximum(jnp.dot(y1, cw1_ref[0], preferred_element_type=f32),
                     jnp.dot(y1, cw1_ref[1], preferred_element_type=f32))
    p1_ref[...] = jnp.maximum(
        jnp.dot(rh1_ref[0], cm, preferred_element_type=f32),
        jnp.dot(rh1_ref[1], cm, preferred_element_type=f32))

    # ---- conv2 + bias + ReLU : [16*10, 10] ------------------------------
    acc = None
    for j in range(kw):
        t = jnp.dot(a2_ref[j], p1_ref[:, j:j + wo2],
                    preferred_element_type=f32)
        acc = t if acc is None else acc + t
    y2 = jnp.maximum(acc + b2_ref[...], 0.0)               # [160, 10]

    # ---- max-pool 2x2 -> [16*5, 5] --------------------------------------
    cm = jnp.maximum(jnp.dot(y2, cw2_ref[0], preferred_element_type=f32),
                     jnp.dot(y2, cw2_ref[1], preferred_element_type=f32))
    p2_ref[...] = jnp.maximum(
        jnp.dot(rh2_ref[0], cm, preferred_element_type=f32),
        jnp.dot(rh2_ref[1], cm, preferred_element_type=f32))

    # ---- fc1 (+ReLU): NCHW flatten is folded into the 5 per-column weights
    h = None
    for w in range(fc1w_ref.shape[0]):                     # 5
        t = jnp.dot(fc1w_ref[w], p2_ref[:, w:w + 1],
                    preferred_element_type=f32)
        h = t if h is None else h + t
    h = jnp.maximum(h + fc1b_ref[...], 0.0)                # [120, 1]

    # ---- fc2 (+ReLU), fc3 ------------------------------------------------
    h = jnp.maximum(jnp.dot(fc2w_ref[...], h, preferred_element_type=f32)
                    + fc2b_ref[...], 0.0)                  # [84, 1]
    out_ref[0] = (jnp.dot(fc3w_ref[...], h, preferred_element_type=f32)
                  + fc3b_ref[...])                         # [10, 1]


# ---------------------------------------------------------------------------
# Host-side, one-time weight preparation (outside jit)
# ---------------------------------------------------------------------------
def _conv_to_banded(w, h_in, h_out):
    """w: [O, C, kh, kw] -> A: [kw, O*h_out, C*h_in] with
    A[j, o*h_out + ho, c*h_in + ho + i] = w[o, c, i, j].  Then
    conv(x)[o, ho, wo] = sum_j (A[j] @ X[:, wo + j]) for X in [C*h_in, W] layout."""
    w = np.asarray(w, np.float32)
    O, C, kh, kw = w.shape
    A = np.zeros((kw, O * h_out, C * h_in), np.float32)
    o_rows = np.arange(O)[:, None] * h_out
    c_cols = np.arange(C)[None, :] * h_in
    for j in range(kw):
        for i in range(kh):
            for ho in range(h_out):
                A[j, o_rows + ho, c_cols + ho + i] = w[:, :, i, j]
    return A


def _pool_col_selectors(w_in, w_out):
    """[2, w_in, w_out]: right-multiply to pick even / odd columns of 2x2 windows."""
    S = np.zeros((2, w_in, w_out), np.float32)
    for d in range(2):
        for w2 in range(w_out):
            S[d, 2 * w2 + d, w2] = 1.0
    return S


def _pool_row_selectors(ch, h_in, h_out):
    """[2, ch*h_out, ch*h_in]: left-multiply to pick even / odd rows of 2x2 windows
    inside each channel block of the [C*H, W] layout."""
    S = np.zeros((2, ch * h_out, ch * h_in), np.float32)
    for d in range(2):
        for c in range(ch):
            for h2 in range(h_out):
                S[d, c * h_out + h2, c * h_in + 2 * h2 + d] = 1.0
    return S


def prepare_params(params):
    """Convert PyTorch-layout LeNet params into kernel-ready matrices (host, once)."""
    W1 = np.asarray(params["conv1_w"], np.float32)     # [6, 3, 5, 5]
    b1 = np.asarray(params["conv1_b"], np.float32)
    W2 = np.asarray(params["conv2_w"], np.float32)     # [16, 6, 5, 5]
    b2 = np.asarray(params["conv2_b"], np.float32)

    HO1, HP1 = 28, 14          # conv1 out height, pool1 out height
    HO2, HP2 = 10, 5           # conv2 out height, pool2 out height

    fc1_w = np.asarray(params["fc1_w"], np.float32)    # [120, 400] (out, in)
    n_fc1 = fc1_w.shape[0]
    # Fold the NCHW flatten into fc1: one [120, 16*5] weight slab per width index.
    fc1_stack = (fc1_w.reshape(n_fc1, W2.shape[0], HP2, HP2)
                 .transpose(3, 0, 1, 2).reshape(HP2, n_fc1, W2.shape[0] * HP2))

    kp = {
        "a1": _conv_to_banded(W1, 32, HO1),                   # [5, 168, 96]
        "b1": np.repeat(b1, HO1)[:, None],                    # [168, 1]
        "cw1": _pool_col_selectors(HO1, HP1),                 # [2, 28, 14]
        "rh1": _pool_row_selectors(W1.shape[0], HO1, HP1),    # [2, 84, 168]
        "a2": _conv_to_banded(W2, HP1, HO2),                  # [5, 160, 84]
        "b2": np.repeat(b2, HO2)[:, None],                    # [160, 1]
        "cw2": _pool_col_selectors(HO2, HP2),                 # [2, 10, 5]
        "rh2": _pool_row_selectors(W2.shape[0], HO2, HP2),    # [2, 80, 160]
        "fc1w": fc1_stack,                                    # [5, 120, 80]
        "fc1b": np.asarray(params["fc1_b"], np.float32)[:, None],
        "fc2w": np.asarray(params["fc2_w"], np.float32),      # [84, 120]
        "fc2b": np.asarray(params["fc2_b"], np.float32)[:, None],
        "fc3w": np.asarray(params["fc3_w"], np.float32),      # [10, 84]
        "fc3b": np.asarray(params["fc3_b"], np.float32)[:, None],
    }
    return {k: jnp.asarray(v) for k, v in kp.items()}


# ---------------------------------------------------------------------------
# Fused forward (one pallas_call)
# ---------------------------------------------------------------------------
_WEIGHT_ORDER = ("a1", "b1", "cw1", "rh1", "a2", "b2", "cw2", "rh2",
                 "fc1w", "fc1b", "fc2w", "fc2b", "fc3w", "fc3b")


def lenet_forward(x, kp):
    """x: [B, 3, 32, 32] float32 -> logits [B, 10]."""
    B, C, H, W = x.shape
    x2 = x.reshape(B, C * H, W)            # contiguous -> free reshape
    weights = [kp[name] for name in _WEIGHT_ORDER]

    def _const_spec(a):
        zeros = (0,) * a.ndim
        return pl.BlockSpec(a.shape, lambda b, _z=zeros: _z)

    in_specs = ([pl.BlockSpec((1, C * H, W), lambda b: (b, 0, 0))]
                + [_const_spec(a) for a in weights])

    out = pl.pallas_call(
        _lenet_kernel,
        out_shape=jax.ShapeDtypeStruct((B, 10, 1), jnp.float32),
        grid=(B,),
        in_specs=in_specs,
        out_specs=pl.BlockSpec((1, 10, 1), lambda b: (b, 0, 0)),
        scratch_shapes=[
            pltpu.VMEM((kp["rh1"].shape[1], kp["cw1"].shape[2]), jnp.float32),  # pool1 out [84,14]
            pltpu.VMEM((kp["rh2"].shape[1], kp["cw2"].shape[2]), jnp.float32),  # pool2 out [80,5]
        ],
        compiler_params=pltpu.CompilerParams(
            dimension_semantics=("parallel",)),
    )(x2, *weights)
    return out.reshape(B, 10)


# ---------------------------------------------------------------------------
# Pure-JAX reference (for correctness check only)
# ---------------------------------------------------------------------------
def reference_forward(x, params):
    hp = jax.lax.Precision.HIGHEST

    def conv(x, w, b):
        y = jax.lax.conv_general_dilated(
            x, w, window_strides=(1, 1), padding="VALID",
            dimension_numbers=("NCHW", "OIHW", "NCHW"), precision=hp)
        return jax.nn.relu(y + b[None, :, None, None])

    def pool(x):
        return jax.lax.reduce_window(x, -jnp.inf, jax.lax.max,
                                     (1, 1, 2, 2), (1, 1, 2, 2), "VALID")

    out = pool(conv(x, params["conv1_w"], params["conv1_b"]))
    out = pool(conv(out, params["conv2_w"], params["conv2_b"]))
    out = out.reshape(out.shape[0], -1)
    out = jax.nn.relu(jnp.dot(out, params["fc1_w"].T, precision=hp) + params["fc1_b"])
    out = jax.nn.relu(jnp.dot(out, params["fc2_w"].T, precision=hp) + params["fc2_b"])
    return jnp.dot(out, params["fc3_w"].T, precision=hp) + params["fc3_b"]


# ---------------------------------------------------------------------------
# Parameter init (PyTorch nn.Module shapes)
# ---------------------------------------------------------------------------
def init_params(key):
    ks = jax.random.split(key, 10)

    def w(k, shape, fan_in):
        return jax.random.normal(k, shape, jnp.float32) / jnp.sqrt(float(fan_in))

    return {
        "conv1_w": w(ks[0], (6, 3, 5, 5), 3 * 5 * 5),
        "conv1_b": w(ks[1], (6,), 3 * 5 * 5),
        "conv2_w": w(ks[2], (16, 6, 5, 5), 6 * 5 * 5),
        "conv2_b": w(ks[3], (16,), 6 * 5 * 5),
        "fc1_w": w(ks[4], (120, 16 * 5 * 5), 16 * 5 * 5),   # PyTorch Linear: [out, in]
        "fc1_b": w(ks[5], (120,), 16 * 5 * 5),
        "fc2_w": w(ks[6], (84, 120), 120),
        "fc2_b": w(ks[7], (84,), 120),
        "fc3_w": w(ks[8], (10, 84), 84),
        "fc3_b": w(ks[9], (10,), 84),
    }


if __name__ == "__main__":
    key = jax.random.PRNGKey(0)
    pkey, xkey = jax.random.split(key)
    params = init_params(pkey)
    # CIFAR-sized input implied by fc1 = Linear(16*5*5, 120): [B, 3, 32, 32]
    x = jax.random.normal(xkey, (2, 3, 32, 32), jnp.float32)

    kparams = prepare_params(params)           # host-side, one-time weight prep
    fwd = jax.jit(lenet_forward)
    logits = jax.block_until_ready(fwd(x, kparams))

    assert logits.shape == (2, 10) and logits.dtype == jnp.float32

    ref = jax.block_until_ready(reference_forward(x, params))
    max_err = float(jnp.max(jnp.abs(logits - ref)))
    assert max_err < 5e-2, f"mismatch vs reference: max abs err = {max_err}"

    print("KERNEL_OK")
</pallas_src>

<mosaic_0001>
module attributes {stable_mosaic.version = 11 : i64} {
  func.func @_lenet_kernel(%arg0: i32, %arg1: memref<1x96x32xf32, #tpu.memory_space<vmem>>, %arg2: memref<5x168x96xf32, #tpu.memory_space<vmem>>, %arg3: memref<168x1xf32, #tpu.memory_space<vmem>>, %arg4: memref<2x28x14xf32, #tpu.memory_space<vmem>>, %arg5: memref<2x84x168xf32, #tpu.memory_space<vmem>>, %arg6: memref<5x160x84xf32, #tpu.memory_space<vmem>>, %arg7: memref<160x1xf32, #tpu.memory_space<vmem>>, %arg8: memref<2x10x5xf32, #tpu.memory_space<vmem>>, %arg9: memref<2x80x160xf32, #tpu.memory_space<vmem>>, %arg10: memref<5x120x80xf32, #tpu.memory_space<vmem>>, %arg11: memref<120x1xf32, #tpu.memory_space<vmem>>, %arg12: memref<84x120xf32, #tpu.memory_space<vmem>>, %arg13: memref<84x1xf32, #tpu.memory_space<vmem>>, %arg14: memref<10x84xf32, #tpu.memory_space<vmem>>, %arg15: memref<10x1xf32, #tpu.memory_space<vmem>>, %arg16: memref<1x10x1xf32, #tpu.memory_space<vmem>>, %arg17: memref<84x14xf32, #tpu.memory_space<vmem>>, %arg18: memref<80x5xf32, #tpu.memory_space<vmem>>) attributes {dimension_semantics = [#tpu.dimension_semantics<parallel>], iteration_bounds = array<i64: 2>, scalar_prefetch = 0 : i64, scratch_operands = 2 : i64, tpu.core_type = #tpu.core_type<tc>, window_params = [{transform_indices = @transform_0, window_bounds = array<i64: 1, 96, 32>}, {pipeline_mode = #tpu.pipeline_mode<synchronous>, transform_indices = @transform_1, window_bounds = array<i64: 5, 168, 96>}, {pipeline_mode = #tpu.pipeline_mode<synchronous>, transform_indices = @transform_2, window_bounds = array<i64: 168, 1>}, {pipeline_mode = #tpu.pipeline_mode<synchronous>, transform_indices = @transform_3, window_bounds = array<i64: 2, 28, 14>}, {pipeline_mode = #tpu.pipeline_mode<synchronous>, transform_indices = @transform_4, window_bounds = array<i64: 2, 84, 168>}, {pipeline_mode = #tpu.pipeline_mode<synchronous>, transform_indices = @transform_5, window_bounds = array<i64: 5, 160, 84>}, {pipeline_mode = #tpu.pipeline_mode<synchronous>, transform_indices = @transform_6, window_bounds = array<i64: 160, 1>}, {pipeline_mode = #tpu.pipeline_mode<synchronous>, transform_indices = @transform_7, window_bounds = array<i64: 2, 10, 5>}, {pipeline_mode = #tpu.pipeline_mode<synchronous>, transform_indices = @transform_8, window_bounds = array<i64: 2, 80, 160>}, {pipeline_mode = #tpu.pipeline_mode<synchronous>, transform_indices = @transform_9, window_bounds = array<i64: 5, 120, 80>}, {pipeline_mode = #tpu.pipeline_mode<synchronous>, transform_indices = @transform_10, window_bounds = array<i64: 120, 1>}, {pipeline_mode = #tpu.pipeline_mode<synchronous>, transform_indices = @transform_11, window_bounds = array<i64: 84, 120>}, {pipeline_mode = #tpu.pipeline_mode<synchronous>, transform_indices = @transform_12, window_bounds = array<i64: 84, 1>}, {pipeline_mode = #tpu.pipeline_mode<synchronous>, transform_indices = @transform_13, window_bounds = array<i64: 10, 84>}, {pipeline_mode = #tpu.pipeline_mode<synchronous>, transform_indices = @transform_14, window_bounds = array<i64: 10, 1>}, {transform_indices = @transform_15, window_bounds = array<i64: 1, 10, 1>}]} {
    %c0 = arith.constant 0 : index
    %c0_0 = arith.constant 0 : index
    %c0_1 = arith.constant 0 : index
    %0 = vector.load %arg2[%c0, %c0_0, %c0_1] : memref<5x168x96xf32, #tpu.memory_space<vmem>>, vector<1x168x96xf32>
    %1 = vector.shape_cast %0 : vector<1x168x96xf32> to vector<168x96xf32>
    %c0_2 = arith.constant 0 : index
    %c0_3 = arith.constant 0 : index
    %c0_4 = arith.constant 0 : index
    %2 = vector.load %arg1[%c0_2, %c0_3, %c0_4] : memref<1x96x32xf32, #tpu.memory_space<vmem>>, vector<1x96x28xf32>
    %3 = vector.shape_cast %2 : vector<1x96x28xf32> to vector<96x28xf32>
    %cst = arith.constant dense<0.000000e+00> : vector<168x28xf32>
    %4 = tpu.matmul %1, %3, %cst {dimension_numbers = #tpu.dot_dimension_numbers<[1], [0], [0], [1], [0, 0, 1, 1], [], []>} : vector<168x96xf32>, vector<96x28xf32>, vector<168x28xf32> -> vector<168x28xf32>
    %c1 = arith.constant 1 : index
    %c0_5 = arith.constant 0 : index
    %c0_6 = arith.constant 0 : index
    %5 = vector.load %arg2[%c1, %c0_5, %c0_6] : memref<5x168x96xf32, #tpu.memory_space<vmem>>, vector<1x168x96xf32>
    %6 = vector.shape_cast %5 : vector<1x168x96xf32> to vector<168x96xf32>
    %c0_7 = arith.constant 0 : index
    %c0_8 = arith.constant 0 : index
    %c1_9 = arith.constant 1 : index
    %7 = vector.load %arg1[%c0_7, %c0_8, %c1_9] : memref<1x96x32xf32, #tpu.memory_space<vmem>>, vector<1x96x28xf32>
    %8 = vector.shape_cast %7 : vector<1x96x28xf32> to vector<96x28xf32>
    %cst_10 = arith.constant dense<0.000000e+00> : vector<168x28xf32>
    %9 = tpu.matmul %6, %8, %cst_10 {dimension_numbers = #tpu.dot_dimension_numbers<[1], [0], [0], [1], [0, 0, 1, 1], [], []>} : vector<168x96xf32>, vector<96x28xf32>, vector<168x28xf32> -> vector<168x28xf32>
    %10 = arith.addf %4, %9 : vector<168x28xf32>
    %c2 = arith.constant 2 : index
    %c0_11 = arith.constant 0 : index
    %c0_12 = arith.constant 0 : index
    %11 = vector.load %arg2[%c2, %c0_11, %c0_12] : memref<5x168x96xf32, #tpu.memory_space<vmem>>, vector<1x168x96xf32>
    %12 = vector.shape_cast %11 : vector<1x168x96xf32> to vector<168x96xf32>
    %c0_13 = arith.constant 0 : index
    %c0_14 = arith.constant 0 : index
    %c2_15 = arith.constant 2 : index
    %13 = vector.load %arg1[%c0_13, %c0_14, %c2_15] : memref<1x96x32xf32, #tpu.memory_space<vmem>>, vector<1x96x28xf32>
    %14 = vector.shape_cast %13 : vector<1x96x28xf32> to vector<96x28xf32>
    %cst_16 = arith.constant dense<0.000000e+00> : vector<168x28xf32>
    %15 = tpu.matmul %12, %14, %cst_16 {dimension_numbers = #tpu.dot_dimension_numbers<[1], [0], [0], [1], [0, 0, 1, 1], [], []>} : vector<168x96xf32>, vector<96x28xf32>, vector<168x28xf32> -> vector<168x28xf32>
    %16 = arith.addf %10, %15 : vector<168x28xf32>
    %c3 = arith.constant 3 : index
    %c0_17 = arith.constant 0 : index
    %c0_18 = arith.constant 0 : index
    %17 = vector.load %arg2[%c3, %c0_17, %c0_18] : memref<5x168x96xf32, #tpu.memory_space<vmem>>, vector<1x168x96xf32>
    %18 = vector.shape_cast %17 : vector<1x168x96xf32> to vector<168x96xf32>
    %c0_19 = arith.constant 0 : index
    %c0_20 = arith.constant 0 : index
    %c3_21 = arith.constant 3 : index
    %19 = vector.load %arg1[%c0_19, %c0_20, %c3_21] : memref<1x96x32xf32, #tpu.memory_space<vmem>>, vector<1x96x28xf32>
    %20 = vector.shape_cast %19 : vector<1x96x28xf32> to vector<96x28xf32>
    %cst_22 = arith.constant dense<0.000000e+00> : vector<168x28xf32>
    %21 = tpu.matmul %18, %20, %cst_22 {dimension_numbers = #tpu.dot_dimension_numbers<[1], [0], [0], [1], [0, 0, 1, 1], [], []>} : vector<168x96xf32>, vector<96x28xf32>, vector<168x28xf32> -> vector<168x28xf32>
    %22 = arith.addf %16, %21 : vector<168x28xf32>
    %c4 = arith.constant 4 : index
    %c0_23 = arith.constant 0 : index
    %c0_24 = arith.constant 0 : index
    %23 = vector.load %arg2[%c4, %c0_23, %c0_24] : memref<5x168x96xf32, #tpu.memory_space<vmem>>, vector<1x168x96xf32>
    %24 = vector.shape_cast %23 : vector<1x168x96xf32> to vector<168x96xf32>
    %c0_25 = arith.constant 0 : index
    %c0_26 = arith.constant 0 : index
    %c4_27 = arith.constant 4 : index
    %25 = vector.load %arg1[%c0_25, %c0_26, %c4_27] : memref<1x96x32xf32, #tpu.memory_space<vmem>>, vector<1x96x28xf32>
    %26 = vector.shape_cast %25 : vector<1x96x28xf32> to vector<96x28xf32>
    %cst_28 = arith.constant dense<0.000000e+00> : vector<168x28xf32>
    %27 = tpu.matmul %24, %26, %cst_28 {dimension_numbers = #tpu.dot_dimension_numbers<[1], [0], [0], [1], [0, 0, 1, 1], [], []>} : vector<168x96xf32>, vector<96x28xf32>, vector<168x28xf32> -> vector<168x28xf32>
    %28 = arith.addf %22, %27 : vector<168x28xf32>
    %c0_29 = arith.constant 0 : index
    %c0_30 = arith.constant 0 : index
    %29 = vector.load %arg3[%c0_29, %c0_30] : memref<168x1xf32, #tpu.memory_space<vmem>>, vector<168x1xf32>
    %30 = vector.broadcast %29 : vector<168x1xf32> to vector<168x28xf32>
    %31 = arith.addf %28, %30 : vector<168x28xf32>
    %cst_31 = arith.constant 0.000000e+00 : f32
    %32 = vector.broadcast %cst_31 : f32 to vector<168x28xf32>
    %33 = arith.maximumf %31, %32 : vector<168x28xf32>
    %c0_32 = arith.constant 0 : index
    %c0_33 = arith.constant 0 : index
    %c0_34 = arith.constant 0 : index
    %34 = vector.load %arg4[%c0_32, %c0_33, %c0_34] : memref<2x28x14xf32, #tpu.memory_space<vmem>>, vector<1x28x14xf32>
    %35 = vector.shape_cast %34 : vector<1x28x14xf32> to vector<28x14xf32>
    %cst_35 = arith.constant dense<0.000000e+00> : vector<168x14xf32>
    %36 = tpu.matmul %33, %35, %cst_35 {dimension_numbers = #tpu.dot_dimension_numbers<[1], [0], [0], [1], [0, 0, 1, 1], [], []>} : vector<168x28xf32>, vector<28x14xf32>, vector<168x14xf32> -> vector<168x14xf32>
    %c1_36 = arith.constant 1 : index
    %c0_37 = arith.constant 0 : index
    %c0_38 = arith.constant 0 : index
    %37 = vector.load %arg4[%c1_36, %c0_37, %c0_38] : memref<2x28x14xf32, #tpu.memory_space<vmem>>, vector<1x28x14xf32>
    %38 = vector.shape_cast %37 : vector<1x28x14xf32> to vector<28x14xf32>
    %cst_39 = arith.constant dense<0.000000e+00> : vector<168x14xf32>
    %39 = tpu.matmul %33, %38, %cst_39 {dimension_numbers = #tpu.dot_dimension_numbers<[1], [0], [0], [1], [0, 0, 1, 1], [], []>} : vector<168x28xf32>, vector<28x14xf32>, vector<168x14xf32> -> vector<168x14xf32>
    %40 = arith.maximumf %36, %39 : vector<168x14xf32>
    %c0_40 = arith.constant 0 : index
    %c0_41 = arith.constant 0 : index
    %c0_42 = arith.constant 0 : index
    %41 = vector.load %arg5[%c0_40, %c0_41, %c0_42] : memref<2x84x168xf32, #tpu.memory_space<vmem>>, vector<1x84x168xf32>
    %42 = vector.shape_cast %41 : vector<1x84x168xf32> to vector<84x168xf32>
    %cst_43 = arith.constant dense<0.000000e+00> : vector<84x14xf32>
    %43 = tpu.matmul %42, %40, %cst_43 {dimension_numbers = #tpu.dot_dimension_numbers<[1], [0], [0], [1], [0, 0, 1, 1], [], []>} : vector<84x168xf32>, vector<168x14xf32>, vector<84x14xf32> -> vector<84x14xf32>
    %c1_44 = arith.constant 1 : index
    %c0_45 = arith.constant 0 : index
    %c0_46 = arith.constant 0 : index
    %44 = vector.load %arg5[%c1_44, %c0_45, %c0_46] : memref<2x84x168xf32, #tpu.memory_space<vmem>>, vector<1x84x168xf32>
    %45 = vector.shape_cast %44 : vector<1x84x168xf32> to vector<84x168xf32>
    %cst_47 = arith.constant dense<0.000000e+00> : vector<84x14xf32>
    %46 = tpu.matmul %45, %40, %cst_47 {dimension_numbers = #tpu.dot_dimension_numbers<[1], [0], [0], [1], [0, 0, 1, 1], [], []>} : vector<84x168xf32>, vector<168x14xf32>, vector<84x14xf32> -> vector<84x14xf32>
    %47 = arith.maximumf %43, %46 : vector<84x14xf32>
    %c0_48 = arith.constant 0 : index
    %c0_49 = arith.constant 0 : index
    %48 = vector.load %arg17[%c0_48, %c0_49] : memref<84x14xf32, #tpu.memory_space<vmem>>, vector<84x14xf32>
    tpu.vector_store %arg17[%c0_48, %c0_49], %47 {strides = array<i32>} : memref<84x14xf32, #tpu.memory_space<vmem>>, vector<84x14xf32>,
    %c0_50 = arith.constant 0 : index
    %c0_51 = arith.constant 0 : index
    %c0_52 = arith.constant 0 : index
    %49 = vector.load %arg6[%c0_50, %c0_51, %c0_52] : memref<5x160x84xf32, #tpu.memory_space<vmem>>, vector<1x160x84xf32>
    %50 = vector.shape_cast %49 : vector<1x160x84xf32> to vector<160x84xf32>
    %c0_53 = arith.constant 0 : index
    %c0_54 = arith.constant 0 : index
    %51 = vector.load %arg17[%c0_53, %c0_54] : memref<84x14xf32, #tpu.memory_space<vmem>>, vector<84x10xf32>
    %cst_55 = arith.constant dense<0.000000e+00> : vector<160x10xf32>
    %52 = tpu.matmul %50, %51, %cst_55 {dimension_numbers = #tpu.dot_dimension_numbers<[1], [0], [0], [1], [0, 0, 1, 1], [], []>} : vector<160x84xf32>, vector<84x10xf32>, vector<160x10xf32> -> vector<160x10xf32>
    %c1_56 = arith.constant 1 : index
    %c0_57 = arith.constant 0 : index
    %c0_58 = arith.constant 0 : index
    %53 = vector.load %arg6[%c1_56, %c0_57, %c0_58] : memref<5x160x84xf32, #tpu.memory_space<vmem>>, vector<1x160x84xf32>
    %54 = vector.shape_cast %53 : vector<1x160x84xf32> to vector<160x84xf32>
    %c0_59 = arith.constant 0 : index
    %c1_60 = arith.constant 1 : index
    %55 = vector.load %arg17[%c0_59, %c1_60] : memref<84x14xf32, #tpu.memory_space<vmem>>, vector<84x10xf32>
    %cst_61 = arith.constant dense<0.000000e+00> : vector<160x10xf32>
    %56 = tpu.matmul %54, %55, %cst_61 {dimension_numbers = #tpu.dot_dimension_numbers<[1], [0], [0], [1], [0, 0, 1, 1], [], []>} : vector<160x84xf32>, vector<84x10xf32>, vector<160x10xf32> -> vector<160x10xf32>
    %57 = arith.addf %52, %56 : vector<160x10xf32>
    %c2_62 = arith.constant 2 : index
    %c0_63 = arith.constant 0 : index
    %c0_64 = arith.constant 0 : index
    %58 = vector.load %arg6[%c2_62, %c0_63, %c0_64] : memref<5x160x84xf32, #tpu.memory_space<vmem>>, vector<1x160x84xf32>
    %59 = vector.shape_cast %58 : vector<1x160x84xf32> to vector<160x84xf32>
    %c0_65 = arith.constant 0 : index
    %c2_66 = arith.constant 2 : index
    %60 = vector.load %arg17[%c0_65, %c2_66] : memref<84x14xf32, #tpu.memory_space<vmem>>, vector<84x10xf32>
    %cst_67 = arith.constant dense<0.000000e+00> : vector<160x10xf32>
    %61 = tpu.matmul %59, %60, %cst_67 {dimension_numbers = #tpu.dot_dimension_numbers<[1], [0], [0], [1], [0, 0, 1, 1], [], []>} : vector<160x84xf32>, vector<84x10xf32>, vector<160x10xf32> -> vector<160x10xf32>
    %62 = arith.addf %57, %61 : vector<160x10xf32>
    %c3_68 = arith.constant 3 : index
    %c0_69 = arith.constant 0 : index
    %c0_70 = arith.constant 0 : index
    %63 = vector.load %arg6[%c3_68, %c0_69, %c0_70] : memref<5x160x84xf32, #tpu.memory_space<vmem>>, vector<1x160x84xf32>
    %64 = vector.shape_cast %63 : vector<1x160x84xf32> to vector<160x84xf32>
    %c0_71 = arith.constant 0 : index
    %c3_72 = arith.constant 3 : index
    %65 = vector.load %arg17[%c0_71, %c3_72] : memref<84x14xf32, #tpu.memory_space<vmem>>, vector<84x10xf32>
    %cst_73 = arith.constant dense<0.000000e+00> : vector<160x10xf32>
    %66 = tpu.matmul %64, %65, %cst_73 {dimension_numbers = #tpu.dot_dimension_numbers<[1], [0], [0], [1], [0, 0, 1, 1], [], []>} : vector<160x84xf32>, vector<84x10xf32>, vector<160x10xf32> -> vector<160x10xf32>
    %67 = arith.addf %62, %66 : vector<160x10xf32>
    %c4_74 = arith.constant 4 : index
    %c0_75 = arith.constant 0 : index
    %c0_76 = arith.constant 0 : index
    %68 = vector.load %arg6[%c4_74, %c0_75, %c0_76] : memref<5x160x84xf32, #tpu.memory_space<vmem>>, vector<1x160x84xf32>
    %69 = vector.shape_cast %68 : vector<1x160x84xf32> to vector<160x84xf32>
    %c0_77 = arith.constant 0 : index
    %c4_78 = arith.constant 4 : index
    %70 = vector.load %arg17[%c0_77, %c4_78] : memref<84x14xf32, #tpu.memory_space<vmem>>, vector<84x10xf32>
    %cst_79 = arith.constant dense<0.000000e+00> : vector<160x10xf32>
    %71 = tpu.matmul %69, %70, %cst_79 {dimension_numbers = #tpu.dot_dimension_numbers<[1], [0], [0], [1], [0, 0, 1, 1], [], []>} : vector<160x84xf32>, vector<84x10xf32>, vector<160x10xf32> -> vector<160x10xf32>
    %72 = arith.addf %67, %71 : vector<160x10xf32>
    %c0_80 = arith.constant 0 : index
    %c0_81 = arith.constant 0 : index
    %73 = vector.load %arg7[%c0_80, %c0_81] : memref<160x1xf32, #tpu.memory_space<vmem>>, vector<160x1xf32>
    %74 = vector.broadcast %73 : vector<160x1xf32> to vector<160x10xf32>
    %75 = arith.addf %72, %74 : vector<160x10xf32>
    %cst_82 = arith.constant 0.000000e+00 : f32
    %76 = vector.broadcast %cst_82 : f32 to vector<160x10xf32>
    %77 = arith.maximumf %75, %76 : vector<160x10xf32>
    %c0_83 = arith.constant 0 : index
    %c0_84 = arith.constant 0 : index
    %c0_85 = arith.constant 0 : index
    %78 = vector.load %arg8[%c0_83, %c0_84, %c0_85] : memref<2x10x5xf32, #tpu.memory_space<vmem>>, vector<1x10x5xf32>
    %79 = vector.shape_cast %78 : vector<1x10x5xf32> to vector<10x5xf32>
    %cst_86 = arith.constant dense<0.000000e+00> : vector<160x5xf32>
    %80 = tpu.matmul %77, %79, %cst_86 {dimension_numbers = #tpu.dot_dimension_numbers<[1], [0], [0], [1], [0, 0, 1, 1], [], []>} : vector<160x10xf32>, vector<10x5xf32>, vector<160x5xf32> -> vector<160x5xf32>
    %c1_87 = arith.constant 1 : index
    %c0_88 = arith.constant 0 : index
    %c0_89 = arith.constant 0 : index
    %81 = vector.load %arg8[%c1_87, %c0_88, %c0_89] : memref<2x10x5xf32, #tpu.memory_space<vmem>>, vector<1x10x5xf32>
    %82 = vector.shape_cast %81 : vector<1x10x5xf32> to vector<10x5xf32>
    %cst_90 = arith.constant dense<0.000000e+00> : vector<160x5xf32>
    %83 = tpu.matmul %77, %82, %cst_90 {dimension_numbers = #tpu.dot_dimension_numbers<[1], [0], [0], [1], [0, 0, 1, 1], [], []>} : vector<160x10xf32>, vector<10x5xf32>, vector<160x5xf32> -> vector<160x5xf32>
    %84 = arith.maximumf %80, %83 : vector<160x5xf32>
    %c0_91 = arith.constant 0 : index
    %c0_92 = arith.constant 0 : index
    %c0_93 = arith.constant 0 : index
    %85 = vector.load %arg9[%c0_91, %c0_92, %c0_93] : memref<2x80x160xf32, #tpu.memory_space<vmem>>, vector<1x80x160xf32>
    %86 = vector.shape_cast %85 : vector<1x80x160xf32> to vector<80x160xf32>
    %cst_94 = arith.constant dense<0.000000e+00> : vector<80x5xf32>
    %87 = tpu.matmul %86, %84, %cst_94 {dimension_numbers = #tpu.dot_dimension_numbers<[1], [0], [0], [1], [0, 0, 1, 1], [], []>} : vector<80x160xf32>, vector<160x5xf32>, vector<80x5xf32> -> vector<80x5xf32>
    %c1_95 = arith.constant 1 : index
    %c0_96 = arith.constant 0 : index
    %c0_97 = arith.constant 0 : index
    %88 = vector.load %arg9[%c1_95, %c0_96, %c0_97] : memref<2x80x160xf32, #tpu.memory_space<vmem>>, vector<1x80x160xf32>
    %89 = vector.shape_cast %88 : vector<1x80x160xf32> to vector<80x160xf32>
    %cst_98 = arith.constant dense<0.000000e+00> : vector<80x5xf32>
    %90 = tpu.matmul %89, %84, %cst_98 {dimension_numbers = #tpu.dot_dimension_numbers<[1], [0], [0], [1], [0, 0, 1, 1], [], []>} : vector<80x160xf32>, vector<160x5xf32>, vector<80x5xf32> -> vector<80x5xf32>
    %91 = arith.maximumf %87, %90 : vector<80x5xf32>
    %c0_99 = arith.constant 0 : index
    %c0_100 = arith.constant 0 : index
    %92 = vector.load %arg18[%c0_99, %c0_100] : memref<80x5xf32, #tpu.memory_space<vmem>>, vector<80x5xf32>
    tpu.vector_store %arg18[%c0_99, %c0_100], %91 {strides = array<i32>} : memref<80x5xf32, #tpu.memory_space<vmem>>, vector<80x5xf32>,
    %c0_101 = arith.constant 0 : index
    %c0_102 = arith.constant 0 : index
    %c0_103 = arith.constant 0 : index
    %93 = vector.load %arg10[%c0_101, %c0_102, %c0_103] : memref<5x120x80xf32, #tpu.memory_space<vmem>>, vector<1x120x80xf32>
    %94 = vector.shape_cast %93 : vector<1x120x80xf32> to vector<120x80xf32>
    %c0_104 = arith.constant 0 : index
    %c0_105 = arith.constant 0 : index
    %95 = vector.load %arg18[%c0_104, %c0_105] : memref<80x5xf32, #tpu.memory_space<vmem>>, vector<80x1xf32>
    %cst_106 = arith.constant dense<0.000000e+00> : vector<120x1xf32>
    %96 = tpu.matmul %94, %95, %cst_106 {dimension_numbers = #tpu.dot_dimension_numbers<[1], [0], [0], [1], [0, 0, 1, 1], [], []>} : vector<120x80xf32>, vector<80x1xf32>, vector<120x1xf32> -> vector<120x1xf32>
    %c1_107 = arith.constant 1 : index
    %c0_108 = arith.constant 0 : index
    %c0_109 = arith.constant 0 : index
    %97 = vector.load %arg10[%c1_107, %c0_108, %c0_109] : memref<5x120x80xf32, #tpu.memory_space<vmem>>, vector<1x120x80xf32>
    %98 = vector.shape_cast %97 : vector<1x120x80xf32> to vector<120x80xf32>
    %c0_110 = arith.constant 0 : index
    %c1_111 = arith.constant 1 : index
    %99 = vector.load %arg18[%c0_110, %c1_111] : memref<80x5xf32, #tpu.memory_space<vmem>>, vector<80x1xf32>
    %cst_112 = arith.constant dense<0.000000e+00> : vector<120x1xf32>
    %100 = tpu.matmul %98, %99, %cst_112 {dimension_numbers = #tpu.dot_dimension_numbers<[1], [0], [0], [1], [0, 0, 1, 1], [], []>} : vector<120x80xf32>, vector<80x1xf32>, vector<120x1xf32> -> vector<120x1xf32>
    %101 = arith.addf %96, %100 : vector<120x1xf32>
    %c2_113 = arith.constant 2 : index
    %c0_114 = arith.constant 0 : index
    %c0_115 = arith.constant 0 : index
    %102 = vector.load %arg10[%c2_113, %c0_114, %c0_115] : memref<5x120x80xf32, #tpu.memory_space<vmem>>, vector<1x120x80xf32>
    %103 = vector.shape_cast %102 : vector<1x120x80xf32> to vector<120x80xf32>
    %c0_116 = arith.constant 0 : index
    %c2_117 = arith.constant 2 : index
    %104 = vector.load %arg18[%c0_116, %c2_117] : memref<80x5xf32, #tpu.memory_space<vmem>>, vector<80x1xf32>
    %cst_118 = arith.constant dense<0.000000e+00> : vector<120x1xf32>
    %105 = tpu.matmul %103, %104, %cst_118 {dimension_numbers = #tpu.dot_dimension_numbers<[1], [0], [0], [1], [0, 0, 1, 1], [], []>} : vector<120x80xf32>, vector<80x1xf32>, vector<120x1xf32> -> vector<120x1xf32>
    %106 = arith.addf %101, %105 : vector<120x1xf32>
    %c3_119 = arith.constant 3 : index
    %c0_120 = arith.constant 0 : index
    %c0_121 = arith.constant 0 : index
    %107 = vector.load %arg10[%c3_119, %c0_120, %c0_121] : memref<5x120x80xf32, #tpu.memory_space<vmem>>, vector<1x120x80xf32>
    %108 = vector.shape_cast %107 : vector<1x120x80xf32> to vector<120x80xf32>
    %c0_122 = arith.constant 0 : index
    %c3_123 = arith.constant 3 : index
    %109 = vector.load %arg18[%c0_122, %c3_123] : memref<80x5xf32, #tpu.memory_space<vmem>>, vector<80x1xf32>
    %cst_124 = arith.constant dense<0.000000e+00> : vector<120x1xf32>
    %110 = tpu.matmul %108, %109, %cst_124 {dimension_numbers = #tpu.dot_dimension_numbers<[1], [0], [0], [1], [0, 0, 1, 1], [], []>} : vector<120x80xf32>, vector<80x1xf32>, vector<120x1xf32> -> vector<120x1xf32>
    %111 = arith.addf %106, %110 : vector<120x1xf32>
    %c4_125 = arith.constant 4 : index
    %c0_126 = arith.constant 0 : index
    %c0_127 = arith.constant 0 : index
    %112 = vector.load %arg10[%c4_125, %c0_126, %c0_127] : memref<5x120x80xf32, #tpu.memory_space<vmem>>, vector<1x120x80xf32>
    %113 = vector.shape_cast %112 : vector<1x120x80xf32> to vector<120x80xf32>
    %c0_128 = arith.constant 0 : index
    %c4_129 = arith.constant 4 : index
    %114 = vector.load %arg18[%c0_128, %c4_129] : memref<80x5xf32, #tpu.memory_space<vmem>>, vector<80x1xf32>
    %cst_130 = arith.constant dense<0.000000e+00> : vector<120x1xf32>
    %115 = tpu.matmul %113, %114, %cst_130 {dimension_numbers = #tpu.dot_dimension_numbers<[1], [0], [0], [1], [0, 0, 1, 1], [], []>} : vector<120x80xf32>, vector<80x1xf32>, vector<120x1xf32> -> vector<120x1xf32>
    %116 = arith.addf %111, %115 : vector<120x1xf32>
    %c0_131 = arith.constant 0 : index
    %c0_132 = arith.constant 0 : index
    %117 = vector.load %arg11[%c0_131, %c0_132] : memref<120x1xf32, #tpu.memory_space<vmem>>, vector<120x1xf32>
    %118 = arith.addf %116, %117 : vector<120x1xf32>
    %cst_133 = arith.constant 0.000000e+00 : f32
    %119 = vector.broadcast %cst_133 : f32 to vector<120x1xf32>
    %120 = arith.maximumf %118, %119 : vector<120x1xf32>
    %c0_134 = arith.constant 0 : index
    %c0_135 = arith.constant 0 : index
    %121 = vector.load %arg12[%c0_134, %c0_135] : memref<84x120xf32, #tpu.memory_space<vmem>>, vector<84x120xf32>
    %cst_136 = arith.constant dense<0.000000e+00> : vector<84x1xf32>
    %122 = tpu.matmul %121, %120, %cst_136 {dimension_numbers = #tpu.dot_dimension_numbers<[1], [0], [0], [1], [0, 0, 1, 1], [], []>} : vector<84x120xf32>, vector<120x1xf32>, vector<84x1xf32> -> vector<84x1xf32>
    %c0_137 = arith.constant 0 : index
    %c0_138 = arith.constant 0 : index
    %123 = vector.load %arg13[%c0_137, %c0_138] : memref<84x1xf32, #tpu.memory_space<vmem>>, vector<84x1xf32>
    %124 = arith.addf %122, %123 : vector<84x1xf32>
    %cst_139 = arith.constant 0.000000e+00 : f32
    %125 = vector.broadcast %cst_139 : f32 to vector<84x1xf32>
    %126 = arith.maximumf %124, %125 : vector<84x1xf32>
    %c0_140 = arith.constant 0 : index
    %c0_141 = arith.constant 0 : index
    %127 = vector.load %arg14[%c0_140, %c0_141] : memref<10x84xf32, #tpu.memory_space<vmem>>, vector<10x84xf32>
    %cst_142 = arith.constant dense<0.000000e+00> : vector<10x1xf32>
    %128 = tpu.matmul %127, %126, %cst_142 {dimension_numbers = #tpu.dot_dimension_numbers<[1], [0], [0], [1], [0, 0, 1, 1], [], []>} : vector<10x84xf32>, vector<84x1xf32>, vector<10x1xf32> -> vector<10x1xf32>
    %c0_143 = arith.constant 0 : index
    %c0_144 = arith.constant 0 : index
    %129 = vector.load %arg15[%c0_143, %c0_144] : memref<10x1xf32, #tpu.memory_space<vmem>>, vector<10x1xf32>
    %130 = arith.addf %128, %129 : vector<10x1xf32>
    %c0_145 = arith.constant 0 : index
    %c0_146 = arith.constant 0 : index
    %c0_147 = arith.constant 0 : index
    %131 = vector.load %arg16[%c0_145, %c0_146, %c0_147] : memref<1x10x1xf32, #tpu.memory_space<vmem>>, vector<1x10x1xf32>
    %132 = vector.shape_cast %131 : vector<1x10x1xf32> to vector<10x1xf32>
    %133 = vector.shape_cast %130 : vector<10x1xf32> to vector<1x10x1xf32>
    tpu.vector_store %arg16[%c0_145, %c0_146, %c0_147], %133 {strides = array<i32>} : memref<1x10x1xf32, #tpu.memory_space<vmem>>, vector<1x10x1xf32>,
    return
  }
  func.func @transform_0(%arg0: i32) -> (i32, i32, i32) {
    %c0_i32 = arith.constant 0 : i32
    %c0_i32_0 = arith.constant 0 : i32
    %c0_i32_1 = arith.constant 0 : i32
    return %arg0, %c0_i32, %c0_i32_0 : i32, i32, i32
  }
  func.func @transform_1(%arg0: i32) -> (i32, i32, i32) {
    %c0_i32 = arith.constant 0 : i32
    %c0_i32_0 = arith.constant 0 : i32
    %c0_i32_1 = arith.constant 0 : i32
    %c0_i32_2 = arith.constant 0 : i32
    return %c0_i32, %c0_i32_0, %c0_i32_1 : i32, i32, i32
  }
  func.func @transform_2(%arg0: i32) -> (i32, i32) {
    %c0_i32 = arith.constant 0 : i32
    %c0_i32_0 = arith.constant 0 : i32
    %c0_i32_1 = arith.constant 0 : i32
    return %c0_i32, %c0_i32_0 : i32, i32
  }
  func.func @transform_3(%arg0: i32) -> (i32, i32, i32) {
    %c0_i32 = arith.constant 0 : i32
    %c0_i32_0 = arith.constant 0 : i32
    %c0_i32_1 = arith.constant 0 : i32
    %c0_i32_2 = arith.constant 0 : i32
    return %c0_i32, %c0_i32_0, %c0_i32_1 : i32, i32, i32
  }
  func.func @transform_4(%arg0: i32) -> (i32, i32, i32) {
    %c0_i32 = arith.constant 0 : i32
    %c0_i32_0 = arith.constant 0 : i32
    %c0_i32_1 = arith.constant 0 : i32
    %c0_i32_2 = arith.constant 0 : i32
    return %c0_i32, %c0_i32_0, %c0_i32_1 : i32, i32, i32
  }
  func.func @transform_5(%arg0: i32) -> (i32, i32, i32) {
    %c0_i32 = arith.constant 0 : i32
    %c0_i32_0 = arith.constant 0 : i32
    %c0_i32_1 = arith.constant 0 : i32
    %c0_i32_2 = arith.constant 0 : i32
    return %c0_i32, %c0_i32_0, %c0_i32_1 : i32, i32, i32
  }
  func.func @transform_6(%arg0: i32) -> (i32, i32) {
    %c0_i32 = arith.constant 0 : i32
    %c0_i32_0 = arith.constant 0 : i32
    %c0_i32_1 = arith.constant 0 : i32
    return %c0_i32, %c0_i32_0 : i32, i32
  }
  func.func @transform_7(%arg0: i32) -> (i32, i32, i32) {
    %c0_i32 = arith.constant 0 : i32
    %c0_i32_0 = arith.constant 0 : i32
    %c0_i32_1 = arith.constant 0 : i32
    %c0_i32_2 = arith.constant 0 : i32
    return %c0_i32, %c0_i32_0, %c0_i32_1 : i32, i32, i32
  }
  func.func @transform_8(%arg0: i32) -> (i32, i32, i32) {
    %c0_i32 = arith.constant 0 : i32
    %c0_i32_0 = arith.constant 0 : i32
    %c0_i32_1 = arith.constant 0 : i32
    %c0_i32_2 = arith.constant 0 : i32
    return %c0_i32, %c0_i32_0, %c0_i32_1 : i32, i32, i32
  }
  func.func @transform_9(%arg0: i32) -> (i32, i32, i32) {
    %c0_i32 = arith.constant 0 : i32
    %c0_i32_0 = arith.constant 0 : i32
    %c0_i32_1 = arith.constant 0 : i32
    %c0_i32_2 = arith.constant 0 : i32
    return %c0_i32, %c0_i32_0, %c0_i32_1 : i32, i32, i32
  }
  func.func @transform_10(%arg0: i32) -> (i32, i32) {
    %c0_i32 = arith.constant 0 : i32
    %c0_i32_0 = arith.constant 0 : i32
    %c0_i32_1 = arith.constant 0 : i32
    return %c0_i32, %c0_i32_0 : i32, i32
  }
  func.func @transform_11(%arg0: i32) -> (i32, i32) {
    %c0_i32 = arith.constant 0 : i32
    %c0_i32_0 = arith.constant 0 : i32
    %c0_i32_1 = arith.constant 0 : i32
    return %c0_i32, %c0_i32_0 : i32, i32
  }
  func.func @transform_12(%arg0: i32) -> (i32, i32) {
    %c0_i32 = arith.constant 0 : i32
    %c0_i32_0 = arith.constant 0 : i32
    %c0_i32_1 = arith.constant 0 : i32
    return %c0_i32, %c0_i32_0 : i32, i32
  }
  func.func @transform_13(%arg0: i32) -> (i32, i32) {
    %c0_i32 = arith.constant 0 : i32
    %c0_i32_0 = arith.constant 0 : i32
    %c0_i32_1 = arith.constant 0 : i32
    return %c0_i32, %c0_i32_0 : i32, i32
  }
  func.func @transform_14(%arg0: i32) -> (i32, i32) {
    %c0_i32 = arith.constant 0 : i32
    %c0_i32_0 = arith.constant 0 : i32
    %c0_i32_1 = arith.constant 0 : i32
    return %c0_i32, %c0_i32_0 : i32, i32
  }
  func.func @transform_15(%arg0: i32) -> (i32, i32, i32) {
    %c0_i32 = arith.constant 0 : i32
    %c0_i32_0 = arith.constant 0 : i32
    %c0_i32_1 = arith.constant 0 : i32
    return %arg0, %c0_i32, %c0_i32_0 : i32, i32, i32
  }
}

</mosaic_0001>

<bundles_post_ra>
// kernel: lenet_forward.1
= control target key start
LH: loop header
LB: loop body
LE: loop exit
PB: predicated region body
PF: predicated region fallthrough
CT: control target
= control target key end

     0   :  { %s13923_s0 = inlined_call_operand.hbm [shape: f32[2,96,32], index: 0, kind: input, shape index: {}]   ;;  %s13924_s1 = inlined_call_operand.vmem [shape: f32[5,168,96], index: 1, kind: input, shape index: {}]   ;;  %s13925_s2 = inlined_call_operand.vmem [shape: f32[168,1], index: 2, kind: input, shape index: {}]   ;;  %s13926_s3 = inlined_call_operand.vmem [shape: f32[2,28,14], index: 3, kind: input, shape index: {}]   ;;  %s13927_s4 = inlined_call_operand.vmem [shape: f32[2,84,168], index: 4, kind: input, shape index: {}]   ;;  %s13928_s5 = inlined_call_operand.vmem [shape: f32[5,160,84], index: 5, kind: input, shape index: {}]   ;;  %s13929_s6 = inlined_call_operand.vmem [shape: f32[160,1], index: 6, kind: input, shape index: {}]   ;;  %s13930_s7 = inlined_call_operand.vmem [shape: f32[2,10,5], index: 7, kind: input, shape index: {}]   ;;  %s13931_s8 = inlined_call_operand.hbm [shape: f32[2,80,160], index: 8, kind: input, shape index: {}]   ;;  %s13932_s9 = inlined_call_operand.vmem [shape: f32[5,120,80], index: 9, kind: input, shape index: {}]   ;;  %s13933_s10 = inlined_call_operand.vmem [shape: f32[120,1], index: 10, kind: input, shape index: {}]   ;;  %s13934_s11 = inlined_call_operand.hbm [shape: f32[84,120], index: 11, kind: input, shape index: {}]   ;;  %s13935_s12 = inlined_call_operand.vmem [shape: f32[84,1], index: 12, kind: input, shape index: {}]   ;;  %s13936_s13 = inlined_call_operand.vmem [shape: f32[10,84], index: 13, kind: input, shape index: {}]   ;;  %s13937_s14 = inlined_call_operand.vmem [shape: f32[10,1], index: 14, kind: input, shape index: {}]   ;;  %s13938_s15 = inlined_call_operand.vmem [shape: f32[2,10,1], index: 15, kind: output, shape index: {}]  }
   0x1   :  { %13948 = sst [smem:[#allocation11_spill]] %s13933_s10 }
   0x2   :  { %13949 = sst [smem:[#allocation12_spill]] %s13935_s12 }
   0x3   :  { %13950 = sst [smem:[#allocation13_spill]] %s13936_s13 }
   0x4   :  { %13951 = sst [smem:[#allocation14_spill]] %s13937_s14 }
   0x5   :  { %13952 = sst [smem:[#allocation15_spill]] %s13938_s15 }
   0x6   :  { %20 = vsyncpa [#allocation5], 0 }
   0x7   :  { %22 = vsyncpa [#allocation5 + $0x1], 0 }
   0x8   :  { %23 = vsyncpa [#allocation7], 0  ;;  %s10774_s18 = smov 0   ;;  %s10776_s19 = smov 0  }
   0x9   :  { %s10778_s20 = smov 0   ;;  %s10780_s21 = smov 0  }
   0xa LB: > { %s10793_s22 = sadd.s32 4294967295, %s10676_s21   ;;  %p49_p0 = scmp.ne.s32.totalorder %s10668_s19, %s10664_s18  ;;  %s10676_s21 = sphi %s10780_s21, %s13974_s21   ;;  %s10672_s20 = sphi %s10778_s20, %s13973_s20   ;;  %s10668_s19 = sphi %s10776_s19, %s13972_s19   ;;  %s10664_s18 = sphi %s10774_s18, %s13971_s18  }
   0xb   : > { %p13940_p1 = scmp.eq.s32.totalorder %s10793_s22, 0  ;;  %p7022_p2 = scmp.ge.s32.totalorder %s10676_s21, 1 }
   0xc   : > { %p380_p3 = scmp.lt.s32.totalorder %s10676_s21, 3  ;;  %s10678_s25 = smov [#allocation6]  }
   0xd   : > { %p10801_p4 = por %p13940_p1, %p49_p0  ;;  %s413_s26 = sshll.u32 %s10678_s25, 4  ;;  %s414_s26 = int_to_ptr.vmem [resolvable:$true] %s413_s26 }
   0xe   : > { %p10805_p5 = pnand %p7022_p2, %p380_p3  ;;  %s10679_s28 = smov [#allocation8]  }
   0xf   : > { %s13953_s23 = scalar_select %p10801_p4, 1, 0 }
  0x10   : > { %s13954_s24 = scalar_select %p10805_p5, 1, 0 }
  0x11   : > { %p10167_p6 = pneg %p10805_p5  ;;  %s432_s29 = sshll.u32 %s10679_s28, 4  ;;  %s10817_s29 = int_to_ptr.vmem [resolvable:$true] %s432_s29 }
  0x12   : > { %s10552_s17 = scalar_lea.hbm %s13931_s8, 5120 }
  0x13   : > { %p10813_p7 = pnand %p10167_p6, %p13940_p1  ;;  %p10553_p8 = scmp.ne.s32.totalorder %s13931_s8, %s10552_s17 }
  0x14   : > { %p10559_p12 = scmp.lt.u32.totalorder %s10552_s17, %s13931_s8 }
  0x15   : > { %p10554_p9 = pneg %p10813_p7 }
  0x17   : > { %p10555_p10 = pnand %p10554_p9, %p10553_p8 }
  0x19   : > { %p10556_p11 = pneg %p10555_p10 }
  0x1b   : > { %p10561_p13 = pnand %p10559_p12, %p10556_p11 }
  0x1d   : > { %10564 = shalt.err (!%p10561_p13)
}
  0x1e   : > { %s10565_s28 = scalar_lea.vmem %s414_s26, 5120  ;;  %p10573_p6 = scmp.lt.s32.totalorder %s414_s26, %s414_s26 }
  0x1f   : > { %p10566_p0 = scmp.ne.s32.totalorder %s414_s26, %s10565_s28  ;;  %p10574_p1 = scmp.lt.s32.totalorder %s10565_s28, %s10565_s28 }
  0x21   : > { %p10568_p2 = pnand %p10566_p0, %p10554_p9  ;;  %p10575_p4 = por %p10574_p1, %p10573_p6 }
  0x23   : > { %p10569_p3 = pneg %p10568_p2 }
  0x25   : > { %p10576_p5 = pnand %p10575_p4, %p10569_p3 }
  0x27   : > { %10579 = shalt.err (!%p10576_p5)
}
  0x28   : > { %s10680_s30 = smov 256   ;;  %s10681_s16 = smov 16  }
  0x29   : > { %10170 = dma.hbm_to_vmem [thread:$0]  (!%p10813_p7), %s13931_s8, 5120, %s414_s26, [#allocation7], %s10680_s30, %s10680_s30, %s10681_s16  }
  0x2a   : > { %s10580_s25 = scalar_lea.hbm %s13934_s11, 1408 }
  0x2b   : > { %p10581_p8 = scmp.ne.s32.totalorder %s13934_s11, %s10580_s25  ;;  %p10587_p5 = scmp.lt.u32.totalorder %s10580_s25, %s13934_s11 }
  0x2d   : > { %p10583_p1 = pnand %p10581_p8, %p10554_p9 }
  0x2f   : > { %p10584_p4 = pneg %p10583_p1 }
  0x31   : > { %p10589_p10 = pnand %p10587_p5, %p10584_p4 }
  0x33   : > { %10592 = shalt.err (!%p10589_p10)
}
  0x34   : > { %s10593_s26 = scalar_lea.vmem %s10817_s29, 1408  ;;  %p10601_p0 = scmp.lt.s32.totalorder %s10817_s29, %s10817_s29 }
  0x35   : > { %p10594_p11 = scmp.ne.s32.totalorder %s10817_s29, %s10593_s26  ;;  %p10602_p2 = scmp.lt.s32.totalorder %s10593_s26, %s10593_s26 }
  0x37   : > { %p10596_p12 = pnand %p10594_p11, %p10554_p9  ;;  %p10603_p3 = por %p10602_p2, %p10601_p0 }
  0x39   : > { %p10597_p13 = pneg %p10596_p12 }
  0x3b   : > { %p10604_p6 = pnand %p10603_p3, %p10597_p13 }
  0x3d   : > { %10607 = shalt.err (!%p10604_p6)
}
  0x3e   : > { %s13946_s10 = smov 128   ;;  %s13947_s12 = smov 8  }
  0x3f   : > { %10173 = dma.hbm_to_vmem [thread:$0]  (!%p10813_p7), %s13934_s11, 1408, %s10817_s29, [#allocation7], %s13946_s10, %s13946_s10, %s13947_s12  }
  0x40   : > { %s10870_s16 = sadd.s32 1, %s10676_s21   ;;  %s36_s15 = sadd.s32 1, %s10672_s20 }
  0x41   : > { %s33_s14 = ssub.s32 %s10676_s21, %s10870_s16  ;;  %p43_p8 = scmp.ne.s32.totalorder %s10672_s20, %s10668_s19 }
  0x42   : > { %p34_p9 = scmp.eq.s32.totalorder %s33_s14, 0  ;;  %p44_p1 = scmp.eq.s32.totalorder %s10676_s21, 0 }
  0x43   : > { %p10180_p5 = scmp.lt.s32.totalorder %s10676_s21, 2  ;;  %s455_s27 = sand.u32 1, %s10672_s20  }
  0x44   : > { %s10879_s17 = scalar_select %p34_p9, %s10672_s20, %s36_s15  }
  0x45   : > { %p45_p4 = por %p44_p1, %p43_p8  ;;  %s10155_s18 = smul.u32 1536, %s10676_s21 }
  0x46   : > { %s10154_s25 = smul.u32 96, %s455_s27  ;;  %s10895_s21 = scalar_lea.sflag [#allocation5], %s455_s27 }
  0x47   : > { %p10884_p10 = pnand %p10180_p5, %p45_p4  ;;  %s10891_s13 = scalar_lea.hbm %s13923_s0, %s10155_s18 }
  0x48   : > { %s459_s30 = scalar_lea.vmem [#allocation4], %s10154_s25  ;;  %s10608_s15 = scalar_lea.hbm %s10891_s13, 1536 }
  0x49   : > { %s466_s14 = sshll.u32 %s459_s30, 4  ;;  %p10609_p7 = scmp.ne.s32.totalorder %s10891_s13, %s10608_s15  ;;  %s10893_s14 = int_to_ptr.vmem [resolvable:$true] %s466_s14 }
  0x4a   : > { %p10610_p11 = pneg %p10884_p10  ;;  %s10613_s26 = scalar_lea.hbm %s13923_s0, 3072 }
  0x4b   : > { %p10614_p0 = scmp.lt.u32.totalorder %s10891_s13, %s13923_s0  ;;  %p10615_p2 = scmp.lt.u32.totalorder %s10613_s26, %s10608_s15 }
  0x4c   : > { %p10611_p12 = pnand %p10610_p11, %p10609_p7  ;;  %p10617_p6 = scmp.lt.u32.totalorder %s10608_s15, %s10891_s13 }
  0x4d   : > { %p10616_p3 = por %p10615_p2, %p10614_p0 }
  0x4e   : > { %p10612_p13 = pneg %p10611_p12 }
  0x4f   : > { %p10618_p9 = por %p10617_p6, %p10616_p3 }
  0x51   : > { %p10619_p8 = pnand %p10618_p9, %p10612_p13 }
  0x53   : > { %10622 = shalt.err (!%p10619_p8)
}
  0x54   : > { %s10623_s27 = scalar_lea.vmem %s10893_s14, 1536  ;;  %s10684_s25 = smov [#allocation4]  }
  0x55   : > { %p10624_p1 = scmp.ne.s32.totalorder %s10893_s14, %s10623_s27  ;;  %s10628_s30 = sshll.u32 %s10684_s25, 4  ;;  %s10629_s30 = int_to_ptr.vmem [resolvable:$false] %s10628_s30 }
  0x56   : > { %s10630_s10 = scalar_lea.vmem %s10629_s30, 3072  ;;  %p10631_p7 = scmp.lt.s32.totalorder %s10893_s14, %s10629_s30 }
  0x57   : > { %p10626_p4 = pnand %p10624_p1, %p10610_p11  ;;  %p10632_p12 = scmp.lt.s32.totalorder %s10630_s10, %s10623_s27 }
  0x59   : > { %p10627_p5 = pneg %p10626_p4  ;;  %p10633_p0 = por %p10632_p12, %p10631_p7 }
  0x5b   : > { %p10634_p2 = pnand %p10633_p0, %p10627_p5 }
  0x5d   : > { %10637 = shalt.err (!%p10634_p2)
}
  0x5e   : > { %s13957_s12 = smov 8   ;;  %s13958_s15 = smov 128  }
  0x5f   : > { %10177 = dma.hbm_to_vmem [thread:$0]  (!%p10884_p10), %s10891_s13, 1536, %s10893_s14, %s10895_s21, %s13958_s15, %s13958_s15, %s13957_s12  }
  0x60   : > { %p13959_p11 = scmp.ne.s32.totalorder %s13954_s24, 0 }
  0x61   : > { %s480_s18 = sand.u32 (!%p13959_p11), 1, %s10668_s19   ;;  %p13960_p13 = scmp.ne.s32.totalorder (!%p13959_p11), %s13953_s23, 0 }
  0x62   : > { %478 = sbr.rel (%p13959_p11) target bundleno = 3335 (0xd07), region = 80  ;;  %s481_s26 = scalar_lea.sflag (!%p13959_p11), [#allocation5], %s480_s18 }
  0x63   : > { %s10156_s29 = smul.u32 (!%p13959_p11), 96, %s480_s18 }
  0x65   : > { %s484_s27 = scalar_lea.vmem (!%p13959_p11), [#allocation4], %s10156_s29 }
  0x69   : > { %10655 = dma.done.wait (%p13960_p13), %s481_s26, 1536  }
  0x6a   : > { %10657 = vsyncadd (%p13960_p13), %s481_s26, 4294965760  ;;  %p13961_p3 = scmp.eq.s32.totalorder %s10793_s22, 0 }
  0x6c   : > { %10659 = dma.done.wait (%p13961_p3), [#allocation7], 6528   ;;  %p13962_p6 = pmov %p13961_p3 }
  0x6d   : > { %v10685_v0 = vmov 0.0|0.0   ;;  %v565_v1 = vld [vmem:[%s484_s27] sm:$0xff]  ;;  %v566_v2 = vld [vmem:[%s484_s27 + $0x8] sm:$0xff]  ;;  %v567_v3 = vld [vmem:[%s484_s27 + $0x10] sm:$0xff]  ;;  %s10686_s23 = smov 127   ;;  %vm10687_vm0 = vmmov 0  }
  0x6e   : > { %10661 = vsyncadd (%p13962_p6), [#allocation7], 4294960768  ;;  %9628 = vmatprep.subr.bf16.mxu1 %v10685_v0  ;;  %9610 = vmatprep.subr.bf16.mxu0 %v10685_v0  ;;  %v10230_v4 = vpack.i.bf16 %v566_v2, %v565_v1  ;;  %v568_v5 = vld [vmem:[%s484_s27 + $0x18] sm:$0xff]  ;;  %v569_v6 = vld [vmem:[%s484_s27 + $0x20] sm:$0xff]  ;;  %v9629_v8 = vpack.c.bf16 %v566_v2, %v565_v1  ;;  %v10688_v22 = vmov 0.0   ;;  %s10689_s24 = smov 126  }
  0x6f   : > { %v570_v7 = vld [vmem:[%s484_s27 + $0x28] sm:$0xff]  ;;  %v571_v10 = vld [vmem:[%s484_s27 + $0x30] sm:$0xff]  ;;  %v572_v11 = vld [vmem:[%s484_s27 + $0x38] sm:$0xff]  ;;  %v10942_v12 = vpack.i.bf16 %v568_v5, %v567_v3  ;;  %v9632_v18 = vpack.c.bf16 %v568_v5, %v567_v3  ;;  %8403 = vmatprep.mubr.msk.f32.mxu1 %vm10687_vm0, %v10688_v22  ;;  %8316 = vmatprep.mubr.msk.f32.mxu0 %vm10687_vm0, %v10688_v22  ;;  %vm647_vm1 = vcmask 785408   ;;  %s10690_s14 = smov 125   ;;  %s10691_s30 = smov 124  }
  0x70   : > { %v10939_v9 = vpack.i.bf16 %v570_v7, %v569_v6  ;;  %10231 = vrot.lane.b32.xlu0 %v10230_v4, %s10686_s23  ;;  %v10946_v13 = vpack.i.bf16 %v572_v11, %v571_v10  ;;  %v573_v14 = vld [vmem:[%s484_s27 + $0x40] sm:$0xff]  ;;  %v574_v15 = vld [vmem:[%s484_s27 + $0x48] sm:$0xff]  ;;  %v575_v16 = vld [vmem:[%s484_s27 + $0x50] sm:$0xff]  ;;  %9630 = vmatpush3.bf16.msra.mxu1 %v9629_v8  ;;  %v9635_v21 = vpack.c.bf16 %v570_v7, %v569_v6  ;;  %vm2286_vm2 = vcmask 1043456   ;;  %s13965_s21 = sld [smem:[#allocation11_spill]]  ;;  %s13968_s15 = sld [smem:[#allocation12_spill]] }
  0x71   : > { %v576_v17 = vld [vmem:[%s484_s27 + $0x58] sm:$0xff]  ;;  %9631 = vmatprep.subr.bf16.mxu1 %v10685_v0  ;;  %v10951_v19 = vpack.i.bf16 %v574_v15, %v573_v14  ;;  %v9638_v23 = vpack.c.bf16 %v572_v11, %v571_v10  ;;  %v9641_v24 = vpack.c.bf16 %v574_v15, %v573_v14  ;;  %v545_v27 = vld [vmem:[%s13924_s1 + $0x8] sm:$0xff]  ;;  %v546_v28 = vld [vmem:[%s13924_s1 + $0x10] sm:$0xff]  ;;  %vm10693_vm3 = vmmov 1   ;;  %p539_p10 = scmp.lt.s32.totalorder %s10793_s22, 1  ;;  %s13969_s29 = sld [smem:[#allocation14_spill]] }
  0x72   : > { %10241 = vrot.lane.b32.xlu1 %v10939_v9, %s10686_s23  ;;  %v10955_v20 = vpack.i.bf16 %v576_v17, %v575_v16  ;;  %v9644_v25 = vpack.c.bf16 %v576_v17, %v575_v16  ;;  %v544_v26 = vld [vmem:[%s13924_s1] sm:$0xff]  ;;  %v547_v29 = vld [vmem:[%s13924_s1 + $0x18] sm:$0xff]  ;;  %v549_v31 = vld [vmem:[%s13924_s1 + $0x28] sm:$0xff]  ;;  %vm2222_vm5 = vcmask 228352   ;;  %vm2681_vm6 = vcmask 326656   ;;  %s13970_s13 = sld [smem:[#allocation15_spill]] }
  0x73   : > { %v548_v30 = vld [vmem:[%s13924_s1 + $0x20] sm:$0xff]  ;;  %v550_v32 = vld [vmem:[%s13924_s1 + $0x30] sm:$0xff]  ;;  %v551_v33 = vld [vmem:[%s13924_s1 + $0x38] sm:$0xff]  ;;  %vm3022_vm7 = vcmask 113664   ;;  %vm3033_vm8 = vcmask 109568   ;;  %vm3130_vm9 = vcmask 687104  }
  0x74   : > { %10236 = vrot.lane.b32.xlu0 %v10942_v12, %s10686_s23  ;;  %9633 = vmatpush3.bf16.msra.mxu1 %v9632_v18  ;;  %v552_v34 = vld [vmem:[%s13924_s1 + $0x40] sm:$0xff]  ;;  %v553_v35 = vld [vmem:[%s13924_s1 + $0x48] sm:$0xff]  ;;  %v554_v36 = vld [vmem:[%s13924_s1 + $0x50] sm:$0xff]  ;;  %vm4708_vm10 = vcmask 1041408   ;;  %vm4647_vm12 = vcmask 80896   ;;  %vm5088_vm13 = vcmask 261120  }
  0x75   : > { %9634 = vmatprep.subr.bf16.mxu1 %v10685_v0  ;;  %v555_v37 = vld [vmem:[%s13924_s1 + $0x58] sm:$0xff]  ;;  %v556_v38 = vld [vmem:[%s13924_s1 + $0x60] sm:$0xff]  ;;  %v557_v39 = vld [vmem:[%s13924_s1 + $0x68] sm:$0xff]  ;;  %vm5410_vm14 = vcmask 39936   ;;  %vm5502_vm15 = vcmask 654336   ;;  %s13976_s22 = smov (!%p539_p10, %s10793_s22), 1 }
  0x76   : > { %10246 = vrot.lane.b32.xlu1 %v10946_v13, %s10686_s23  ;;  %v558_v40 = vld [vmem:[%s13924_s1 + $0x70] sm:$0xff]  ;;  %v559_v41 = vld [vmem:[%s13924_s1 + $0x78] sm:$0xff]  ;;  %v560_v42 = vld [vmem:[%s13924_s1 + $0x80] sm:$0xff]  ;;  %s7713_s10 = sshll.u32 %s13976_s22, 4 }
  0x77   : > { %v561_v43 = vld [vmem:[%s13924_s1 + $0x88] sm:$0xff]  ;;  %v562_v44 = vld [vmem:[%s13924_s1 + $0x90] sm:$0xff]  ;;  %v563_v45 = vld [vmem:[%s13924_s1 + $0x98] sm:$0xff] }
  0x78   : > { %10251 = vrot.lane.b32.xlu0 %v10951_v19, %s10686_s23  ;;  %9636 = vmatpush3.bf16.msra.mxu1 %v9635_v21  ;;  %v564_v46 = vld [vmem:[%s13924_s1 + $0xa0] sm:$0xff]  ;;  %v7032_v18 = vld [vmem:[%s13924_s1 + $0xa8] sm:$0xff]  ;;  %vm9705_vm4 = vmpackc.low %vm2286_vm2, %vm10693_vm3 }
  0x79   : > { %9637 = vmatprep.subr.bf16.mxu1 %v10685_v0  ;;  %vm12931_vm11 = vmpackc.low %vm4708_vm10, %vm10693_vm3 }
  0x7a   : > { %10256 = vrot.lane.b32.xlu1 %v10955_v20, %s10686_s23 }
  0x7c   : > { %10261 = vrot.lane.b32.xlu0 %v10230_v4, %s10689_s24  ;;  %9639 = vmatpush3.bf16.msra.mxu1 %v9638_v23 }
  0x7d   : > { %9640 = vmatprep.subr.bf16.mxu1 %v10685_v0 }
  0x7e   : > { %10266 = vrot.lane.b32.xlu1 %v10942_v12, %s10689_s24 }
  0x80   : > { %10271 = vrot.lane.b32.xlu0 %v10939_v9, %s10689_s24  ;;  %9642 = vmatpush3.bf16.msra.mxu1 %v9641_v24 }
  0x81   : > { %9643 = vmatprep.subr.bf16.mxu1 %v10685_v0 }
  0x82   : > { %10276 = vrot.lane.b32.xlu1 %v10946_v13, %s10689_s24 }
  0x84   : > { %10281 = vrot.lane.b32.xlu0 %v10951_v19, %s10689_s24  ;;  %9645 = vmatpush3.bf16.msra.mxu1 %v9644_v25 }
  0x85   : > { %9664 = vmatprep.subr.bf16.mxu1 %v10685_v0 }
  0x86   : > { %10286 = vrot.lane.b32.xlu1 %v10955_v20, %s10689_s24 }
  0x87   : > { %8404 = vmatmul.mubr.msk.f32.vlgmr.msra.gmra.mrb[0].mxu1 %vm647_vm1, %v544_v26 }
  0x88   : > { %10291 = vrot.lane.b32.xlu0 %v10230_v4, %s10690_s14  ;;  %8406 = vmatprep.mubr.msk.f32.mxu1 %vm10687_vm0, %v10688_v22 }
  0x8a   : > { %10296 = vrot.lane.b32.xlu1 %v10942_v12, %s10690_s14 }
  0x8b   : > { %8407 = vmatmul.mubr.msk.f32.gmra.mrb[2].mxu1 %vm647_vm1, %v545_v27 }
  0x8c   : > { %10301 = vrot.lane.b32.xlu0 %v10939_v9, %s10690_s14  ;;  %8409 = vmatprep.mubr.msk.f32.mxu1 %vm10687_vm0, %v10688_v22 }
  0x8e   : > { %10306 = vrot.lane.b32.xlu1 %v10230_v4, %s10691_s30 }
  0x8f   : > { %8410 = vmatmul.mubr.msk.f32.gmra.mrb[4].mxu1 %vm647_vm1, %v546_v28 }
  0x90   : > { %10311 = vrot.lane.b32.xlu0 %v10946_v13, %s10690_s14  ;;  %8412 = vmatprep.mubr.msk.f32.mxu1 %vm10687_vm0, %v10688_v22 }
  0x92   : > { %10316 = vrot.lane.b32.xlu1 %v10942_v12, %s10691_s30 }
  0x93   : > { %8413 = vmatmul.mubr.msk.f32.gmra.mrb[6].mxu1 %vm647_vm1, %v547_v29  ;;  %v7033_v29 = vld [vmem:[%s13924_s1 + $0xb0] sm:$0xff] }
  0x94   : > { %10321 = vrot.lane.b32.xlu0 %v10951_v19, %s10690_s14  ;;  %8415 = vmatprep.mubr.msk.f32.mxu1 %vm10687_vm0, %v10688_v22 }
  0x96   : > { %10326 = vrot.lane.b32.xlu1 %v10939_v9, %s10691_s30 }
  0x97   : > { %8416 = vmatmul.mubr.msk.f32.gmra.mrb[8].mxu1 %vm647_vm1, %v548_v30 }
  0x98   : > { %10331 = vrot.lane.b32.xlu0 %v10955_v20, %s10690_s14  ;;  %8418 = vmatprep.mubr.msk.f32.mxu1 %vm10687_vm0, %v10688_v22 }
  0x9a   : > { %10336 = vrot.lane.b32.xlu1 %v10946_v13, %s10691_s30 }
  0x9b   : > { %8419 = vmatmul.mubr.msk.f32.gmra.mrb[10].mxu1 %vm647_vm1, %v549_v31 }
  0x9c   : > { %8421 = vmatprep.mubr.msk.f32.mxu1 %vm10687_vm0, %v10688_v22  ;;  %10341 = vrot.lane.b32.xlu0 %v10951_v19, %s10691_s30 }
  0x9e   : > { %10346 = vrot.lane.b32.xlu1 %v10955_v20, %s10691_s30 }
  0x9f   : > { %8422 = vmatmul.mubr.msk.f32.gmra.mrb[12].mxu1 %vm647_vm1, %v550_v32 }
  0xa0   : > { %8424 = vmatprep.mubr.msk.f32.mxu1 %vm10687_vm0, %v10688_v22 }
  0xa3   : > { %8425 = vmatmul.mubr.msk.f32.gmra.mrb[14].mxu1 %vm647_vm1, %v551_v33 }
  0xa4   : > { %8427 = vmatprep.mubr.msk.f32.mxu1 %vm10687_vm0, %v10688_v22 }
  0xa7   : > { %8428 = vmatmul.mubr.msk.f32.gmra.mrb[16].mxu1 %vm647_vm1, %v552_v34 }
  0xa8   : > { %8430 = vmatprep.mubr.msk.f32.mxu1 %vm10687_vm0, %v10688_v22 }
  0xab   : > { %8431 = vmatmul.mubr.msk.f32.gmra.mrb[18].mxu1 %vm647_vm1, %v553_v35 }
  0xac   : > { %8433 = vmatprep.mubr.msk.f32.mxu1 %vm10687_vm0, %v10688_v22 }
  0xaf   : > { %8434 = vmatmul.mubr.msk.f32.gmra.mrb[20].mxu1 %vm647_vm1, %v554_v36 }
  0xb0   : > { %8436 = vmatprep.mubr.msk.f32.mxu1 %vm10687_vm0, %v10688_v22 }
  0xb3   : > { %8437 = vmatmul.mubr.msk.f32.gmra.mrb[22].mxu1 %vm647_vm1, %v555_v37  ;;  %v7034_v37 = vld [vmem:[%s13924_s1 + $0xb8] sm:$0xff] }
  0xb4   : > { %8439 = vmatprep.mubr.msk.f32.mxu1 %vm10687_vm0, %v10688_v22 }
  0xb7   : > { %8440 = vmatmul.mubr.msk.f32.gmra.mrb[24].mxu1 %vm647_vm1, %v556_v38 }
  0xb8   : > { %8442 = vmatprep.mubr.msk.f32.mxu1 %vm10687_vm0, %v10688_v22 }
  0xbb   : > { %8443 = vmatmul.mubr.msk.f32.gmra.mrb[26].mxu1 %vm647_vm1, %v557_v39 }
  0xbc   : > { %8445 = vmatprep.mubr.msk.f32.mxu1 %vm10687_vm0, %v10688_v22 }
  0xbf   : > { %8446 = vmatmul.mubr.msk.f32.gmra.mrb[28].mxu1 %vm647_vm1, %v558_v40 }
  0xc0   : > { %8448 = vmatprep.mubr.msk.f32.mxu1 %vm10687_vm0, %v10688_v22 }
  0xc3   : > { %8449 = vmatmul.mubr.msk.f32.gmra.mrb[30].mxu1 %vm647_vm1, %v559_v41 }
  0xc4   : > { %8451 = vmatprep.mubr.msk.f32.mxu1 %vm10687_vm0, %v10688_v22 }
  0xc7   : > { %8452 = vmatmul.mubr.msk.f32.gmra.mrb[32].mxu1 %vm647_vm1, %v560_v42 }
  0xc8   : > { %8454 = vmatprep.mubr.msk.f32.mxu1 %vm10687_vm0, %v10688_v22 }
  0xcb   : > { %8455 = vmatmul.mubr.msk.f32.gmra.mrb[34].mxu1 %vm647_vm1, %v561_v43 }
  0xcc   : > { %8457 = vmatprep.mubr.msk.f32.mxu1 %vm10687_vm0, %v10688_v22 }
  0xcf   : > { %8458 = vmatmul.mubr.msk.f32.gmra.mrb[36].mxu1 %vm647_vm1, %v562_v44 }
  0xd0   : > { %8460 = vmatprep.mubr.msk.f32.mxu1 %vm10687_vm0, %v10688_v22 }
  0xd3   : > { %8461 = vmatmul.mubr.msk.f32.gmra.mrb[38].mxu1 %vm647_vm1, %v563_v45  ;;  %v7035_v45 = vld [vmem:[%s13924_s1 + $0xc0] sm:$0xff] }
  0xd4   : > { %8463 = vmatprep.mubr.msk.f32.mxu1 %vm10687_vm0, %v10688_v22 }
  0xd7   : > { %8464 = vmatmul.mubr.msk.f32.gmra.mrb[40].mxu1 %vm647_vm1, %v564_v46 }
  0xd8   : > { %8577 = vmatprep.mubr.msk.f32.mxu1 %vm10687_vm0, %v10688_v22 }
  0xe2   : > { %v10232_v47 = vpop.permute.xlu0 %10231 }
  0xe3   : > { %v10234_v48 = vunpack.i.h.bf16 %v10232_v47  ;;  %v10233_v49 = vunpack.i.l.bf16 %v10232_v47 }
  0xe4   : > { %v10242_v50 = vpop.permute.xlu1 %10241 }
  0xe5   : > { %v9611_v51 = vpack.c.bf16 %v10234_v48, %v10233_v49  ;;  %v10244_v55 = vunpack.i.h.bf16 %v10242_v50  ;;  %v10243_v56 = vunpack.i.l.bf16 %v10242_v50 }
  0xe6   : > { %v10237_v52 = vpop.permute.xlu0 %10236 }
  0xe7   : > { %v10239_v53 = vunpack.i.h.bf16 %v10237_v52  ;;  %v10238_v54 = vunpack.i.l.bf16 %v10237_v52  ;;  %9612 = vmatpush3.bf16.msra.mxu0 %v9611_v51  ;;  %v9617_v62 = vpack.c.bf16 %v10244_v55, %v10243_v56 }
  0xe8   : > { %v10247_v57 = vpop.permute.xlu1 %10246  ;;  %9613 = vmatprep.subr.bf16.mxu0 %v10685_v0 }
  0xe9   : > { %v9614_v58 = vpack.c.bf16 %v10239_v53, %v10238_v54  ;;  %v10249_v60 = vunpack.i.h.bf16 %v10247_v57  ;;  %v10248_v61 = vunpack.i.l.bf16 %v10247_v57  ;;  %v7036_v54 = vld [vmem:[%s13924_s1 + $0xc8] sm:$0xff] }
  0xea   : > { %v10252_v59 = vpop.permute.xlu0 %10251 }
  0xeb   : > { %9615 = vmatpush3.bf16.msra.mxu0 %v9614_v58  ;;  %v10254_v2 = vunpack.i.h.bf16 %v10252_v59  ;;  %v10253_v3 = vunpack.i.l.bf16 %v10252_v59  ;;  %v9620_v4 = vpack.c.bf16 %v10249_v60, %v10248_v61 }
  0xec   : > { %v10257_v63 = vpop.permute.xlu1 %10256  ;;  %9616 = vmatprep.subr.bf16.mxu0 %v10685_v0 }
  0xed   : > { %v10259_v7 = vunpack.i.h.bf16 %v10257_v63  ;;  %v10258_v8 = vunpack.i.l.bf16 %v10257_v63  ;;  %v9623_v9 = vpack.c.bf16 %v10254_v2, %v10253_v3 }
  0xee   : > { %v10262_v1 = vpop.permute.xlu0 %10261 }
  0xef   : > { %9618 = vmatpush3.bf16.msra.mxu0 %v9617_v62  ;;  %v9626_v12 = vpack.c.bf16 %v10259_v7, %v10258_v8  ;;  %v10264_v13 = vunpack.i.h.bf16 %v10262_v1  ;;  %v10263_v14 = vunpack.i.l.bf16 %v10262_v1  ;;  %v7037_v62 = vld [vmem:[%s13924_s1 + $0xd0] sm:$0xff] }
  0xf0   : > { %v10267_v5 = vpop.permute.xlu1 %10266  ;;  %9619 = vmatprep.subr.bf16.mxu0 %v10685_v0 }
  0xf1   : > { %v10269_v16 = vunpack.i.h.bf16 %v10267_v5  ;;  %v9647_v19 = vpack.c.bf16 %v10264_v13, %v10263_v14  ;;  %v10268_v20 = vunpack.i.l.bf16 %v10267_v5 }
  0xf2   : > { %v10272_v6 = vpop.permute.xlu0 %10271 }
  0xf3   : > { %9621 = vmatpush3.bf16.msra.mxu0 %v9620_v4  ;;  %v9650_v30 = vpack.c.bf16 %v10269_v16, %v10268_v20  ;;  %v10274_v31 = vunpack.i.h.bf16 %v10272_v6  ;;  %v10273_v32 = vunpack.i.l.bf16 %v10272_v6  ;;  %v7038_v4 = vld [vmem:[%s13924_s1 + $0xd8] sm:$0xff]  ;;  %v7040_v16 = vld [vmem:[%s13924_s1 + $0xe8] sm:$0xff] }
  0xf4   : > { %v10277_v10 = vpop.permute.xlu1 %10276  ;;  %9622 = vmatprep.subr.bf16.mxu0 %v10685_v0  ;;  %v7137_v6 = vld [vmem:[%s13924_s1 + $0x1f8] sm:$0xff] }
  0xf5   : > { %v9653_v38 = vpack.c.bf16 %v10274_v31, %v10273_v32  ;;  %v10279_v39 = vunpack.i.h.bf16 %v10277_v10  ;;  %v10278_v40 = vunpack.i.l.bf16 %v10277_v10  ;;  %v7039_v10 = vld [vmem:[%s13924_s1 + $0xe0] sm:$0xff] }
  0xf6   : > { %v11133_v11 = vpop.permute.xlu0 %10281 }
  0xf7   : > { %9624 = vmatpush3.bf16.msra.mxu0 %v9623_v9  ;;  %v9656_v46 = vpack.c.bf16 %v10279_v39, %v10278_v40  ;;  %v10284_v47 = vunpack.i.h.bf16 %v11133_v11  ;;  %v10283_v48 = vunpack.i.l.bf16 %v11133_v11  ;;  %v7138_v11 = vld [vmem:[%s13924_s1 + $0x200] sm:$0xff]  ;;  %v7045_v39 = vld [vmem:[%s13924_s1 + $0x110] sm:$0xff] }
  0xf8   : > { %v11135_v15 = vpop.permute.xlu1 %10286  ;;  %9625 = vmatprep.subr.bf16.mxu0 %v10685_v0  ;;  %v7144_v40 = vld [vmem:[%s13924_s1 + $0x230] sm:$0xff] }
  0xf9   : > { %v9659_v55 = vpack.c.bf16 %v10284_v47, %v10283_v48  ;;  %v10289_v56 = vunpack.i.h.bf16 %v11135_v15  ;;  %v10288_v57 = vunpack.i.l.bf16 %v11135_v15  ;;  %v7049_v47 = vld [vmem:[%s13924_s1 + $0x130] sm:$0xff] }
  0xfa   : > { %v10292_v17 = vpop.permute.xlu0 %10291  ;;  %v7148_v48 = vld [vmem:[%s13924_s1 + $0x250] sm:$0xff] }
  0xfb   : > { %9627 = vmatpush3.bf16.msra.mxu0 %v9626_v12  ;;  %v10294_v21 = vunpack.i.h.bf16 %v10292_v17  ;;  %v10293_v23 = vunpack.i.l.bf16 %v10292_v17  ;;  %v9662_v63 = vpack.c.bf16 %v10289_v56, %v10288_v57  ;;  %v7139_v17 = vld [vmem:[%s13924_s1 + $0x208] sm:$0xff]  ;;  %v7152_v56 = vld [vmem:[%s13924_s1 + $0x270] sm:$0xff]  ;;  %v7096_v57 = vld [vmem:[%s13924_s1 + $0x158] sm:$0xff] }
  0xfc   : > { %v10297_v24 = vpop.permute.xlu1 %10296  ;;  %9646 = vmatprep.subr.bf16.mxu0 %v10685_v0 }
  0xfd   : > { %v10299_v25 = vunpack.i.h.bf16 %v10297_v24  ;;  %v10298_v26 = vunpack.i.l.bf16 %v10297_v24  ;;  %v9665_v27 = vpack.c.bf16 %v10294_v21, %v10293_v23  ;;  %v7041_v23 = vld [vmem:[%s13924_s1 + $0xf0] sm:$0xff] }
  0xfe   : > { %8317 = vmatmul.mubr.msk.f32.vlgmr.msra.gmra.mrb[0].mxu0 %vm647_vm1, %v7032_v18  ;;  %v10302_v28 = vpop.permute.xlu0 %10301  ;;  %v7140_v24 = vld [vmem:[%s13924_s1 + $0x210] sm:$0xff] }
  0xff   : > { %8319 = vmatprep.mubr.msk.f32.mxu0 %vm10687_vm0, %v10688_v22  ;;  %9648 = vmatpush3.bf16.msra.mxu0 %v9647_v19  ;;  %v9668_v33 = vpack.c.bf16 %v10299_v25, %v10298_v26  ;;  %v10304_v34 = vunpack.i.h.bf16 %v10302_v28  ;;  %v10303_v35 = vunpack.i.l.bf16 %v10302_v28 }
 0x100   : > { %9666 = vmatpush3.bf16.msra.mxu1 %v9665_v27  ;;  %9649 = vmatprep.subr.bf16.mxu0 %v10685_v0  ;;  %v10307_v49 = vpop.permute.xlu1 %10306 }
 0x101   : > { %9667 = vmatprep.subr.bf16.mxu1 %v10685_v0  ;;  %v9671_v41 = vpack.c.bf16 %v10304_v34, %v10303_v35  ;;  %v10309_v2 = vunpack.i.h.bf16 %v10307_v49  ;;  %v10308_v3 = vunpack.i.l.bf16 %v10307_v49  ;;  %v7043_v34 = vld [vmem:[%s13924_s1 + $0x100] sm:$0xff]  ;;  %v7050_v49 = vld [vmem:[%s13924_s1 + $0x138] sm:$0xff] }
 0x102   : > { %8320 = vmatmul.mubr.msk.f32.gmra.mrb[2].mxu0 %vm647_vm1, %v7033_v29  ;;  %v10312_v36 = vpop.permute.xlu0 %10311  ;;  %v7042_v29 = vld [vmem:[%s13924_s1 + $0xf8] sm:$0xff]  ;;  %v7142_v35 = vld [vmem:[%s13924_s1 + $0x220] sm:$0xff] }
 0x103   : > { %8322 = vmatprep.mubr.msk.f32.mxu0 %vm10687_vm0, %v10688_v22  ;;  %9651 = vmatpush3.bf16.msra.mxu0 %v9650_v30  ;;  %v10314_v42 = vunpack.i.h.bf16 %v10312_v36  ;;  %v10313_v43 = vunpack.i.l.bf16 %v10312_v36  ;;  %v11195_v7 = vpack.c.bf16 %v10309_v2, %v10308_v3  ;;  %v7141_v30 = vld [vmem:[%s13924_s1 + $0x218] sm:$0xff]  ;;  %v7098_v2 = vld [vmem:[%s13924_s1 + $0x168] sm:$0xff] }
 0x104   : > { %9669 = vmatpush3.bf16.msra.mxu1 %v9668_v33  ;;  %9652 = vmatprep.subr.bf16.mxu0 %v10685_v0  ;;  %v10317_v61 = vpop.permute.xlu1 %10316  ;;  %v2053_v3 = vld [vmem:[%s13925_s2 + $0x18] sm:$0xff] }
 0x105   : > { %9670 = vmatprep.subr.bf16.mxu1 %v10685_v0  ;;  %v9674_v50 = vpack.c.bf16 %v10314_v42, %v10313_v43  ;;  %v10319_v8 = vunpack.i.h.bf16 %v10317_v61  ;;  %v10318_v9 = vunpack.i.l.bf16 %v10317_v61  ;;  %v7145_v42 = vld [vmem:[%s13924_s1 + $0x238] sm:$0xff]  ;;  %v7047_v43 = vld [vmem:[%s13924_s1 + $0x120] sm:$0xff] }
 0x106   : > { %8323 = vmatmul.mubr.msk.f32.gmra.mrb[4].mxu0 %vm647_vm1, %v7034_v37  ;;  %v10322_v44 = vpop.permute.xlu0 %10321  ;;  %v7044_v37 = vld [vmem:[%s13924_s1 + $0x108] sm:$0xff]  ;;  %v7097_v61 = vld [vmem:[%s13924_s1 + $0x160] sm:$0xff] }
 0x107   : > { %8325 = vmatprep.mubr.msk.f32.mxu0 %vm10687_vm0, %v10688_v22  ;;  %9654 = vmatpush3.bf16.msra.mxu0 %v9653_v38  ;;  %v10324_v51 = vunpack.i.h.bf16 %v10322_v44  ;;  %v10323_v52 = vunpack.i.l.bf16 %v10322_v44  ;;  %v11212_v12 = vpack.c.bf16 %v10319_v8, %v10318_v9  ;;  %v7143_v38 = vld [vmem:[%s13924_s1 + $0x228] sm:$0xff]  ;;  %v7146_v44 = vld [vmem:[%s13924_s1 + $0x240] sm:$0xff]  ;;  %v7099_v8 = vld [vmem:[%s13924_s1 + $0x170] sm:$0xff] }
 0x108   : > { %9672 = vmatpush3.bf16.msra.mxu1 %v9671_v41  ;;  %9655 = vmatprep.subr.bf16.mxu0 %v10685_v0  ;;  %v10327_v5 = vpop.permute.xlu1 %10326  ;;  %v7046_v41 = vld [vmem:[%s13924_s1 + $0x118] sm:$0xff]  ;;  %v2055_v9 = vld [vmem:[%s13925_s2 + $0x28] sm:$0xff] }
 0x109   : > { %9673 = vmatprep.subr.bf16.mxu1 %v10685_v0  ;;  %v9677_v58 = vpack.c.bf16 %v10324_v51, %v10323_v52  ;;  %v10329_v13 = vunpack.i.h.bf16 %v10327_v5  ;;  %v10328_v14 = vunpack.i.l.bf16 %v10327_v5  ;;  %v7051_v51 = vld [vmem:[%s13924_s1 + $0x140] sm:$0xff]  ;;  %v7155_v5 = vld [vmem:[%s13924_s1 + $0x288] sm:$0xff] }
 0x10a   : > { %8326 = vmatmul.mubr.msk.f32.gmra.mrb[6].mxu0 %vm647_vm1, %v7035_v45  ;;  %v10332_v53 = vpop.permute.xlu0 %10331  ;;  %v7048_v45 = vld [vmem:[%s13924_s1 + $0x128] sm:$0xff]  ;;  %v7150_v52 = vld [vmem:[%s13924_s1 + $0x260] sm:$0xff] }
 0x10b   : > { %8328 = vmatprep.mubr.msk.f32.mxu0 %vm10687_vm0, %v10688_v22  ;;  %9657 = vmatpush3.bf16.msra.mxu0 %v9656_v46  ;;  %v10334_v59 = vunpack.i.h.bf16 %v10332_v53  ;;  %v10333_v60 = vunpack.i.l.bf16 %v10332_v53  ;;  %v11227_v18 = vpack.c.bf16 %v10329_v13, %v10328_v14  ;;  %v7147_v46 = vld [vmem:[%s13924_s1 + $0x248] sm:$0xff]  ;;  %v2056_v13 = vld [vmem:[%s13925_s2 + $0x30] sm:$0xff]  ;;  %v7100_v14 = vld [vmem:[%s13924_s1 + $0x178] sm:$0xff] }
 0x10c   : > { %9675 = vmatpush3.bf16.msra.mxu1 %v9674_v50  ;;  %9658 = vmatprep.subr.bf16.mxu0 %v10685_v0  ;;  %v10337_v15 = vpop.permute.xlu1 %10336  ;;  %v7149_v50 = vld [vmem:[%s13924_s1 + $0x258] sm:$0xff]  ;;  %v7052_v53 = vld [vmem:[%s13924_s1 + $0x148] sm:$0xff] }
 0x10d   : > { %9676 = vmatprep.subr.bf16.mxu1 %v10685_v0  ;;  %v9680_v1 = vpack.c.bf16 %v10334_v59, %v10333_v60  ;;  %v10339_v19 = vunpack.i.h.bf16 %v10337_v15  ;;  %v10338_v20 = vunpack.i.l.bf16 %v10337_v15  ;;  %v10692_v59 = vmov 0   ;;  %v2051_v60 = vld [vmem:[%s13925_s2 + $0x8] sm:$0xff]  ;;  %v2057_v15 = vld [vmem:[%s13925_s2 + $0x38] sm:$0xff] }
 0x10e   : > { %8329 = vmatmul.mubr.msk.f32.gmra.mrb[8].mxu0 %vm647_vm1, %v7036_v54  ;;  %v10342_v21 = vpop.permute.xlu0 %10341  ;;  %v7151_v54 = vld [vmem:[%s13924_s1 + $0x268] sm:$0xff]  ;;  %10351 = vset.pattern.permute.xlu1 %v10692_v59 }
 0x10f   : > { %8331 = vmatprep.mubr.msk.f32.mxu0 %vm10687_vm0, %v10688_v22  ;;  %9660 = vmatpush3.bf16.msra.mxu0 %v9659_v55  ;;  %v11243_v25 = vpack.c.bf16 %v10339_v19, %v10338_v20  ;;  %v10344_v26 = vunpack.i.h.bf16 %v10342_v21  ;;  %v10343_v27 = vunpack.i.l.bf16 %v10342_v21  ;;  %v7095_v55 = vld [vmem:[%s13924_s1 + $0x150] sm:$0xff]  ;;  %v2058_v19 = vld [vmem:[%s13925_s2 + $0x40] sm:$0xff]  ;;  %v2059_v21 = vld [vmem:[%s13925_s2 + $0x48] sm:$0xff] }
 0x110   : > { %9678 = vmatpush3.bf16.msra.mxu1 %v9677_v58  ;;  %9661 = vmatprep.subr.bf16.mxu0 %v10685_v0  ;;  %v10347_v28 = vpop.permute.xlu1 %10346  ;;  %v7153_v58 = vld [vmem:[%s13924_s1 + $0x278] sm:$0xff]  ;;  %v7101_v20 = vld [vmem:[%s13924_s1 + $0x180] sm:$0xff] }
 0x111   : > { %9679 = vmatprep.subr.bf16.mxu1 %v10685_v0  ;;  %v11259_v31 = vpack.c.bf16 %v10344_v26, %v10343_v27  ;;  %v10349_v32 = vunpack.i.h.bf16 %v10347_v28  ;;  %v10348_v33 = vunpack.i.l.bf16 %v10347_v28  ;;  %10350 = vset.pattern.permute.xlu0 %v10692_v59  ;;  %v2060_v26 = vld [vmem:[%s13925_s2 + $0x50] sm:$0xff]  ;;  %v7102_v27 = vld [vmem:[%s13924_s1 + $0x188] sm:$0xff]  ;;  %v2061_v28 = vld [vmem:[%s13925_s2 + $0x58] sm:$0xff] }
 0x112   : > { %8332 = vmatmul.mubr.msk.f32.gmra.mrb[10].mxu0 %vm647_vm1, %v7037_v62  ;;  %v2050_v62 = vld [vmem:[%s13925_s2] sm:$0xff]  ;;  %2078 = vperm.xlu1 %10351, %v2051_v60  }
 0x113   : > { %8334 = vmatprep.mubr.msk.f32.mxu0 %vm10687_vm0, %v10688_v22  ;;  %9663 = vmatpush3.bf16.msra.mxu0 %v9662_v63  ;;  %v11275_v36 = vpack.c.bf16 %v10349_v32, %v10348_v33  ;;  %v7154_v63 = vld [vmem:[%s13924_s1 + $0x280] sm:$0xff]  ;;  %v7103_v33 = vld [vmem:[%s13924_s1 + $0x190] sm:$0xff] }
 0x114   : > { %9681 = vmatpush3.bf16.msra.mxu1 %v9680_v1  ;;  %9682 = vmatprep.subr.bf16.mxu0 %v10685_v0  ;;  %v2052_v1 = vld [vmem:[%s13925_s2 + $0x10] sm:$0xff]  ;;  %v2062_v32 = vld [vmem:[%s13925_s2 + $0x60] sm:$0xff] }
 0x115   : > { %10062 = vmatprep.subr.bf16.mxu1 %v10685_v0  ;;  %2073 = vperm.xlu0 %10350, %v2050_v62   ;;  %v7109_v59 = vld [vmem:[%s13924_s1 + $0x1c0] sm:$0xff]  ;;  %v7110_v62 = vld [vmem:[%s13924_s1 + $0x1c8] sm:$0xff] }
 0x116   : > { %8335 = vmatmul.mubr.msk.f32.gmra.mrb[12].mxu0 %vm647_vm1, %v7038_v4  ;;  %2083 = vperm.xlu1 %10351, %v2052_v1  }
 0x117   : > { %8337 = vmatprep.mubr.msk.f32.mxu0 %vm10687_vm0, %v10688_v22  ;;  %8578 = vmatmul.mubr.msk.f32.vlgmr.msra.gmra.mrb[42].mxu1 %vm647_vm1, %v7137_v6 }
 0x118   : > { %8580 = vmatprep.mubr.msk.f32.mxu1 %vm10687_vm0, %v10688_v22  ;;  %10068 = vmatpush3.bf16.msra.mxu1 %v11195_v7 }
 0x119   : > { %10063 = vmatprep.subr.bf16.mxu1 %v10685_v0  ;;  %2088 = vperm.xlu0 %10350, %v2053_v3  }
 0x11a   : > { %8338 = vmatmul.mubr.msk.f32.gmra.mrb[14].mxu0 %vm647_vm1, %v7039_v10 }
 0x11b   : > { %8340 = vmatprep.mubr.msk.f32.mxu0 %vm10687_vm0, %v10688_v22  ;;  %8581 = vmatmul.mubr.msk.f32.gmra.mrb[44].mxu1 %vm647_vm1, %v7138_v11  ;;  %v7156_v11 = vld [vmem:[%s13924_s1 + $0x290] sm:$0xff] }
 0x11c   : > { %8583 = vmatprep.mubr.msk.f32.mxu1 %vm10687_vm0, %v10688_v22  ;;  %10069 = vmatpush3.bf16.msra.mxu1 %v11212_v12 }
 0x11d   : > { %10064 = vmatprep.subr.bf16.mxu1 %v10685_v0  ;;  %2098 = vperm.xlu0 %10350, %v2055_v9   ;;  %v7113_v9 = vld [vmem:[%s13924_s1 + $0x1e0] sm:$0xff] }
 0x11e   : > { %8341 = vmatmul.mubr.msk.f32.gmra.mrb[16].mxu0 %vm647_vm1, %v7040_v16 }
 0x11f   : > { %8343 = vmatprep.mubr.msk.f32.mxu0 %vm10687_vm0, %v10688_v22  ;;  %8584 = vmatmul.mubr.msk.f32.gmra.mrb[46].mxu1 %vm647_vm1, %v7139_v17  ;;  %v7157_v17 = vld [vmem:[%s13924_s1 + $0x298] sm:$0xff] }
 0x120   : > { %8586 = vmatprep.mubr.msk.f32.mxu1 %vm10687_vm0, %v10688_v22  ;;  %10070 = vmatpush3.bf16.msra.mxu1 %v11227_v18 }
 0x121   : > { %10065 = vmatprep.subr.bf16.mxu1 %v10685_v0  ;;  %2108 = vperm.xlu0 %10350, %v2057_v15  }
 0x122   : > { %8344 = vmatmul.mubr.msk.f32.gmra.mrb[18].mxu0 %vm647_vm1, %v7041_v23 }
 0x123   : > { %8346 = vmatprep.mubr.msk.f32.mxu0 %vm10687_vm0, %v10688_v22  ;;  %8587 = vmatmul.mubr.msk.f32.gmra.mrb[48].mxu1 %vm647_vm1, %v7140_v24  ;;  %v7198_v24 = vld [vmem:[%s13924_s1 + $0x338] sm:$0xff] }
 0x124   : > { %8589 = vmatprep.mubr.msk.f32.mxu1 %vm10687_vm0, %v10688_v22  ;;  %10071 = vmatpush3.bf16.msra.mxu1 %v11243_v25 }
 0x125   : > { %10066 = vmatprep.subr.bf16.mxu1 %v10685_v0  ;;  %2118 = vperm.xlu0 %10350, %v2059_v21  }
 0x126   : > { %8347 = vmatmul.mubr.msk.f32.gmra.mrb[20].mxu0 %vm647_vm1, %v7042_v29 }
 0x127   : > { %8349 = vmatprep.mubr.msk.f32.mxu0 %vm10687_vm0, %v10688_v22  ;;  %8590 = vmatmul.mubr.msk.f32.gmra.mrb[50].mxu1 %vm647_vm1, %v7141_v30  ;;  %v7199_v30 = vld [vmem:[%s13924_s1 + $0x340] sm:$0xff] }
 0x128   : > { %8592 = vmatprep.mubr.msk.f32.mxu1 %vm10687_vm0, %v10688_v22  ;;  %10072 = vmatpush3.bf16.msra.mxu1 %v11259_v31 }
 0x129   : > { %10067 = vmatprep.subr.bf16.mxu1 %v10685_v0  ;;  %2128 = vperm.xlu0 %10350, %v2061_v28   ;;  %v7181_v28 = vld [vmem:[%s13924_s1 + $0x2b0] sm:$0xff] }
 0x12a   : > { %8350 = vmatmul.mubr.msk.f32.gmra.mrb[22].mxu0 %vm647_vm1, %v7043_v34  ;;  %v2063_v34 = vld [vmem:[%s13925_s2 + $0x68] sm:$0xff] }
 0x12b   : > { %8352 = vmatprep.mubr.msk.f32.mxu0 %vm10687_vm0, %v10688_v22  ;;  %8593 = vmatmul.mubr.msk.f32.gmra.mrb[52].mxu1 %vm647_vm1, %v7142_v35 }
 0x12c   : > { %8595 = vmatprep.mubr.msk.f32.mxu1 %vm10687_vm0, %v10688_v22  ;;  %10073 = vmatpush3.bf16.msra.mxu1 %v11275_v36 }
 0x12d   : > { %9700 = vmatprep.subr.bf16.mxu1 %v10685_v0  ;;  %2138 = vperm.xlu0 %10350, %v2063_v34   ;;  %v7184_v34 = vld [vmem:[%s13924_s1 + $0x2c8] sm:$0xff] }
 0x12e   : > { %8353 = vmatmul.mubr.msk.f32.gmra.mrb[24].mxu0 %vm647_vm1, %v7044_v37  ;;  %v2064_v37 = vld [vmem:[%s13925_s2 + $0x70] sm:$0xff] }
 0x12f   : > { %8355 = vmatprep.mubr.msk.f32.mxu0 %vm10687_vm0, %v10688_v22  ;;  %8596 = vmatmul.mubr.msk.f32.gmra.mrb[54].mxu1 %vm647_vm1, %v7143_v38  ;;  %v7104_v38 = vld [vmem:[%s13924_s1 + $0x198] sm:$0xff] }
 0x130   : > { %8598 = vmatprep.mubr.msk.f32.mxu1 %vm10687_vm0, %v10688_v22 }
 0x132   : > { %8356 = vmatmul.mubr.msk.f32.gmra.mrb[26].mxu0 %vm647_vm1, %v7045_v39  ;;  %v2065_v39 = vld [vmem:[%s13925_s2 + $0x78] sm:$0xff] }
 0x133   : > { %8358 = vmatprep.mubr.msk.f32.mxu0 %vm10687_vm0, %v10688_v22  ;;  %8599 = vmatmul.mubr.msk.f32.gmra.mrb[56].mxu1 %vm647_vm1, %v7144_v40 }
 0x134   : > { %8601 = vmatprep.mubr.msk.f32.mxu1 %vm10687_vm0, %v10688_v22  ;;  %2148 = vperm.xlu0 %10350, %v2065_v39   ;;  %v7188_v39 = vld [vmem:[%s13924_s1 + $0x2e8] sm:$0xff] }
 0x136   : > { %8359 = vmatmul.mubr.msk.f32.gmra.mrb[28].mxu0 %vm647_vm1, %v7046_v41 }
 0x137   : > { %8361 = vmatprep.mubr.msk.f32.mxu0 %vm10687_vm0, %v10688_v22  ;;  %8602 = vmatmul.mubr.msk.f32.gmra.mrb[58].mxu1 %vm647_vm1, %v7145_v42  ;;  %v2066_v42 = vld [vmem:[%s13925_s2 + $0x80] sm:$0xff] }
 0x138   : > { %8604 = vmatprep.mubr.msk.f32.mxu1 %vm10687_vm0, %v10688_v22 }
 0x13a   : > { %8362 = vmatmul.mubr.msk.f32.gmra.mrb[30].mxu0 %vm647_vm1, %v7047_v43  ;;  %v7105_v43 = vld [vmem:[%s13924_s1 + $0x1a0] sm:$0xff] }
 0x13b   : > { %8364 = vmatprep.mubr.msk.f32.mxu0 %vm10687_vm0, %v10688_v22  ;;  %8605 = vmatmul.mubr.msk.f32.gmra.mrb[60].mxu1 %vm647_vm1, %v7146_v44  ;;  %v2067_v44 = vld [vmem:[%s13925_s2 + $0x88] sm:$0xff] }
 0x13c   : > { %8607 = vmatprep.mubr.msk.f32.mxu1 %vm10687_vm0, %v10688_v22  ;;  %2158 = vperm.xlu0 %10350, %v2067_v44  }
 0x13e   : > { %8365 = vmatmul.mubr.msk.f32.gmra.mrb[32].mxu0 %vm647_vm1, %v7048_v45 }
 0x13f   : > { %8367 = vmatprep.mubr.msk.f32.mxu0 %vm10687_vm0, %v10688_v22  ;;  %8608 = vmatmul.mubr.msk.f32.gmra.mrb[62].mxu1 %vm647_vm1, %v7147_v46 }
 0x140   : > { %8610 = vmatprep.mubr.msk.f32.mxu1 %vm10687_vm0, %v10688_v22 }
 0x142   : > { %8368 = vmatmul.mubr.msk.f32.gmra.mrb[34].mxu0 %vm647_vm1, %v7049_v47  ;;  %v2068_v47 = vld [vmem:[%s13925_s2 + $0x90] sm:$0xff] }
 0x143   : > { %8370 = vmatprep.mubr.msk.f32.mxu0 %vm10687_vm0, %v10688_v22  ;;  %8611 = vmatmul.mubr.msk.f32.gmra.mrb[64].mxu1 %vm647_vm1, %v7148_v48  ;;  %v7106_v48 = vld [vmem:[%s13924_s1 + $0x1a8] sm:$0xff] }
 0x144   : > { %8613 = vmatprep.mubr.msk.f32.mxu1 %vm10687_vm0, %v10688_v22 }
 0x146   : > { %8371 = vmatmul.mubr.msk.f32.gmra.mrb[36].mxu0 %vm647_vm1, %v7050_v49  ;;  %v2069_v49 = vld [vmem:[%s13925_s2 + $0x98] sm:$0xff] }
 0x147   : > { %8373 = vmatprep.mubr.msk.f32.mxu0 %vm10687_vm0, %v10688_v22  ;;  %8614 = vmatmul.mubr.msk.f32.gmra.mrb[66].mxu1 %vm647_vm1, %v7149_v50 }
 0x148   : > { %8616 = vmatprep.mubr.msk.f32.mxu1 %vm10687_vm0, %v10688_v22  ;;  %2168 = vperm.xlu0 %10350, %v2069_v49  }
 0x14a   : > { %8374 = vmatmul.mubr.msk.f32.gmra.mrb[38].mxu0 %vm647_vm1, %v7051_v51 }
 0x14b   : > { %8376 = vmatprep.mubr.msk.f32.mxu0 %vm10687_vm0, %v10688_v22  ;;  %8617 = vmatmul.mubr.msk.f32.gmra.mrb[68].mxu1 %vm647_vm1, %v7150_v52  ;;  %v2070_v52 = vld [vmem:[%s13925_s2 + $0xa0] sm:$0xff] }
 0x14c   : > { %8619 = vmatprep.mubr.msk.f32.mxu1 %vm10687_vm0, %v10688_v22 }
 0x14e   : > { %8377 = vmatmul.mubr.msk.f32.gmra.mrb[40].mxu0 %vm647_vm1, %v7052_v53  ;;  %v7107_v53 = vld [vmem:[%s13924_s1 + $0x1b0] sm:$0xff] }
 0x14f   : > { %8490 = vmatprep.mubr.msk.f32.mxu0 %vm10687_vm0, %v10688_v22  ;;  %8620 = vmatmul.mubr.msk.f32.gmra.mrb[70].mxu1 %vm647_vm1, %v7151_v54 }
 0x150   : > { %8622 = vmatprep.mubr.msk.f32.mxu1 %vm10687_vm0, %v10688_v22 }
 0x152   : > { %8491 = vmatmul.mubr.msk.f32.vlgmr.msra.gmra.mrb[42].mxu0 %vm647_vm1, %v7095_v55 }
 0x153   : > { %8493 = vmatprep.mubr.msk.f32.mxu0 %vm10687_vm0, %v10688_v22  ;;  %9684 = vmatpush3.bf16.msra.mxu0 %v11195_v7  ;;  %v2054_v7 = vld [vmem:[%s13925_s2 + $0x20] sm:$0xff] }
 0x154   : > { %8623 = vmatmul.mubr.msk.f32.gmra.mrb[72].mxu1 %vm647_vm1, %v7152_v56  ;;  %9685 = vmatprep.subr.bf16.mxu0 %v10685_v0  ;;  %v7108_v56 = vld [vmem:[%s13924_s1 + $0x1b8] sm:$0xff] }
 0x155   : > { %8625 = vmatprep.mubr.msk.f32.mxu1 %vm10687_vm0, %v10688_v22  ;;  %2093 = vperm.xlu1 %10351, %v2054_v7  }
 0x156   : > { %8494 = vmatmul.mubr.msk.f32.gmra.mrb[44].mxu0 %vm647_vm1, %v7096_v57 }
 0x157   : > { %8496 = vmatprep.mubr.msk.f32.mxu0 %vm10687_vm0, %v10688_v22  ;;  %9687 = vmatpush3.bf16.msra.mxu0 %v11212_v12 }
 0x158   : > { %8626 = vmatmul.mubr.msk.f32.gmra.mrb[74].mxu1 %vm647_vm1, %v7153_v58  ;;  %9688 = vmatprep.subr.bf16.mxu0 %v10685_v0 }
 0x159   : > { %8628 = vmatprep.mubr.msk.f32.mxu1 %vm10687_vm0, %v10688_v22  ;;  %2103 = vperm.xlu1 %10351, %v2056_v13   ;;  %v7114_v13 = vld [vmem:[%s13924_s1 + $0x1e8] sm:$0xff] }
 0x15a   : > { %8497 = vmatmul.mubr.msk.f32.gmra.mrb[46].mxu0 %vm647_vm1, %v7097_v61  ;;  %v11450_v4 = vpop.f32.mrb[0].mxu1 }
 0x15b   : > { %8499 = vmatprep.mubr.msk.f32.mxu0 %vm10687_vm0, %v10688_v22  ;;  %9690 = vmatpush3.bf16.msra.mxu0 %v11227_v18  ;;  %v8405_v6 = vpop.f32.mrb[1].mxu1 }
 0x15c   : > { %8629 = vmatmul.mubr.msk.f32.gmra.mrb[76].mxu1 %vm647_vm1, %v7154_v63  ;;  %9691 = vmatprep.subr.bf16.mxu0 %v10685_v0  ;;  %v7112_v6 = vld [vmem:[%s13924_s1 + $0x1d8] sm:$0xff] }
 0x15d   : > { %8631 = vmatprep.mubr.msk.f32.mxu1 %vm10687_vm0, %v10688_v22  ;;  %2113 = vperm.xlu1 %10351, %v2058_v19  }
 0x15e   : > { %8500 = vmatmul.mubr.msk.f32.gmra.mrb[48].mxu0 %vm647_vm1, %v7098_v2  ;;  %v11472_v10 = vpop.f32.mrb[2].mxu1  ;;  %v7111_v2 = vld [vmem:[%s13924_s1 + $0x1d0] sm:$0xff] }
 0x15f   : > { %8502 = vmatprep.mubr.msk.f32.mxu0 %vm10687_vm0, %v10688_v22  ;;  %9693 = vmatpush3.bf16.msra.mxu0 %v11243_v25  ;;  %v8408_v12 = vpop.f32.mrb[3].mxu1 }
 0x160   : > { %8632 = vmatmul.mubr.msk.f32.gmra.mrb[78].mxu1 %vm647_vm1, %v7155_v5  ;;  %9694 = vmatprep.subr.bf16.mxu0 %v10685_v0 }
 0x161   : > { %8634 = vmatprep.mubr.msk.f32.mxu1 %vm10687_vm0, %v10688_v22  ;;  %2123 = vperm.xlu1 %10351, %v2060_v26  }
 0x162   : > { %8503 = vmatmul.mubr.msk.f32.gmra.mrb[50].mxu0 %vm647_vm1, %v7099_v8  ;;  %v11494_v16 = vpop.f32.mrb[4].mxu1 }
 0x163   : > { %8505 = vmatprep.mubr.msk.f32.mxu0 %vm10687_vm0, %v10688_v22  ;;  %9696 = vmatpush3.bf16.msra.mxu0 %v11259_v31  ;;  %v8411_v18 = vpop.f32.mrb[5].mxu1 }
 0x164   : > { %8635 = vmatmul.mubr.msk.f32.gmra.mrb[80].mxu1 %vm647_vm1, %v7156_v11  ;;  %9697 = vmatprep.subr.bf16.mxu0 %v10685_v0 }
 0x165   : > { %8637 = vmatprep.mubr.msk.f32.mxu1 %vm10687_vm0, %v10688_v22  ;;  %2133 = vperm.xlu1 %10351, %v2062_v32   ;;  %v7182_v32 = vld [vmem:[%s13924_s1 + $0x2b8] sm:$0xff] }
 0x166   : > { %8506 = vmatmul.mubr.msk.f32.gmra.mrb[52].mxu0 %vm647_vm1, %v7100_v14  ;;  %v11515_v23 = vpop.f32.mrb[6].mxu1 }
 0x167   : > { %8508 = vmatprep.mubr.msk.f32.mxu0 %vm10687_vm0, %v10688_v22  ;;  %9699 = vmatpush3.bf16.msra.mxu0 %v11275_v36  ;;  %v8414_v25 = vpop.f32.mrb[7].mxu1 }
 0x168   : > { %8638 = vmatmul.mubr.msk.f32.gmra.mrb[82].mxu1 %vm647_vm1, %v7157_v17  ;;  %9707 = vmatprep.subr.bf16.mxu0 %v10685_v0  ;;  %v7115_v17 = vld [vmem:[%s13924_s1 + $0x1f0] sm:$0xff]  ;;  %v7180_v25 = vld [vmem:[%s13924_s1 + $0x2a8] sm:$0xff] }
 0x169   : > { %8721 = vmatprep.mubr.msk.f32.mxu1 %vm10687_vm0, %v10688_v22  ;;  %2143 = vperm.xlu1 %10351, %v2064_v37   ;;  %v7186_v37 = vld [vmem:[%s13924_s1 + $0x2d8] sm:$0xff] }
 0x16a   : > { %8509 = vmatmul.mubr.msk.f32.gmra.mrb[54].mxu0 %vm647_vm1, %v7101_v20  ;;  %v11536_v29 = vpop.f32.mrb[8].mxu1  ;;  %v7179_v20 = vld [vmem:[%s13924_s1 + $0x2a0] sm:$0xff] }
 0x16b   : > { %8511 = vmatprep.mubr.msk.f32.mxu0 %vm10687_vm0, %v10688_v22  ;;  %v8417_v31 = vpop.f32.mrb[9].mxu1 }
 0x16c   : > { %8722 = vmatmul.mubr.msk.f32.vlgmr.msra.gmra.mrb[84].mxu1 %vm647_vm1, %v7198_v24 }
 0x16d   : > { %8724 = vmatprep.mubr.msk.f32.mxu1 %vm10687_vm0, %v10688_v22  ;;  %2153 = vperm.xlu1 %10351, %v2066_v42   ;;  %v7190_v42 = vld [vmem:[%s13924_s1 + $0x2f8] sm:$0xff] }
 0x16e   : > { %8512 = vmatmul.mubr.msk.f32.gmra.mrb[56].mxu0 %vm647_vm1, %v7102_v27  ;;  %v11556_v35 = vpop.f32.mrb[10].mxu1 }
 0x16f   : > { %8514 = vmatprep.mubr.msk.f32.mxu0 %vm10687_vm0, %v10688_v22  ;;  %v8420_v36 = vpop.f32.mrb[11].mxu1 }
 0x170   : > { %8725 = vmatmul.mubr.msk.f32.gmra.mrb[86].mxu1 %vm647_vm1, %v7199_v30  ;;  %v7185_v36 = vld [vmem:[%s13924_s1 + $0x2d0] sm:$0xff] }
 0x171   : > { %8735 = vmatprep.mubr.msk.f32.mxu1 %vm10687_vm0, %v10688_v22  ;;  %2163 = vperm.xlu1 %10351, %v2068_v47   ;;  %v7191_v47 = vld [vmem:[%s13924_s1 + $0x300] sm:$0xff] }
 0x172   : > { %8515 = vmatmul.mubr.msk.f32.gmra.mrb[58].mxu0 %vm647_vm1, %v7103_v33  ;;  %v11572_v40 = vpop.f32.mrb[12].mxu1  ;;  %v7183_v33 = vld [vmem:[%s13924_s1 + $0x2c0] sm:$0xff] }
 0x173   : > { %8517 = vmatprep.mubr.msk.f32.mxu0 %vm10687_vm0, %v10688_v22  ;;  %v8423_v41 = vpop.f32.mrb[13].mxu1 }
 0x174   : > { %v7189_v41 = vld [vmem:[%s13924_s1 + $0x2f0] sm:$0xff] }
 0x175   : > { %2173 = vperm.xlu1 %10351, %v2070_v52  }
 0x176   : > { %8518 = vmatmul.mubr.msk.f32.gmra.mrb[60].mxu0 %vm647_vm1, %v7104_v38  ;;  %v11586_v45 = vpop.f32.mrb[14].mxu1  ;;  %v7187_v38 = vld [vmem:[%s13924_s1 + $0x2e0] sm:$0xff] }
 0x177   : > { %8520 = vmatprep.mubr.msk.f32.mxu0 %vm10687_vm0, %v10688_v22  ;;  %v8426_v46 = vpop.f32.mrb[15].mxu1 }
 0x17a   : > { %8521 = vmatmul.mubr.msk.f32.gmra.mrb[62].mxu0 %vm647_vm1, %v7105_v43  ;;  %v11600_v50 = vpop.f32.mrb[16].mxu1 }
 0x17b   : > { %8523 = vmatprep.mubr.msk.f32.mxu0 %vm10687_vm0, %v10688_v22  ;;  %v8429_v51 = vpop.f32.mrb[17].mxu1 }
 0x17e   : > { %8524 = vmatmul.mubr.msk.f32.gmra.mrb[64].mxu0 %vm647_vm1, %v7106_v48  ;;  %v11611_v54 = vpop.f32.mrb[18].mxu1 }
 0x17f   : > { %8526 = vmatprep.mubr.msk.f32.mxu0 %vm10687_vm0, %v10688_v22  ;;  %v8432_v55 = vpop.f32.mrb[19].mxu1 }
 0x182   : > { %8527 = vmatmul.mubr.msk.f32.gmra.mrb[66].mxu0 %vm647_vm1, %v7107_v53  ;;  %v11619_v57 = vpop.f32.mrb[20].mxu1 }
 0x183   : > { %8529 = vmatprep.mubr.msk.f32.mxu0 %vm10687_vm0, %v10688_v22  ;;  %v8435_v58 = vpop.f32.mrb[21].mxu1 }
 0x186   : > { %8530 = vmatmul.mubr.msk.f32.gmra.mrb[68].mxu0 %vm647_vm1, %v7108_v56  ;;  %v11627_v60 = vpop.f32.mrb[22].mxu1 }
 0x187   : > { %8532 = vmatprep.mubr.msk.f32.mxu0 %vm10687_vm0, %v10688_v22  ;;  %v8438_v61 = vpop.f32.mrb[23].mxu1 }
 0x18a   : > { %8533 = vmatmul.mubr.msk.f32.gmra.mrb[70].mxu0 %vm647_vm1, %v7109_v59  ;;  %v11635_v63 = vpop.f32.mrb[24].mxu1 }
 0x18b   : > { %8535 = vmatprep.mubr.msk.f32.mxu0 %vm10687_vm0, %v10688_v22  ;;  %v8441_v1 = vpop.f32.mrb[25].mxu1 }
 0x18e   : > { %8536 = vmatmul.mubr.msk.f32.gmra.mrb[72].mxu0 %vm647_vm1, %v7110_v62  ;;  %v11643_v3 = vpop.f32.mrb[26].mxu1 }
 0x18f   : > { %8538 = vmatprep.mubr.msk.f32.mxu0 %vm10687_vm0, %v10688_v22  ;;  %v8444_v5 = vpop.f32.mrb[27].mxu1 }
 0x190   : > { %v7195_v5 = vld [vmem:[%s13924_s1 + $0x320] sm:$0xff] }
 0x192   : > { %8539 = vmatmul.mubr.msk.f32.gmra.mrb[74].mxu0 %vm647_vm1, %v7111_v2  ;;  %v11651_v7 = vpop.f32.mrb[28].mxu1  ;;  %v7243_v2 = vld [vmem:[%s13926_s3 + $0x20] sm:$0xff] }
 0x193   : > { %8541 = vmatprep.mubr.msk.f32.mxu0 %vm10687_vm0, %v10688_v22  ;;  %v8447_v8 = vpop.f32.mrb[29].mxu1 }
 0x196   : > { %8542 = vmatmul.mubr.msk.f32.gmra.mrb[76].mxu0 %vm647_vm1, %v7112_v6  ;;  %v11659_v11 = vpop.f32.mrb[30].mxu1 }
 0x197   : > { %8544 = vmatprep.mubr.msk.f32.mxu0 %vm10687_vm0, %v10688_v22  ;;  %v8450_v12 = vpop.f32.mrb[31].mxu1 }
 0x198   : > { %v7196_v12 = vld [vmem:[%s13924_s1 + $0x328] sm:$0xff] }
 0x19a   : > { %8545 = vmatmul.mubr.msk.f32.gmra.mrb[78].mxu0 %vm647_vm1, %v7113_v9  ;;  %v11667_v14 = vpop.f32.mrb[32].mxu1 }
 0x19b   : > { %8547 = vmatprep.mubr.msk.f32.mxu0 %vm10687_vm0, %v10688_v22  ;;  %v8453_v15 = vpop.f32.mrb[33].mxu1 }
 0x19e   : > { %8548 = vmatmul.mubr.msk.f32.gmra.mrb[80].mxu0 %vm647_vm1, %v7114_v13  ;;  %v11675_v18 = vpop.f32.mrb[34].mxu1 }
 0x19f   : > { %8550 = vmatprep.mubr.msk.f32.mxu0 %vm10687_vm0, %v10688_v22  ;;  %v8456_v19 = vpop.f32.mrb[35].mxu1 }
 0x1a2   : > { %8551 = vmatmul.mubr.msk.f32.gmra.mrb[82].mxu0 %vm647_vm1, %v7115_v17  ;;  %v11683_v21 = vpop.f32.mrb[36].mxu1 }
 0x1a3   : > { %8664 = vmatprep.mubr.msk.f32.mxu0 %vm10687_vm0, %v10688_v22  ;;  %v8459_v24 = vpop.f32.mrb[37].mxu1 }
 0x1a6   : > { %8665 = vmatmul.mubr.msk.f32.vlgmr.msra.gmra.mrb[84].mxu0 %vm647_vm1, %v7179_v20  ;;  %v11691_v26 = vpop.f32.mrb[38].mxu1 }
 0x1a7   : > { %8667 = vmatprep.mubr.msk.f32.mxu0 %vm10687_vm0, %v10688_v22  ;;  %v8462_v27 = vpop.f32.mrb[39].mxu1 }
 0x1aa   : > { %8668 = vmatmul.mubr.msk.f32.gmra.mrb[86].mxu0 %vm647_vm1, %v7180_v25  ;;  %v11699_v30 = vpop.f32.mrb[40].mxu1 }
 0x1ab   : > { %8670 = vmatprep.mubr.msk.f32.mxu0 %vm10687_vm0, %v10688_v22  ;;  %v8465_v31 = vpop.f32.mrb[41].mxu1 }
 0x1ae   : > { %8671 = vmatmul.mubr.msk.f32.gmra.mrb[88].mxu0 %vm647_vm1, %v7181_v28 }
 0x1af   : > { %8673 = vmatprep.mubr.msk.f32.mxu0 %vm10687_vm0, %v10688_v22 }
 0x1b2   : > { %8674 = vmatmul.mubr.msk.f32.gmra.mrb[90].mxu0 %vm647_vm1, %v7182_v32 }
 0x1b3   : > { %8676 = vmatprep.mubr.msk.f32.mxu0 %vm10687_vm0, %v10688_v22 }
 0x1b6   : > { %8677 = vmatmul.mubr.msk.f32.gmra.mrb[92].mxu0 %vm647_vm1, %v7183_v33 }
 0x1b7   : > { %8679 = vmatprep.mubr.msk.f32.mxu0 %vm10687_vm0, %v10688_v22 }
 0x1ba   : > { %8680 = vmatmul.mubr.msk.f32.gmra.mrb[94].mxu0 %vm647_vm1, %v7184_v34 }
 0x1bb   : > { %8682 = vmatprep.mubr.msk.f32.mxu0 %vm10687_vm0, %v10688_v22 }
 0x1be   : > { %8683 = vmatmul.mubr.msk.f32.gmra.mrb[96].mxu0 %vm647_vm1, %v7185_v36 }
 0x1bf   : > { %8685 = vmatprep.mubr.msk.f32.mxu0 %vm10687_vm0, %v10688_v22 }
 0x1c2   : > { %8686 = vmatmul.mubr.msk.f32.gmra.mrb[98].mxu0 %vm647_vm1, %v7186_v37 }
 0x1c3   : > { %8688 = vmatprep.mubr.msk.f32.mxu0 %vm10687_vm0, %v10688_v22 }
 0x1c6   : > { %8689 = vmatmul.mubr.msk.f32.gmra.mrb[100].mxu0 %vm647_vm1, %v7187_v38 }
 0x1c7   : > { %8691 = vmatprep.mubr.msk.f32.mxu0 %vm10687_vm0, %v10688_v22 }
 0x1ca   : > { %8692 = vmatmul.mubr.msk.f32.gmra.mrb[102].mxu0 %vm647_vm1, %v7188_v39 }
 0x1cb   : > { %8694 = vmatprep.mubr.msk.f32.mxu0 %vm10687_vm0, %v10688_v22 }
 0x1ce   : > { %8695 = vmatmul.mubr.msk.f32.gmra.mrb[104].mxu0 %vm647_vm1, %v7189_v41 }
 0x1cf   : > { %8697 = vmatprep.mubr.msk.f32.mxu0 %vm10687_vm0, %v10688_v22 }
 0x1d1   : > { %v777_v43 = vpop.f32.mrb[0].mxu0 }
 0x1d2   : > { %v8318_v44 = vpop.f32.mrb[1].mxu0  ;;  %8698 = vmatmul.mubr.msk.f32.gmra.mrb[106].mxu0 %vm647_vm1, %v7190_v42  ;;  %v11757_v46 = vadd.f32 %v11450_v4, %v777_v43  ;;  %v7192_v4 = vld [vmem:[%s13924_s1 + $0x308] sm:$0xff] }
 0x1d3   : > { %8700 = vmatprep.mubr.msk.f32.mxu0 %vm10687_vm0, %v10688_v22  ;;  %v2219_v42 = vld [vmem:[%s13926_s3 + $0x8] sm:$0xff] }
 0x1d5   : > { %v782_v48 = vpop.f32.mrb[2].mxu0 }
 0x1d6   : > { %v8321_v49 = vpop.f32.mrb[3].mxu0  ;;  %8701 = vmatmul.mubr.msk.f32.gmra.mrb[108].mxu0 %vm647_vm1, %v7191_v47  ;;  %v11766_v51 = vadd.f32 %v11472_v10, %v782_v48  ;;  %v7193_v10 = vld [vmem:[%s13924_s1 + $0x310] sm:$0xff] }
 0x1d7   : > { %8703 = vmatprep.mubr.msk.f32.mxu0 %vm10687_vm0, %v10688_v22 }
 0x1d9   : > { %v787_v52 = vpop.f32.mrb[4].mxu0 }
 0x1da   : > { %v8324_v53 = vpop.f32.mrb[5].mxu0  ;;  %8704 = vmatmul.mubr.msk.f32.gmra.mrb[110].mxu0 %vm647_vm1, %v7192_v4  ;;  %v11775_v55 = vadd.f32 %v11494_v16, %v787_v52  ;;  %v7194_v16 = vld [vmem:[%s13924_s1 + $0x318] sm:$0xff]  ;;  %v7245_v52 = vld [vmem:[%s13926_s3 + $0x30] sm:$0xff] }
 0x1db   : > { %8706 = vmatprep.mubr.msk.f32.mxu0 %vm10687_vm0, %v10688_v22  ;;  %v2221_v4 = vld [vmem:[%s13926_s3 + $0x18] sm:$0xf] }
 0x1dd   : > { %v792_v56 = vpop.f32.mrb[6].mxu0 }
 0x1de   : > { %v8327_v58 = vpop.f32.mrb[7].mxu0  ;;  %8707 = vmatmul.mubr.msk.f32.gmra.mrb[112].mxu0 %vm647_vm1, %v7193_v10  ;;  %v11784_v59 = vadd.f32 %v11515_v23, %v792_v56  ;;  %v7244_v23 = vld [vmem:[%s13926_s3 + $0x28] sm:$0xff] }
 0x1df   : > { %8709 = vmatprep.mubr.msk.f32.mxu0 %vm10687_vm0, %v10688_v22  ;;  %v9708_v6 = vpack.c.bf16 %v7244_v23, %v7243_v2 }
 0x1e1   : > { %v797_v61 = vpop.f32.mrb[8].mxu0  ;;  %9709 = vmatpush3.bf16.msra.mxu0 %v9708_v6 }
 0x1e2   : > { %v8330_v62 = vpop.f32.mrb[9].mxu0  ;;  %8710 = vmatmul.mubr.msk.f32.gmra.mrb[114].mxu0 %vm647_vm1, %v7194_v16  ;;  %v11793_v1 = vadd.f32 %v11536_v29, %v797_v61  ;;  %9710 = vmatprep.subr.bf16.mxu0 %v10685_v0 }
 0x1e3   : > { %8712 = vmatprep.mubr.msk.f32.mxu0 %vm10687_vm0, %v10688_v22 }
 0x1e5   : > { %v802_v8 = vpop.f32.mrb[10].mxu0 }
 0x1e6   : > { %v8333_v29 = vpop.f32.mrb[11].mxu0  ;;  %8713 = vmatmul.mubr.msk.f32.gmra.mrb[116].mxu0 %vm647_vm1, %v7195_v5  ;;  %v11808_v9 = vadd.f32 %v11556_v35, %v802_v8  ;;  %v7197_v35 = vld [vmem:[%s13924_s1 + $0x330] sm:$0xff] }
 0x1e7   : > { %8715 = vmatprep.mubr.msk.f32.mxu0 %vm10687_vm0, %v10688_v22 }
 0x1e9   : > { %v807_v13 = vpop.f32.mrb[12].mxu0 }
 0x1ea   : > { %v8336_v15 = vpop.f32.mrb[13].mxu0  ;;  %8716 = vmatmul.mubr.msk.f32.gmra.mrb[118].mxu0 %vm647_vm1, %v7196_v12  ;;  %v11817_v17 = vpop.f32.mrb[42].mxu1  ;;  %v11820_v19 = vadd.f32 %v11572_v40, %v807_v13 }
 0x1eb   : > { %8718 = vmatprep.mubr.msk.f32.mxu0 %vm10687_vm0, %v10688_v22  ;;  %v8579_v20 = vpop.f32.mrb[43].mxu1 }
 0x1ed   : > { %v812_v24 = vpop.f32.mrb[14].mxu0 }
 0x1ee   : > { %v8339_v25 = vpop.f32.mrb[15].mxu0  ;;  %8719 = vmatmul.mubr.msk.f32.gmra.mrb[120].mxu0 %vm647_vm1, %v7197_v35  ;;  %v11828_v27 = vpop.f32.mrb[44].mxu1  ;;  %v11831_v28 = vadd.f32 %v11586_v45, %v812_v24  ;;  %v2218_v45 = vld [vmem:[%s13926_s3] sm:$0xff]  ;;  %vm6678_vm1 = vcmask 982016  }
 0x1ef   : > { %v8582_v31 = vpop.f32.mrb[45].mxu1  ;;  %8806 = vmatprep.mubr.msk.f32.mxu0 %vm10687_vm0, %v10688_v22  ;;  %v9701_v44 = vpack.c.bf16 %v2219_v42, %v2218_v45 }
 0x1f1   : > { %v817_v40 = vpop.f32.mrb[16].mxu0  ;;  %9702 = vmatpush3.bf16.msra.mxu1 %v9701_v44 }
 0x1f2   : > { %v8342_v32 = vpop.f32.mrb[17].mxu0  ;;  %v11835_v33 = vpop.f32.mrb[46].mxu1  ;;  %v11838_v34 = vadd.f32 %v11600_v50, %v817_v40  ;;  %9703 = vmatprep.subr.bf16.mxu1 %v10685_v0 }
 0x1f3   : > { %v8585_v36 = vpop.f32.mrb[47].mxu1 }
 0x1f5   : > { %v822_v37 = vpop.f32.mrb[18].mxu0 }
 0x1f6   : > { %v8345_v38 = vpop.f32.mrb[19].mxu0  ;;  %v11840_v39 = vpop.f32.mrb[48].mxu1  ;;  %v11843_v41 = vadd.f32 %v11611_v54, %v822_v37  ;;  %v2220_v54 = vld [vmem:[%s13926_s3 + $0x10] sm:$0xff] }
 0x1f7   : > { %v8588_v43 = vpop.f32.mrb[49].mxu1  ;;  %v9704_v10 = vpack.c.bf16 %v2221_v4, %v2220_v54 }
 0x1f9   : > { %v827_v50 = vpop.f32.mrb[20].mxu0  ;;  %9706 = vmatpush3.bf16.msk.msra.mxu1 %vm9705_vm4, %v9704_v10 }
 0x1fa   : > { %v8348_v47 = vpop.f32.mrb[21].mxu0  ;;  %v11851_v48 = vpop.f32.mrb[50].mxu1  ;;  %v11854_v49 = vadd.f32 %v11619_v57, %v827_v50  ;;  %v7246_v57 = vld [vmem:[%s13926_s3 + $0x38] sm:$0xf]  ;;  %9714 = vmatprep.subr.bf16.mxu1 %v10685_v0 }
 0x1fb   : > { %v8591_v53 = vpop.f32.mrb[51].mxu1  ;;  %v9711_v56 = vpack.c.bf16 %v7246_v57, %v7245_v52 }
 0x1fd   : > { %v832_v58 = vpop.f32.mrb[22].mxu0  ;;  %9713 = vmatpush3.bf16.msk.msra.mxu0 %vm9705_vm4, %v9711_v56 }
 0x1fe   : > { %v8351_v16 = vpop.f32.mrb[23].mxu0  ;;  %v11871_v61 = vpop.f32.mrb[52].mxu1  ;;  %v11874_v62 = vadd.f32 %v11627_v60, %v832_v58 }
 0x1ff   : > { %v8594_v2 = vpop.f32.mrb[53].mxu1 }
 0x201   : > { %v837_v23 = vpop.f32.mrb[24].mxu0 }
 0x202   : > { %v8354_v5 = vpop.f32.mrb[25].mxu0  ;;  %v11877_v6 = vpop.f32.mrb[54].mxu1  ;;  %v11880_v8 = vadd.f32 %v11635_v63, %v837_v23 }
 0x203   : > { %v8597_v29 = vpop.f32.mrb[55].mxu1 }
 0x205   : > { %v842_v12 = vpop.f32.mrb[26].mxu0 }
 0x206   : > { %v8357_v13 = vpop.f32.mrb[27].mxu0  ;;  %v11882_v15 = vpop.f32.mrb[56].mxu1  ;;  %v11885_v35 = vadd.f32 %v11643_v3, %v842_v12 }
 0x207   : > { %v8600_v60 = vpop.f32.mrb[57].mxu1 }
 0x209   : > { %v847_v20 = vpop.f32.mrb[28].mxu0 }
 0x20a   : > { %v8360_v24 = vpop.f32.mrb[29].mxu0  ;;  %v11887_v25 = vpop.f32.mrb[58].mxu1  ;;  %v11890_v31 = vadd.f32 %v11651_v7, %v847_v20 }
 0x20b   : > { %v8603_v40 = vpop.f32.mrb[59].mxu1 }
 0x20d   : > { %v852_v32 = vpop.f32.mrb[30].mxu0 }
 0x20e   : > { %v8363_v63 = vpop.f32.mrb[31].mxu0  ;;  %v11892_v36 = vpop.f32.mrb[60].mxu1  ;;  %v11895_v37 = vadd.f32 %v11659_v11, %v852_v32 }
 0x20f   : > { %v8606_v38 = vpop.f32.mrb[61].mxu1 }
 0x211   : > { %v857_v45 = vpop.f32.mrb[32].mxu0 }
 0x212   : > { %v8366_v3 = vpop.f32.mrb[33].mxu0  ;;  %v11897_v42 = vpop.f32.mrb[62].mxu1  ;;  %v11900_v43 = vadd.f32 %v11667_v14, %v857_v45 }
 0x213   : > { %v8609_v44 = vpop.f32.mrb[63].mxu1 }
 0x215   : > { %v862_v50 = vpop.f32.mrb[34].mxu0 }
 0x216   : > { %v8369_v7 = vpop.f32.mrb[35].mxu0  ;;  %v11902_v47 = vpop.f32.mrb[64].mxu1  ;;  %v11905_v54 = vadd.f32 %v11675_v18, %v862_v50 }
 0x217   : > { %v8612_v4 = vpop.f32.mrb[65].mxu1 }
 0x219   : > { %v867_v52 = vpop.f32.mrb[36].mxu0 }
 0x21a   : > { %v8372_v11 = vpop.f32.mrb[37].mxu0  ;;  %v11907_v53 = vpop.f32.mrb[66].mxu1  ;;  %v11910_v10 = vadd.f32 %v11683_v21, %v867_v52 }
 0x21b   : > { %v8615_v57 = vpop.f32.mrb[67].mxu1 }
 0x21d   : > { %v872_v56 = vpop.f32.mrb[38].mxu0 }
 0x21e   : > { %v8375_v14 = vpop.f32.mrb[39].mxu0  ;;  %v11912_v58 = vpop.f32.mrb[68].mxu1  ;;  %v11915_v16 = vadd.f32 %v11691_v26, %v872_v56 }
 0x21f   : > { %v8618_v2 = vpop.f32.mrb[69].mxu1 }
 0x221   : > { %v877_v23 = vpop.f32.mrb[40].mxu0 }
 0x222   : > { %v8378_v18 = vpop.f32.mrb[41].mxu0  ;;  %v11917_v5 = vpop.f32.mrb[70].mxu1  ;;  %v11920_v29 = vadd.f32 %v11699_v30, %v877_v23 }
 0x223   : > { %v8621_v12 = vpop.f32.mrb[71].mxu1 }
 0x225   : > { %v1301_v13 = vpop.f32.mrb[42].mxu0 }
 0x226   : > { %v1405_v21 = vadd.f32 %v1301_v13, %v11757_v46  ;;  %v8492_v60 = vpop.f32.mrb[43].mxu0 }
 0x227   : > { %v11923_v20 = vpop.f32.mrb[72].mxu1 }
 0x228   : > { %v8624_v24 = vpop.f32.mrb[73].mxu1  ;;  %v11926_v40 = vadd.f32 %v11817_v17, %v1405_v21 }
 0x229   : > { %v1306_v26 = vpop.f32.mrb[44].mxu0 }
 0x22a   : > { %v1406_v32 = vadd.f32 %v1306_v26, %v11766_v51  ;;  %v8495_v63 = vpop.f32.mrb[45].mxu0 }
 0x22b   : > { %v11929_v38 = vpop.f32.mrb[74].mxu1 }
 0x22c   : > { %v8627_v45 = vpop.f32.mrb[75].mxu1  ;;  %v11932_v30 = vadd.f32 %v11828_v27, %v1406_v32 }
 0x22d   : > { %v1311_v3 = vpop.f32.mrb[46].mxu0 }
 0x22e   : > { %v1407_v46 = vadd.f32 %v1311_v3, %v11775_v55  ;;  %v8498_v44 = vpop.f32.mrb[47].mxu0 }
 0x22f   : > { %v11935_v50 = vpop.f32.mrb[76].mxu1 }
 0x230   : > { %v8630_v7 = vpop.f32.mrb[77].mxu1  ;;  %v11938_v17 = vadd.f32 %v11835_v33, %v1407_v46 }
 0x231   : > { %v1316_v4 = vpop.f32.mrb[48].mxu0 }
 0x232   : > { %v1408_v51 = vadd.f32 %v1316_v4, %v11784_v59  ;;  %v8501_v52 = vpop.f32.mrb[49].mxu0 }
 0x233   : > { %v11941_v11 = vpop.f32.mrb[78].mxu1 }
 0x234   : > { %v8633_v57 = vpop.f32.mrb[79].mxu1  ;;  %v11944_v27 = vadd.f32 %v11840_v39, %v1408_v51 }
 0x235   : > { %v1321_v56 = vpop.f32.mrb[50].mxu0 }
 0x236   : > { %v1409_v55 = vadd.f32 %v1321_v56, %v11793_v1  ;;  %v8504_v14 = vpop.f32.mrb[51].mxu0 }
 0x237   : > { %v11947_v2 = vpop.f32.mrb[80].mxu1 }
 0x238   : > { %v8636_v23 = vpop.f32.mrb[81].mxu1  ;;  %v11950_v33 = vadd.f32 %v11851_v48, %v1409_v55 }
 0x239   : > { %v1326_v18 = vpop.f32.mrb[52].mxu0 }
 0x23a   : > { %v1410_v59 = vadd.f32 %v1326_v18, %v11808_v9  ;;  %v8507_v12 = vpop.f32.mrb[53].mxu0 }
 0x23b   : > { %v11953_v13 = vpop.f32.mrb[82].mxu1 }
 0x23c   : > { %v8639_v21 = vpop.f32.mrb[83].mxu1  ;;  %v11956_v39 = vadd.f32 %v11871_v61, %v1410_v59 }
 0x23d   : > { %v1331_v60 = vpop.f32.mrb[54].mxu0 }
 0x23e   : > { %v1411_v1 = vadd.f32 %v1331_v60, %v11820_v19  ;;  %v8510_v24 = vpop.f32.mrb[55].mxu0 }
 0x23f   : > { %v2020_v26 = vpop.f32.mrb[84].mxu1 }
 0x240   : > { %v8723_v32 = vpop.f32.mrb[85].mxu1  ;;  %v11960_v63 = vadd.f32 %v11877_v6, %v1411_v1 }
 0x241   : > { %v1336_v48 = vpop.f32.mrb[56].mxu0 }
 0x242   : > { %v1412_v45 = vadd.f32 %v1336_v48, %v11831_v28  ;;  %v8513_v9 = vpop.f32.mrb[57].mxu0 }
 0x243   : > { %v2025_v3 = vpop.f32.mrb[86].mxu1 }
 0x244   : > { %v11964_v46 = vadd.f32 %v11882_v15, %v1412_v45  ;;  %v8726_v44 = vpop.f32.mrb[87].mxu1 }
 0x245   : > { %v1341_v61 = vpop.f32.mrb[58].mxu0 }
 0x246   : > { %v1413_v7 = vadd.f32 %v1341_v61, %v11838_v34  ;;  %v8516_v4 = vpop.f32.mrb[59].mxu0 }
 0x248   : > { %v11968_v19 = vadd.f32 %v11887_v25, %v1413_v7 }
 0x249   : > { %v1346_v51 = vpop.f32.mrb[60].mxu0 }
 0x24a   : > { %v1414_v6 = vadd.f32 %v1346_v51, %v11843_v41  ;;  %v8519_v52 = vpop.f32.mrb[61].mxu0 }
 0x24c   : > { %v11972_v57 = vadd.f32 %v11892_v36, %v1414_v6 }
 0x24d   : > { %v1351_v28 = vpop.f32.mrb[62].mxu0 }
 0x24e   : > { %v1415_v56 = vadd.f32 %v1351_v28, %v11854_v49  ;;  %v8522_v15 = vpop.f32.mrb[63].mxu0 }
 0x250   : > { %v11976_v55 = vadd.f32 %v11897_v42, %v1415_v56 }
 0x251   : > { %v1356_v14 = vpop.f32.mrb[64].mxu0 }
 0x252   : > { %v1416_v34 = vadd.f32 %v1356_v14, %v11874_v62  ;;  %v8525_v23 = vpop.f32.mrb[65].mxu0  ;;  %v2074_v14 = vpop.permute.xlu0 %2073 }
 0x254   : > { %v11980_v25 = vadd.f32 %v11902_v47, %v1416_v34 }
 0x255   : > { %v1361_v18 = vpop.f32.mrb[66].mxu0 }
 0x256   : > { %v1417_v41 = vadd.f32 %v1361_v18, %v11880_v8  ;;  %v8528_v59 = vpop.f32.mrb[67].mxu0 }
 0x258   : > { %v11984_v36 = vadd.f32 %v11907_v53, %v1417_v41 }
 0x259   : > { %v1366_v12 = vpop.f32.mrb[68].mxu0 }
 0x25a   : > { %v1418_v49 = vadd.f32 %v1366_v12, %v11885_v35  ;;  %v8531_v21 = vpop.f32.mrb[69].mxu0 }
 0x25c   : > { %v11988_v42 = vadd.f32 %v11912_v58, %v1418_v49 }
 0x25d   : > { %v1371_v60 = vpop.f32.mrb[70].mxu0 }
 0x25e   : > { %v1419_v62 = vadd.f32 %v1371_v60, %v11890_v31  ;;  %v8534_v1 = vpop.f32.mrb[71].mxu0 }
 0x260   : > { %v11992_v47 = vadd.f32 %v11917_v5, %v1419_v62  ;;  %v2089_v62 = vpop.permute.xlu0 %2088 }
 0x261   : > { %v1376_v24 = vpop.f32.mrb[72].mxu0 }
 0x262   : > { %v1420_v8 = vadd.f32 %v1376_v24, %v11895_v37  ;;  %v8537_v32 = vpop.f32.mrb[73].mxu0 }
 0x264   : > { %v11996_v53 = vadd.f32 %v11923_v20, %v1420_v8 }
 0x265   : > { %v1381_v48 = vpop.f32.mrb[74].mxu0 }
 0x266   : > { %v1421_v35 = vadd.f32 %v1381_v48, %v11900_v43  ;;  %v8540_v45 = vpop.f32.mrb[75].mxu0 }
 0x268   : > { %v12000_v58 = vadd.f32 %v11929_v38, %v1421_v35 }
 0x269   : > { %v1386_v9 = vpop.f32.mrb[76].mxu0 }
 0x26a   : > { %v1422_v31 = vadd.f32 %v1386_v9, %v11905_v54  ;;  %v8543_v44 = vpop.f32.mrb[77].mxu0 }
 0x26b   : > { %v2099_v44 = vpop.permute.xlu0 %2098 }
 0x26c   : > { %v12004_v5 = vadd.f32 %v11935_v50, %v1422_v31 }
 0x26d   : > { %v1391_v61 = vpop.f32.mrb[78].mxu0 }
 0x26e   : > { %v1423_v37 = vadd.f32 %v1391_v61, %v11910_v10  ;;  %v8546_v7 = vpop.f32.mrb[79].mxu0 }
 0x270   : > { %v12008_v20 = vadd.f32 %v11941_v11, %v1423_v37 }
 0x271   : > { %v1396_v4 = vpop.f32.mrb[80].mxu0 }
 0x272   : > { %v1424_v43 = vadd.f32 %v1396_v4, %v11915_v16  ;;  %v8549_v51 = vpop.f32.mrb[81].mxu0  ;;  %v2079_v16 = vpop.permute.xlu1 %2078 }
 0x274   : > { %v1736_v38 = vadd.f32 %v11947_v2, %v1424_v43 }
 0x275   : > { %v1401_v6 = vpop.f32.mrb[82].mxu0 }
 0x276   : > { %v1425_v54 = vadd.f32 %v1401_v6, %v11920_v29  ;;  %v8552_v52 = vpop.f32.mrb[83].mxu0  ;;  %v12013_v28 = vadd.f32 %v2020_v26, %v1736_v38  ;;  %v2084_v59 = vpop.permute.xlu1 %2083 }
 0x277   : > { %v2109_v52 = vpop.permute.xlu0 %2108 }
 0x278   : > { %v1737_v50 = vadd.f32 %v11953_v13, %v1425_v54 }
 0x279   : > { %v1925_v56 = vpop.f32.mrb[84].mxu0 }
 0x27a   : > { %v2029_v10 = vadd.f32 %v1925_v56, %v11926_v40  ;;  %v8666_v15 = vpop.f32.mrb[85].mxu0  ;;  %v12017_v11 = vadd.f32 %v2025_v3, %v1737_v50  ;;  %v2094_v48 = vpop.permute.xlu1 %2093 }
 0x27c   : > { %v2176_v34 = vadd.f32 %v2074_v14, %v2029_v10 }
 0x27d   : > { %v1930_v23 = vpop.f32.mrb[86].mxu0 }
 0x27e   : > { %v2197_v2 = vmax.f32 %v2176_v34, 0.0  ;;  %v2030_v18 = vadd.f32 %v1930_v23, %v11932_v30  ;;  %v8669_v29 = vpop.f32.mrb[87].mxu0  ;;  %v2104_v43 = vpop.permute.xlu1 %2103 }
 0x280   : > { %v2177_v41 = vadd.f32 %v2079_v16, %v2030_v18  ;;  %8736 = vmatmul.mubr.msk.f32.vlgmr.msra.gmra.mrb[88].mxu1 %vm2222_vm5, %v2197_v2  ;;  %8807 = vmatmul.mubr.msk.f32.vlgmr.msra.gmra.mrb[122].mxu0 %vm2222_vm5, %v2197_v2  ;;  %v2119_v18 = vpop.permute.xlu0 %2118 }
 0x281   : > { %v1935_v13 = vpop.f32.mrb[88].mxu0  ;;  %8738 = vmatprep.mubr.msk.f32.mxu1 %vm10687_vm0, %v10688_v22  ;;  %8809 = vmatprep.mubr.msk.f32.mxu0 %vm10687_vm0, %v10688_v22 }
 0x282   : > { %v2198_v40 = vmax.f32 %v2177_v41, 0.0  ;;  %v2031_v26 = vadd.f32 %v1935_v13, %v11938_v17  ;;  %v8672_v3 = vpop.f32.mrb[89].mxu0  ;;  %v2114_v14 = vpop.permute.xlu1 %2113 }
 0x284   : > { %v2178_v12 = vadd.f32 %v2084_v59, %v2031_v26  ;;  %8739 = vmatmul.mubr.msk.f32.gmra.mrb[90].mxu1 %vm2222_vm5, %v2198_v40  ;;  %8810 = vmatmul.mubr.msk.f32.gmra.mrb[124].mxu0 %vm2222_vm5, %v2198_v40 }
 0x285   : > { %v1940_v30 = vpop.f32.mrb[90].mxu0  ;;  %8741 = vmatprep.mubr.msk.f32.mxu1 %vm10687_vm0, %v10688_v22  ;;  %8812 = vmatprep.mubr.msk.f32.mxu0 %vm10687_vm0, %v10688_v22 }
 0x286   : > { %v2199_v49 = vmax.f32 %v2178_v12, 0.0  ;;  %v2032_v21 = vadd.f32 %v1940_v30, %v11944_v27  ;;  %v8675_v60 = vpop.f32.mrb[91].mxu0  ;;  %v2124_v26 = vpop.permute.xlu1 %2123 }
 0x288   : > { %v2179_v17 = vadd.f32 %v2089_v62, %v2032_v21  ;;  %8742 = vmatmul.mubr.msk.f32.gmra.mrb[92].mxu1 %vm2222_vm5, %v2199_v49  ;;  %8813 = vmatmul.mubr.msk.f32.gmra.mrb[126].mxu0 %vm2222_vm5, %v2199_v49  ;;  %v2129_v49 = vpop.permute.xlu0 %2128 }
 0x289   : > { %v1945_v1 = vpop.f32.mrb[92].mxu0  ;;  %8744 = vmatprep.mubr.msk.f32.mxu1 %vm10687_vm0, %v10688_v22  ;;  %8815 = vmatprep.mubr.msk.f32.mxu0 %vm10687_vm0, %v10688_v22 }
 0x28a   : > { %v2200_v24 = vmax.f32 %v2179_v17, 0.0  ;;  %v2033_v8 = vadd.f32 %v1945_v1, %v11950_v33  ;;  %v8678_v32 = vpop.f32.mrb[93].mxu0  ;;  %v2134_v1 = vpop.permute.xlu1 %2133 }
 0x28c   : > { %v2180_v27 = vadd.f32 %v2094_v48, %v2033_v8  ;;  %8745 = vmatmul.mubr.msk.f32.gmra.mrb[94].mxu1 %vm2222_vm5, %v2200_v24  ;;  %8816 = vmatmul.mubr.msk.f32.gmra.mrb[128].mxu0 %vm2222_vm5, %v2200_v24 }
 0x28d   : > { %v1950_v35 = vpop.f32.mrb[94].mxu0  ;;  %8747 = vmatprep.mubr.msk.f32.mxu1 %vm10687_vm0, %v10688_v22  ;;  %8818 = vmatprep.mubr.msk.f32.mxu0 %vm10687_vm0, %v10688_v22 }
 0x28e   : > { %v2201_v45 = vmax.f32 %v2180_v27, 0.0  ;;  %v2034_v9 = vadd.f32 %v1950_v35, %v11956_v39  ;;  %v8681_v31 = vpop.f32.mrb[95].mxu0  ;;  %v2139_v27 = vpop.permute.xlu0 %2138 }
 0x290   : > { %v2181_v33 = vadd.f32 %v2099_v44, %v2034_v9  ;;  %8748 = vmatmul.mubr.msk.f32.gmra.mrb[96].mxu1 %vm2222_vm5, %v2201_v45  ;;  %8819 = vmatmul.mubr.msk.f32.gmra.mrb[130].mxu0 %vm2222_vm5, %v2201_v45  ;;  %v2144_v44 = vpop.permute.xlu1 %2143 }
 0x291   : > { %v1955_v61 = vpop.f32.mrb[96].mxu0  ;;  %8750 = vmatprep.mubr.msk.f32.mxu1 %vm10687_vm0, %v10688_v22  ;;  %8821 = vmatprep.mubr.msk.f32.mxu0 %vm10687_vm0, %v10688_v22 }
 0x292   : > { %v2202_v37 = vmax.f32 %v2181_v33, 0.0  ;;  %v2035_v7 = vadd.f32 %v1955_v61, %v11960_v63  ;;  %v8684_v4 = vpop.f32.mrb[97].mxu0 }
 0x293   : > { %v2149_v4 = vpop.permute.xlu0 %2148 }
 0x294   : > { %v2182_v39 = vadd.f32 %v2104_v43, %v2035_v7  ;;  %8751 = vmatmul.mubr.msk.f32.gmra.mrb[98].mxu1 %vm2222_vm5, %v2202_v37  ;;  %8822 = vmatmul.mubr.msk.f32.gmra.mrb[132].mxu0 %vm2222_vm5, %v2202_v37 }
 0x295   : > { %v1960_v51 = vpop.f32.mrb[98].mxu0  ;;  %8753 = vmatprep.mubr.msk.f32.mxu1 %vm10687_vm0, %v10688_v22  ;;  %8824 = vmatprep.mubr.msk.f32.mxu0 %vm10687_vm0, %v10688_v22 }
 0x296   : > { %v2203_v38 = vmax.f32 %v2182_v39, 0.0  ;;  %v2036_v6 = vadd.f32 %v1960_v51, %v11964_v46  ;;  %v8687_v54 = vpop.f32.mrb[99].mxu0 }
 0x297   : > { %v2159_v54 = vpop.permute.xlu0 %2158 }
 0x298   : > { %v2183_v63 = vadd.f32 %v2109_v52, %v2036_v6  ;;  %8754 = vmatmul.mubr.msk.f32.gmra.mrb[100].mxu1 %vm2222_vm5, %v2203_v38  ;;  %8825 = vmatmul.mubr.msk.f32.gmra.mrb[134].mxu0 %vm2222_vm5, %v2203_v38  ;;  %v2154_v6 = vpop.permute.xlu1 %2153 }
 0x299   : > { %v1965_v50 = vpop.f32.mrb[100].mxu0  ;;  %8756 = vmatprep.mubr.msk.f32.mxu1 %vm10687_vm0, %v10688_v22  ;;  %8827 = vmatprep.mubr.msk.f32.mxu0 %vm10687_vm0, %v10688_v22 }
 0x29a   : > { %v2204_v56 = vmax.f32 %v2183_v63, 0.0  ;;  %v2037_v10 = vadd.f32 %v1965_v50, %v11968_v19  ;;  %v8690_v15 = vpop.f32.mrb[101].mxu0 }
 0x29c   : > { %v2184_v46 = vadd.f32 %v2114_v14, %v2037_v10  ;;  %8757 = vmatmul.mubr.msk.f32.gmra.mrb[102].mxu1 %vm2222_vm5, %v2204_v56  ;;  %8828 = vmatmul.mubr.msk.f32.gmra.mrb[136].mxu0 %vm2222_vm5, %v2204_v56  ;;  %v2164_v10 = vpop.permute.xlu1 %2163 }
 0x29d   : > { %v1970_v34 = vpop.f32.mrb[102].mxu0  ;;  %8759 = vmatprep.mubr.msk.f32.mxu1 %vm10687_vm0, %v10688_v22  ;;  %8830 = vmatprep.mubr.msk.f32.mxu0 %vm10687_vm0, %v10688_v22 }
 0x29e   : > { %v2205_v16 = vmax.f32 %v2184_v46, 0.0  ;;  %v2038_v23 = vadd.f32 %v1970_v34, %v11972_v57  ;;  %v8693_v2 = vpop.f32.mrb[103].mxu0 }
 0x2a0   : > { %v2185_v19 = vadd.f32 %v2119_v18, %v2038_v23  ;;  %8760 = vmatmul.mubr.msk.f32.gmra.mrb[104].mxu1 %vm2222_vm5, %v2205_v16  ;;  %8831 = vmatmul.mubr.msk.f32.gmra.mrb[138].mxu0 %vm2222_vm5, %v2205_v16  ;;  %v2169_v16 = vpop.permute.xlu0 %2168  ;;  %v2174_v18 = vpop.permute.xlu1 %2173 }
 0x2a1   : > { %v1975_v29 = vpop.f32.mrb[104].mxu0  ;;  %8762 = vmatprep.mubr.msk.f32.mxu1 %vm10687_vm0, %v10688_v22  ;;  %8833 = vmatprep.mubr.msk.f32.mxu0 %vm10687_vm0, %v10688_v22  ;;  %v2195_v23 = vadd.f32 %v2169_v16, %v12013_v28 }
 0x2a2   : > { %v2206_v41 = vmax.f32 %v2185_v19, 0.0  ;;  %v2039_v13 = vadd.f32 %v1975_v29, %v11976_v55  ;;  %v8696_v40 = vpop.f32.mrb[105].mxu0  ;;  %v2196_v19 = vadd.f32 %v2174_v18, %v12017_v11  ;;  %v2660_v29 = vld [vmem:[%s13927_s4 + $0x8] sm:$0xff] }
 0x2a4   : > { %v2186_v57 = vadd.f32 %v2124_v26, %v2039_v13  ;;  %8763 = vmatmul.mubr.msk.f32.gmra.mrb[106].mxu1 %vm2222_vm5, %v2206_v41  ;;  %8834 = vmatmul.mubr.msk.f32.gmra.mrb[140].mxu0 %vm2222_vm5, %v2206_v41  ;;  %v2217_v28 = vmax.f32 %v2196_v19, 0.0 }
 0x2a5   : > { %v1980_v3 = vpop.f32.mrb[106].mxu0  ;;  %8765 = vmatprep.mubr.msk.f32.mxu1 %vm10687_vm0, %v10688_v22  ;;  %8836 = vmatprep.mubr.msk.f32.mxu0 %vm10687_vm0, %v10688_v22 }
 0x2a6   : > { %v2207_v59 = vmax.f32 %v2186_v57, 0.0  ;;  %v2040_v12 = vadd.f32 %v1980_v3, %v11980_v25  ;;  %v8699_v30 = vpop.f32.mrb[107].mxu0 }
 0x2a8   : > { %v2187_v55 = vadd.f32 %v2129_v49, %v2040_v12  ;;  %8766 = vmatmul.mubr.msk.f32.gmra.mrb[108].mxu1 %vm2222_vm5, %v2207_v59  ;;  %8837 = vmatmul.mubr.msk.f32.gmra.mrb[142].mxu0 %vm2222_vm5, %v2207_v59 }
 0x2a9   : > { %v1985_v21 = vpop.f32.mrb[108].mxu0  ;;  %8768 = vmatprep.mubr.msk.f32.mxu1 %vm10687_vm0, %v10688_v22  ;;  %8839 = vmatprep.mubr.msk.f32.mxu0 %vm10687_vm0, %v10688_v22 }
 0x2aa   : > { %v2208_v60 = vmax.f32 %v2187_v55, 0.0  ;;  %v2041_v62 = vadd.f32 %v1985_v21, %v11984_v36  ;;  %v8702_v17 = vpop.f32.mrb[109].mxu0 }
 0x2ac   : > { %v2188_v25 = vadd.f32 %v2134_v1, %v2041_v62  ;;  %8769 = vmatmul.mubr.msk.f32.gmra.mrb[110].mxu1 %vm2222_vm5, %v2208_v60  ;;  %8840 = vmatmul.mubr.msk.f32.gmra.mrb[144].mxu0 %vm2222_vm5, %v2208_v60 }
 0x2ad   : > { %v1990_v24 = vpop.f32.mrb[110].mxu0  ;;  %8771 = vmatprep.mubr.msk.f32.mxu1 %vm10687_vm0, %v10688_v22  ;;  %8842 = vmatprep.mubr.msk.f32.mxu0 %vm10687_vm0, %v10688_v22 }
 0x2ae   : > { %v2209_v8 = vmax.f32 %v2188_v25, 0.0  ;;  %v2042_v32 = vadd.f32 %v1990_v24, %v11988_v42  ;;  %v8705_v48 = vpop.f32.mrb[111].mxu0 }
 0x2b0   : > { %v2189_v36 = vadd.f32 %v2139_v27, %v2042_v32  ;;  %8772 = vmatmul.mubr.msk.f32.gmra.mrb[112].mxu1 %vm2222_vm5, %v2209_v8  ;;  %8843 = vmatmul.mubr.msk.f32.gmra.mrb[146].mxu0 %vm2222_vm5, %v2209_v8 }
 0x2b1   : > { %v1995_v35 = vpop.f32.mrb[112].mxu0  ;;  %8774 = vmatprep.mubr.msk.f32.mxu1 %vm10687_vm0, %v10688_v22  ;;  %8845 = vmatprep.mubr.msk.f32.mxu0 %vm10687_vm0, %v10688_v22 }
 0x2b2   : > { %v2210_v45 = vmax.f32 %v2189_v36, 0.0  ;;  %v2043_v9 = vadd.f32 %v1995_v35, %v11992_v47  ;;  %v8708_v31 = vpop.f32.mrb[113].mxu0 }
 0x2b4   : > { %v2190_v42 = vadd.f32 %v2144_v44, %v2043_v9  ;;  %8775 = vmatmul.mubr.msk.f32.gmra.mrb[114].mxu1 %vm2222_vm5, %v2210_v45  ;;  %8846 = vmatmul.mubr.msk.f32.gmra.mrb[148].mxu0 %vm2222_vm5, %v2210_v45 }
 0x2b5   : > { %v2000_v33 = vpop.f32.mrb[114].mxu0  ;;  %8777 = vmatprep.mubr.msk.f32.mxu1 %vm10687_vm0, %v10688_v22  ;;  %8848 = vmatprep.mubr.msk.f32.mxu0 %vm10687_vm0, %v10688_v22 }
 0x2b6   : > { %v2211_v61 = vmax.f32 %v2190_v42, 0.0  ;;  %v2044_v37 = vadd.f32 %v2000_v33, %v11996_v53  ;;  %v8711_v7 = vpop.f32.mrb[115].mxu0 }
 0x2b8   : > { %v2191_v47 = vadd.f32 %v2149_v4, %v2044_v37  ;;  %8778 = vmatmul.mubr.msk.f32.gmra.mrb[116].mxu1 %vm2222_vm5, %v2211_v61  ;;  %8849 = vmatmul.mubr.msk.f32.gmra.mrb[150].mxu0 %vm2222_vm5, %v2211_v61 }
 0x2b9   : > { %v2005_v43 = vpop.f32.mrb[116].mxu0  ;;  %8780 = vmatprep.mubr.msk.f32.mxu1 %vm10687_vm0, %v10688_v22  ;;  %8851 = vmatprep.mubr.msk.f32.mxu0 %vm10687_vm0, %v10688_v22 }
 0x2ba   : > { %v2212_v39 = vmax.f32 %v2191_v47, 0.0  ;;  %v2045_v51 = vadd.f32 %v2005_v43, %v12000_v58  ;;  %v8714_v38 = vpop.f32.mrb[117].mxu0 }
 0x2bc   : > { %v2192_v53 = vadd.f32 %v2154_v6, %v2045_v51  ;;  %8781 = vmatmul.mubr.msk.f32.gmra.mrb[118].mxu1 %vm2222_vm5, %v2212_v39  ;;  %8852 = vmatmul.mubr.msk.f32.gmra.mrb[152].mxu0 %vm2222_vm5, %v2212_v39 }
 0x2bd   : > { %v2010_v52 = vpop.f32.mrb[118].mxu0  ;;  %8783 = vmatprep.mubr.msk.f32.mxu1 %vm10687_vm0, %v10688_v22  ;;  %8854 = vmatprep.mubr.msk.f32.mxu0 %vm10687_vm0, %v10688_v22 }
 0x2be   : > { %v2213_v63 = vmax.f32 %v2192_v53, 0.0  ;;  %v2046_v50 = vadd.f32 %v2010_v52, %v12004_v5  ;;  %v8717_v56 = vpop.f32.mrb[119].mxu0 }
 0x2c0   : > { %v2193_v58 = vadd.f32 %v2159_v54, %v2046_v50  ;;  %8784 = vmatmul.mubr.msk.f32.gmra.mrb[120].mxu1 %vm2222_vm5, %v2213_v63  ;;  %8855 = vmatmul.mubr.msk.f32.gmra.mrb[154].mxu0 %vm2222_vm5, %v2213_v63 }
 0x2c1   : > { %v2015_v15 = vpop.f32.mrb[120].mxu0  ;;  %8786 = vmatprep.mubr.msk.f32.mxu1 %vm10687_vm0, %v10688_v22  ;;  %8857 = vmatprep.mubr.msk.f32.mxu0 %vm10687_vm0, %v10688_v22 }
 0x2c2   : > { %v2214_v14 = vmax.f32 %v2193_v58, 0.0  ;;  %v2047_v46 = vadd.f32 %v2015_v15, %v12008_v20  ;;  %v8720_v34 = vpop.f32.mrb[121].mxu0  ;;  %v2216_v20 = vmax.f32 %v2195_v23, 0.0 }
 0x2c4   : > { %v2194_v5 = vadd.f32 %v2164_v10, %v2047_v46  ;;  %8787 = vmatmul.mubr.msk.f32.gmra.mrb[122].mxu1 %vm2222_vm5, %v2214_v14  ;;  %8858 = vmatmul.mubr.msk.f32.gmra.mrb[156].mxu0 %vm2222_vm5, %v2214_v14 }
 0x2c5   : > { %8789 = vmatprep.mubr.msk.f32.mxu1 %vm10687_vm0, %v10688_v22  ;;  %8860 = vmatprep.mubr.msk.f32.mxu0 %vm10687_vm0, %v10688_v22 }
 0x2c6   : > { %v2215_v2 = vmax.f32 %v2194_v5, 0.0 }
 0x2c8   : > { %8790 = vmatmul.mubr.msk.f32.gmra.mrb[124].mxu1 %vm2222_vm5, %v2215_v2  ;;  %8861 = vmatmul.mubr.msk.f32.gmra.mrb[158].mxu0 %vm2222_vm5, %v2215_v2 }
 0x2c9   : > { %8792 = vmatprep.mubr.msk.f32.mxu1 %vm10687_vm0, %v10688_v22  ;;  %8863 = vmatprep.mubr.msk.f32.mxu0 %vm10687_vm0, %v10688_v22 }
 0x2cc   : > { %8793 = vmatmul.mubr.msk.f32.gmra.mrb[126].mxu1 %vm2222_vm5, %v2216_v20  ;;  %8864 = vmatmul.mubr.msk.f32.gmra.mrb[160].mxu0 %vm2222_vm5, %v2216_v20 }
 0x2cd   : > { %8795 = vmatprep.mubr.msk.f32.mxu1 %vm10687_vm0, %v10688_v22  ;;  %8866 = vmatprep.mubr.msk.f32.mxu0 %vm10687_vm0, %v10688_v22 }
 0x2d0   : > { %8796 = vmatmul.mubr.msk.f32.gmra.mrb[128].mxu1 %vm2222_vm5, %v2217_v28  ;;  %8867 = vmatmul.mubr.msk.f32.gmra.mrb[162].mxu0 %vm2222_vm5, %v2217_v28 }
 0x2d1   : > { %7269 = vmatprep.mubr.msk.f32.mxu1 %vm2681_vm6, %v2660_v29 }
 0x353   : > { %v2356_v11 = vpop.f32.mrb[88].mxu1  ;;  %v2534_v41 = vpop.f32.mrb[122].mxu0 }
 0x354   : > { %v2638_v13 = vmax.f32 %v2356_v11, %v2534_v41  ;;  %v8737_v40 = vpop.f32.mrb[89].mxu1  ;;  %v8808_v26 = vpop.f32.mrb[123].mxu0 }
 0x357   : > { %v2361_v57 = vpop.f32.mrb[90].mxu1  ;;  %v2539_v3 = vpop.f32.mrb[124].mxu0 }
 0x358   : > { %v2639_v59 = vmax.f32 %v2361_v57, %v2539_v3  ;;  %v8740_v12 = vpop.f32.mrb[91].mxu1  ;;  %v8811_v30 = vpop.f32.mrb[125].mxu0 }
 0x35a   : > { %v12165_v49 = vpack.c.bf16 %v2639_v59, %v2638_v13 }
 0x35b   : > { %v2366_v55 = vpop.f32.mrb[92].mxu1  ;;  %v2544_v21 = vpop.f32.mrb[126].mxu0 }
 0x35c   : > { %v2640_v60 = vmax.f32 %v2366_v55, %v2544_v21  ;;  %v8743_v62 = vpop.f32.mrb[93].mxu1  ;;  %v8814_v17 = vpop.f32.mrb[127].mxu0  ;;  %9716 = vmatpush1.bf16.msra.mxu1 %v12165_v49 }
 0x35d   : > { %9717 = vmatprep.subr.bf16.mxu1 %v10685_v0 }
 0x35f   : > { %v2371_v1 = vpop.f32.mrb[94].mxu1  ;;  %v2549_v25 = vpop.f32.mrb[128].mxu0 }
 0x360   : > { %v2641_v24 = vmax.f32 %v2371_v1, %v2549_v25  ;;  %v8746_v8 = vpop.f32.mrb[95].mxu1  ;;  %v8817_v32 = vpop.f32.mrb[129].mxu0 }
 0x362   : > { %v12169_v48 = vpack.c.bf16 %v2641_v24, %v2640_v60 }
 0x363   : > { %v2376_v27 = vpop.f32.mrb[96].mxu1  ;;  %v2554_v36 = vpop.f32.mrb[130].mxu0 }
 0x364   : > { %v2642_v35 = vmax.f32 %v2376_v27, %v2554_v36  ;;  %v8749_v45 = vpop.f32.mrb[97].mxu1  ;;  %v8820_v9 = vpop.f32.mrb[131].mxu0  ;;  %9719 = vmatpush1.bf16.msra.mxu1 %v12169_v48 }
 0x365   : > { %9720 = vmatprep.subr.bf16.mxu1 %v10685_v0 }
 0x367   : > { %v2381_v31 = vpop.f32.mrb[98].mxu1  ;;  %v2559_v44 = vpop.f32.mrb[132].mxu0 }
 0x368   : > { %v2643_v42 = vmax.f32 %v2381_v31, %v2559_v44  ;;  %v8752_v33 = vpop.f32.mrb[99].mxu1  ;;  %v8823_v61 = vpop.f32.mrb[133].mxu0 }
 0x36a   : > { %v12173_v37 = vpack.c.bf16 %v2643_v42, %v2642_v35 }
 0x36b   : > { %v2386_v7 = vpop.f32.mrb[100].mxu1  ;;  %v2564_v4 = vpop.f32.mrb[134].mxu0 }
 0x36c   : > { %v2644_v47 = vmax.f32 %v2386_v7, %v2564_v4  ;;  %v8755_v43 = vpop.f32.mrb[101].mxu1  ;;  %v8826_v39 = vpop.f32.mrb[135].mxu0  ;;  %9722 = vmatpush1.bf16.msra.mxu1 %v12173_v37 }
 0x36d   : > { %9723 = vmatprep.subr.bf16.mxu1 %v10685_v0 }
 0x36f   : > { %v2391_v51 = vpop.f32.mrb[102].mxu1  ;;  %v2569_v38 = vpop.f32.mrb[136].mxu0 }
 0x370   : > { %v2645_v6 = vmax.f32 %v2391_v51, %v2569_v38  ;;  %v8758_v53 = vpop.f32.mrb[103].mxu1  ;;  %v8829_v54 = vpop.f32.mrb[137].mxu0 }
 0x372   : > { %v12177_v52 = vpack.c.bf16 %v2645_v6, %v2644_v47 }
 0x373   : > { %v2396_v63 = vpop.f32.mrb[104].mxu1  ;;  %v2574_v50 = vpop.f32.mrb[138].mxu0 }
 0x374   : > { %v2646_v56 = vmax.f32 %v2396_v63, %v2574_v50  ;;  %v8761_v58 = vpop.f32.mrb[105].mxu1  ;;  %v8832_v10 = vpop.f32.mrb[139].mxu0  ;;  %9725 = vmatpush1.bf16.msra.mxu1 %v12177_v52 }
 0x375   : > { %9726 = vmatprep.subr.bf16.mxu1 %v10685_v0 }
 0x377   : > { %v2401_v15 = vpop.f32.mrb[106].mxu1  ;;  %v2579_v14 = vpop.f32.mrb[140].mxu0 }
 0x378   : > { %v2647_v46 = vmax.f32 %v2401_v15, %v2579_v14  ;;  %v8764_v34 = vpop.f32.mrb[107].mxu1  ;;  %v8835_v16 = vpop.f32.mrb[141].mxu0 }
 0x37a   : > { %v12181_v5 = vpack.c.bf16 %v2647_v46, %v2646_v56 }
 0x37b   : > { %v2406_v23 = vpop.f32.mrb[108].mxu1  ;;  %v2584_v2 = vpop.f32.mrb[142].mxu0 }
 0x37c   : > { %v2648_v18 = vmax.f32 %v2406_v23, %v2584_v2  ;;  %v8767_v20 = vpop.f32.mrb[109].mxu1  ;;  %v8838_v19 = vpop.f32.mrb[143].mxu0  ;;  %9728 = vmatpush1.bf16.msra.mxu1 %v12181_v5 }
 0x37d   : > { %9729 = vmatprep.subr.bf16.mxu1 %v10685_v0  ;;  %v2659_v20 = vld [vmem:[%s13927_s4] sm:$0xff]  ;;  %v2662_v19 = vld [vmem:[%s13927_s4 + $0x18] sm:$0xff] }
 0x37f   : > { %v2411_v28 = vpop.f32.mrb[110].mxu1  ;;  %v2589_v29 = vpop.f32.mrb[144].mxu0 }
 0x380   : > { %v2649_v11 = vmax.f32 %v2411_v28, %v2589_v29  ;;  %v8770_v41 = vpop.f32.mrb[111].mxu1  ;;  %v8841_v13 = vpop.f32.mrb[145].mxu0  ;;  %v2661_v28 = vld [vmem:[%s13927_s4 + $0x10] sm:$0xff]  ;;  %v2664_v29 = vld [vmem:[%s13927_s4 + $0x28] sm:$0xff] }
 0x381   : > { %v2668_v41 = vld [vmem:[%s13927_s4 + $0x48] sm:$0xff]  ;;  %v2670_v13 = vld [vmem:[%s13927_s4 + $0x58] sm:$0xff] }
 0x382   : > { %v12185_v40 = vpack.c.bf16 %v2649_v11, %v2648_v18  ;;  %v2666_v11 = vld [vmem:[%s13927_s4 + $0x38] sm:$0xff] }
 0x383   : > { %v2416_v26 = vpop.f32.mrb[112].mxu1  ;;  %v2594_v57 = vpop.f32.mrb[146].mxu0 }
 0x384   : > { %v2650_v3 = vmax.f32 %v2416_v26, %v2594_v57  ;;  %v8773_v59 = vpop.f32.mrb[113].mxu1  ;;  %v8844_v12 = vpop.f32.mrb[147].mxu0  ;;  %9731 = vmatpush1.bf16.msra.mxu1 %v12185_v40  ;;  %v2672_v26 = vld [vmem:[%s13927_s4 + $0x68] sm:$0xff]  ;;  %v2674_v57 = vld [vmem:[%s13927_s4 + $0x78] sm:$0xff] }
 0x385   : > { %9732 = vmatprep.subr.bf16.mxu1 %v10685_v0  ;;  %v2675_v59 = vld [vmem:[%s13927_s4 + $0x80] sm:$0xff]  ;;  %v2678_v12 = vld [vmem:[%s13927_s4 + $0x98] sm:$0xff] }
 0x387   : > { %v2421_v30 = vpop.f32.mrb[114].mxu1  ;;  %v2599_v55 = vpop.f32.mrb[148].mxu0 }
 0x388   : > { %v2651_v21 = vmax.f32 %v2421_v30, %v2599_v55  ;;  %v8776_v60 = vpop.f32.mrb[115].mxu1  ;;  %v8847_v62 = vpop.f32.mrb[149].mxu0  ;;  %v2677_v30 = vld [vmem:[%s13927_s4 + $0x90] sm:$0xff]  ;;  %v2680_v55 = vld [vmem:[%s13927_s4 + $0xa8] sm:$0xf] }
 0x389   : > { %v7281_v60 = vld [vmem:[%s13927_s4 + $0xb8] sm:$0xff]  ;;  %v7280_v62 = vld [vmem:[%s13927_s4 + $0xb0] sm:$0xff] }
 0x38a   : > { %v12189_v17 = vpack.c.bf16 %v2651_v21, %v2650_v3  ;;  %v2676_v3 = vld [vmem:[%s13927_s4 + $0x88] sm:$0xff]  ;;  %v2679_v21 = vld [vmem:[%s13927_s4 + $0xa0] sm:$0xf] }
 0x38b   : > { %v2426_v1 = vpop.f32.mrb[116].mxu1  ;;  %v2604_v25 = vpop.f32.mrb[150].mxu0 }
 0x38c   : > { %v2652_v24 = vmax.f32 %v2426_v1, %v2604_v25  ;;  %v8779_v8 = vpop.f32.mrb[117].mxu1  ;;  %v8850_v32 = vpop.f32.mrb[151].mxu0  ;;  %9734 = vmatpush1.bf16.msra.mxu1 %v12189_v17  ;;  %v7282_v1 = vld [vmem:[%s13927_s4 + $0xc0] sm:$0xff]  ;;  %v7285_v25 = vld [vmem:[%s13927_s4 + $0xd8] sm:$0xff] }
 0x38d   : > { %9735 = vmatprep.subr.bf16.mxu1 %v10685_v0  ;;  %v7287_v8 = vld [vmem:[%s13927_s4 + $0xe8] sm:$0xff]  ;;  %v7286_v32 = vld [vmem:[%s13927_s4 + $0xe0] sm:$0xff] }
 0x38f   : > { %v2431_v27 = vpop.f32.mrb[118].mxu1  ;;  %v2609_v36 = vpop.f32.mrb[152].mxu0 }
 0x390   : > { %v2653_v35 = vmax.f32 %v2431_v27, %v2609_v36  ;;  %v8782_v45 = vpop.f32.mrb[119].mxu1  ;;  %v8853_v9 = vpop.f32.mrb[153].mxu0  ;;  %v7289_v27 = vld [vmem:[%s13927_s4 + $0xf8] sm:$0xff]  ;;  %v7288_v36 = vld [vmem:[%s13927_s4 + $0xf0] sm:$0xff] }
 0x391   : > { %v7290_v45 = vld [vmem:[%s13927_s4 + $0x100] sm:$0xff]  ;;  %v7293_v9 = vld [vmem:[%s13927_s4 + $0x118] sm:$0xff] }
 0x392   : > { %v12193_v31 = vpack.c.bf16 %v2653_v35, %v2652_v24  ;;  %v7284_v24 = vld [vmem:[%s13927_s4 + $0xd0] sm:$0xff]  ;;  %v7291_v35 = vld [vmem:[%s13927_s4 + $0x108] sm:$0xff] }
 0x393   : > { %v2436_v44 = vpop.f32.mrb[120].mxu1  ;;  %v2614_v42 = vpop.f32.mrb[154].mxu0 }
 0x394   : > { %v2654_v33 = vmax.f32 %v2436_v44, %v2614_v42  ;;  %v8785_v61 = vpop.f32.mrb[121].mxu1  ;;  %v8856_v7 = vpop.f32.mrb[155].mxu0  ;;  %9737 = vmatpush1.bf16.msra.mxu1 %v12193_v31  ;;  %v7295_v44 = vld [vmem:[%s13927_s4 + $0x128] sm:$0xff]  ;;  %v7294_v42 = vld [vmem:[%s13927_s4 + $0x120] sm:$0xff] }
 0x395   : > { %9738 = vmatprep.subr.bf16.mxu1 %v10685_v0  ;;  %v7296_v61 = vld [vmem:[%s13927_s4 + $0x130] sm:$0xff]  ;;  %v7299_v7 = vld [vmem:[%s13927_s4 + $0x148] sm:$0xff] }
 0x397   : > { %v2441_v4 = vpop.f32.mrb[122].mxu1  ;;  %v2619_v47 = vpop.f32.mrb[156].mxu0 }
 0x398   : > { %v2655_v43 = vmax.f32 %v2441_v4, %v2619_v47  ;;  %v8788_v39 = vpop.f32.mrb[123].mxu1  ;;  %v8859_v51 = vpop.f32.mrb[157].mxu0  ;;  %v7298_v4 = vld [vmem:[%s13927_s4 + $0x140] sm:$0xff]  ;;  %v7301_v47 = vld [vmem:[%s13927_s4 + $0x158] sm:$0xf] }
 0x39a   : > { %v12197_v38 = vpack.c.bf16 %v2655_v43, %v2654_v33  ;;  %v7297_v33 = vld [vmem:[%s13927_s4 + $0x138] sm:$0xff]  ;;  %v7300_v43 = vld [vmem:[%s13927_s4 + $0x150] sm:$0xf] }
 0x39b   : > { %v2446_v6 = vpop.f32.mrb[124].mxu1  ;;  %v2624_v53 = vpop.f32.mrb[158].mxu0 }
 0x39c   : > { %v2656_v54 = vmax.f32 %v2446_v6, %v2624_v53  ;;  %v8791_v63 = vpop.f32.mrb[125].mxu1  ;;  %v8862_v50 = vpop.f32.mrb[159].mxu0  ;;  %9740 = vmatpush1.bf16.msra.mxu1 %v12197_v38 }
 0x39d   : > { %9741 = vmatprep.subr.bf16.mxu1 %v10685_v0 }
 0x39f   : > { %v2451_v56 = vpop.f32.mrb[126].mxu1  ;;  %v2629_v58 = vpop.f32.mrb[160].mxu0 }
 0x3a0   : > { %v2657_v10 = vmax.f32 %v2451_v56, %v2629_v58  ;;  %v8794_v15 = vpop.f32.mrb[127].mxu1  ;;  %v8865_v14 = vpop.f32.mrb[161].mxu0 }
 0x3a2   : > { %v12201_v46 = vpack.c.bf16 %v2657_v10, %v2656_v54 }
 0x3a3   : > { %v2456_v34 = vpop.f32.mrb[128].mxu1  ;;  %v2634_v16 = vpop.f32.mrb[162].mxu0 }
 0x3a4   : > { %v12203_v23 = vmax.f32 %v2456_v34, %v2634_v16  ;;  %v8797_v2 = vpop.f32.mrb[129].mxu1  ;;  %v8868_v18 = vpop.f32.mrb[163].mxu0  ;;  %9743 = vmatpush1.bf16.msra.mxu1 %v12201_v46 }
 0x3a5   : > { %2755 = vmatprep.subr.mxu1 %v10688_v22 }
 0x3a8   : > { %2756 = vmatpush1.msra.mxu1 %v12203_v23 }
 0x3a9   : > { %2780 = vmatmul.mubr.f32.vlgmr.msra.gmra.mrb[130].mxu1 %v2659_v20  ;;  %9744 = vmatprep.subr.bf16.mxu1 %v10685_v0 }
 0x3aa   : > { %9746 = vmatpush1.bf16.msra.mxu1 %v12165_v49  ;;  %7270 = vmatprep.mubr.msk.f32.mxu1 %vm2681_vm6, %v2662_v19  ;;  %v2663_v49 = vld [vmem:[%s13927_s4 + $0x20] sm:$0xff] }
 0x3ab   : > { %9747 = vmatprep.subr.bf16.mxu1 %v10685_v0 }
 0x3ad   : > { %2785 = vmatmul.mubr.f32.gmra.mrb[132].mxu1 %v2661_v28 }
 0x3ae   : > { %9749 = vmatpush1.bf16.msra.mxu1 %v12169_v48  ;;  %7271 = vmatprep.mubr.msk.f32.mxu1 %vm2681_vm6, %v2664_v29  ;;  %v2665_v48 = vld [vmem:[%s13927_s4 + $0x30] sm:$0xff] }
 0x3af   : > { %9750 = vmatprep.subr.bf16.mxu1 %v10685_v0 }
 0x3b1   : > { %2790 = vmatmul.mubr.f32.gmra.mrb[134].mxu1 %v2663_v49 }
 0x3b2   : > { %9752 = vmatpush1.bf16.msra.mxu1 %v12173_v37  ;;  %7272 = vmatprep.mubr.msk.f32.mxu1 %vm2681_vm6, %v2666_v11  ;;  %v2667_v37 = vld [vmem:[%s13927_s4 + $0x40] sm:$0xff] }
 0x3b3   : > { %9753 = vmatprep.subr.bf16.mxu1 %v10685_v0 }
 0x3b5   : > { %2795 = vmatmul.mubr.f32.gmra.mrb[136].mxu1 %v2665_v48 }
 0x3b6   : > { %9755 = vmatpush1.bf16.msra.mxu1 %v12177_v52  ;;  %7273 = vmatprep.mubr.msk.f32.mxu1 %vm2681_vm6, %v2668_v41  ;;  %v2669_v52 = vld [vmem:[%s13927_s4 + $0x50] sm:$0xff] }
 0x3b7   : > { %9756 = vmatprep.subr.bf16.mxu1 %v10685_v0 }
 0x3b9   : > { %2800 = vmatmul.mubr.f32.gmra.mrb[138].mxu1 %v2667_v37 }
 0x3ba   : > { %9758 = vmatpush1.bf16.msra.mxu1 %v12181_v5  ;;  %7274 = vmatprep.mubr.msk.f32.mxu1 %vm2681_vm6, %v2670_v13  ;;  %v2671_v5 = vld [vmem:[%s13927_s4 + $0x60] sm:$0xff] }
 0x3bb   : > { %9759 = vmatprep.subr.bf16.mxu1 %v10685_v0 }
 0x3bd   : > { %2805 = vmatmul.mubr.f32.gmra.mrb[140].mxu1 %v2669_v52 }
 0x3be   : > { %9761 = vmatpush1.bf16.msra.mxu1 %v12185_v40  ;;  %7275 = vmatprep.mubr.msk.f32.mxu1 %vm2681_vm6, %v2672_v26  ;;  %v2673_v40 = vld [vmem:[%s13927_s4 + $0x70] sm:$0xff] }
 0x3bf   : > { %9762 = vmatprep.subr.bf16.mxu1 %v10685_v0 }
 0x3c1   : > { %2810 = vmatmul.mubr.f32.gmra.mrb[142].mxu1 %v2671_v5 }
 0x3c2   : > { %9764 = vmatpush1.bf16.msra.mxu1 %v12189_v17  ;;  %7276 = vmatprep.mubr.msk.f32.mxu1 %vm2681_vm6, %v2674_v57  ;;  %v7283_v17 = vld [vmem:[%s13927_s4 + $0xc8] sm:$0xff] }
 0x3c3   : > { %9765 = vmatprep.subr.bf16.mxu1 %v10685_v0 }
 0x3c5   : > { %2815 = vmatmul.mubr.f32.gmra.mrb[144].mxu1 %v2673_v40 }
 0x3c6   : > { %9767 = vmatpush1.bf16.msra.mxu1 %v12193_v31  ;;  %7277 = vmatprep.mubr.msk.f32.mxu1 %vm2681_vm6, %v2676_v3  ;;  %v7292_v31 = vld [vmem:[%s13927_s4 + $0x110] sm:$0xff] }
 0x3c7   : > { %9768 = vmatprep.subr.bf16.mxu1 %v10685_v0 }
 0x3c9   : > { %2820 = vmatmul.mubr.f32.gmra.mrb[146].mxu1 %v2675_v59 }
 0x3ca   : > { %9770 = vmatpush1.bf16.msra.mxu1 %v12197_v38  ;;  %7278 = vmatprep.mubr.msk.f32.mxu1 %vm2681_vm6, %v2678_v12 }
 0x3cb   : > { %9771 = vmatprep.subr.bf16.mxu1 %v10685_v0 }
 0x3cd   : > { %2825 = vmatmul.mubr.f32.gmra.mrb[148].mxu1 %v2677_v30 }
 0x3ce   : > { %9773 = vmatpush1.bf16.msra.mxu1 %v12201_v46  ;;  %7279 = vmatprep.mubr.msk.f32.mxu1 %vm2681_vm6, %v2680_v55 }
 0x3cf   : > { %2931 = vmatprep.subr.mxu1 %v10688_v22 }
 0x3d1   : > { %2830 = vmatmul.mubr.f32.gmra.mrb[150].mxu1 %v2679_v21 }
 0x3d2   : > { %2932 = vmatpush1.msra.mxu1 %v12203_v23  ;;  %7302 = vmatprep.mubr.msk.f32.mxu1 %vm2681_vm6, %v7281_v60 }
 0x3d5   : > { %2956 = vmatmul.mubr.f32.vlgmr.msra.gmra.mrb[152].mxu1 %v7280_v62 }
 0x3d6   : > { %7303 = vmatprep.mubr.msk.f32.mxu1 %vm2681_vm6, %v7283_v17 }
 0x3d9   : > { %2961 = vmatmul.mubr.f32.gmra.mrb[154].mxu1 %v7282_v1 }
 0x3da   : > { %7304 = vmatprep.mubr.msk.f32.mxu1 %vm2681_vm6, %v7285_v25 }
 0x3dd   : > { %2966 = vmatmul.mubr.f32.gmra.mrb[156].mxu1 %v7284_v24 }
 0x3de   : > { %7305 = vmatprep.mubr.msk.f32.mxu1 %vm2681_vm6, %v7287_v8 }
 0x3e1   : > { %2971 = vmatmul.mubr.f32.gmra.mrb[158].mxu1 %v7286_v32 }
 0x3e2   : > { %7306 = vmatprep.mubr.msk.f32.mxu1 %vm2681_vm6, %v7289_v27 }
 0x3e5   : > { %2976 = vmatmul.mubr.f32.gmra.mrb[160].mxu1 %v7288_v36 }
 0x3e6   : > { %7307 = vmatprep.mubr.msk.f32.mxu1 %vm2681_vm6, %v7291_v35 }
 0x3e9   : > { %2981 = vmatmul.mubr.f32.gmra.mrb[162].mxu1 %v7290_v45 }
 0x3ea   : > { %7308 = vmatprep.mubr.msk.f32.mxu1 %vm2681_vm6, %v7293_v9 }
 0x3ed   : > { %2986 = vmatmul.mubr.f32.gmra.mrb[164].mxu1 %v7292_v31 }
 0x3ee   : > { %7309 = vmatprep.mubr.msk.f32.mxu1 %vm2681_vm6, %v7295_v44 }
 0x3f1   : > { %2991 = vmatmul.mubr.f32.gmra.mrb[166].mxu1 %v7294_v42 }
 0x3f2   : > { %7310 = vmatprep.mubr.msk.f32.mxu1 %vm2681_vm6, %v7297_v33 }
 0x3f5   : > { %2996 = vmatmul.mubr.f32.gmra.mrb[168].mxu1 %v7296_v61 }
 0x3f6   : > { %7311 = vmatprep.mubr.msk.f32.mxu1 %vm2681_vm6, %v7299_v7 }
 0x3f9   : > { %3001 = vmatmul.mubr.f32.gmra.mrb[170].mxu1 %v7298_v4 }
 0x3fa   : > { %7312 = vmatprep.mubr.msk.f32.mxu1 %vm2681_vm6, %v7301_v47 }
 0x3fd   : > { %3006 = vmatmul.mubr.f32.gmra.mrb[172].mxu1 %v7300_v43 }
 0x47c   : > { %v2781_v39 = vpop.f32.mrb[130].mxu1 }
 0x47d   : > { %v2783_v51 = vpop.f32.mrb[131].mxu1 }
 0x480   : > { %v2786_v38 = vpop.f32.mrb[132].mxu1 }
 0x481   : > { %v2788_v6 = vpop.f32.mrb[133].mxu1 }
 0x484   : > { %v2791_v53 = vpop.f32.mrb[134].mxu1 }
 0x485   : > { %v2793_v54 = vpop.f32.mrb[135].mxu1 }
 0x488   : > { %v2796_v63 = vpop.f32.mrb[136].mxu1 }
 0x489   : > { %v2798_v50 = vpop.f32.mrb[137].mxu1 }
 0x48c   : > { %v2801_v56 = vpop.f32.mrb[138].mxu1 }
 0x48d   : > { %v2803_v58 = vpop.f32.mrb[139].mxu1 }
 0x48e   : > { %v7313_v58 = vld [vmem:[%s13928_s5 + $0xa0] sm:$0xff] }
 0x48f   : > { %8891 = vmatprep.mubr.msk.f32.mxu0 %vm3130_vm9, %v7313_v58 }
 0x490   : > { %v2806_v10 = vpop.f32.mrb[140].mxu1 }
 0x491   : > { %v2808_v15 = vpop.f32.mrb[141].mxu1 }
 0x494   : > { %v2811_v14 = vpop.f32.mrb[142].mxu1 }
 0x495   : > { %v2813_v46 = vpop.f32.mrb[143].mxu1 }
 0x498   : > { %v2816_v34 = vpop.f32.mrb[144].mxu1 }
 0x499   : > { %v2818_v16 = vpop.f32.mrb[145].mxu1 }
 0x49a   : > { %v4485_v16 = vld [vmem:[%s13929_s6] sm:$0xff] }
 0x49c   : > { %v2821_v23 = vpop.f32.mrb[146].mxu1 }
 0x49d   : > { %v2823_v2 = vpop.f32.mrb[147].mxu1 }
 0x49e   : > { %v4487_v2 = vld [vmem:[%s13929_s6 + $0x10] sm:$0xff] }
 0x4a0   : > { %v2826_v18 = vpop.f32.mrb[148].mxu1 }
 0x4a1   : > { %v2828_v20 = vpop.f32.mrb[149].mxu1 }
 0x4a2   : > { %v4489_v20 = vld [vmem:[%s13929_s6 + $0x20] sm:$0xff] }
 0x4a4   : > { %v12380_v19 = vpop.f32.mrb[150].mxu1 }
 0x4a5   : > { %v2833_v28 = vpop.f32.mrb[151].mxu1 }
 0x4a6   : > { %v4491_v28 = vld [vmem:[%s13929_s6 + $0x30] sm:$0xff] }
 0x4a8   : > { %v2957_v29 = vpop.f32.mrb[152].mxu1 }
 0x4a9   : > { %v3011_v49 = vmax.f32 %v2781_v39, %v2957_v29  ;;  %v2959_v11 = vpop.f32.mrb[153].mxu1  ;;  %v4492_v29 = vld [vmem:[%s13929_s6 + $0x38] sm:$0xff] }
 0x4aa   : > { %v4494_v11 = vld [vmem:[%s13929_s6 + $0x48] sm:$0xff] }
 0x4ab   : > { %3023 = vst.msk [vmem:[#allocation2] sm:$0xff] %vm3022_vm7, %v3011_v49  ;;  %v4493_v49 = vld [vmem:[%s13929_s6 + $0x40] sm:$0xff] }
 0x4ac   : > { %v2962_v48 = vpop.f32.mrb[154].mxu1 }
 0x4ad   : > { %v3012_v41 = vmax.f32 %v2786_v38, %v2962_v48  ;;  %v2964_v37 = vpop.f32.mrb[155].mxu1  ;;  %v4495_v48 = vld [vmem:[%s13929_s6 + $0x50] sm:$0xff] }
 0x4ae   : > { %v4497_v37 = vld [vmem:[%s13929_s6 + $0x60] sm:$0xff] }
 0x4af   : > { %3024 = vst.msk [vmem:[#allocation2 + $0x8] sm:$0xff] %vm3022_vm7, %v3012_v41  ;;  %v4496_v41 = vld [vmem:[%s13929_s6 + $0x58] sm:$0xff] }
 0x4b0   : > { %v2967_v13 = vpop.f32.mrb[156].mxu1 }
 0x4b1   : > { %v3013_v52 = vmax.f32 %v2791_v53, %v2967_v13  ;;  %v2969_v26 = vpop.f32.mrb[157].mxu1  ;;  %v4498_v13 = vld [vmem:[%s13929_s6 + $0x68] sm:$0xff] }
 0x4b2   : > { %v3055_v3 = vld [vmem:[#allocation2] sm:$0xff]  ;;  %v4500_v26 = vld [vmem:[%s13929_s6 + $0x78] sm:$0xff] }
 0x4b3   : > { %3025 = vst.msk [vmem:[#allocation2 + $0x10] sm:$0xff] %vm3022_vm7, %v3013_v52  ;;  %v4499_v52 = vld [vmem:[%s13929_s6 + $0x70] sm:$0xff] }
 0x4b4   : > { %v2972_v5 = vpop.f32.mrb[158].mxu1 }
 0x4b5   : > { %v3014_v57 = vmax.f32 %v2796_v63, %v2972_v5  ;;  %v2974_v40 = vpop.f32.mrb[159].mxu1  ;;  %v4501_v5 = vld [vmem:[%s13929_s6 + $0x80] sm:$0xff] }
 0x4b6   : > { %v3056_v59 = vld [vmem:[#allocation2 + $0x8] sm:$0xff]  ;;  %v4503_v40 = vld [vmem:[%s13929_s6 + $0x90] sm:$0xff] }
 0x4b7   : > { %3026 = vst.msk [vmem:[#allocation2 + $0x18] sm:$0xff] %vm3022_vm7, %v3014_v57  ;;  %v12386_v12 = vpack.i.bf16 %v3056_v59, %v3055_v3  ;;  %v12388_v55 = vpack.c.bf16 %v3056_v59, %v3055_v3  ;;  %v4502_v57 = vld [vmem:[%s13929_s6 + $0x88] sm:$0xff]  ;;  %v4504_v3 = vld [vmem:[%s13929_s6 + $0x98] sm:$0xff] }
 0x4b8   : > { %v2977_v30 = vpop.f32.mrb[160].mxu1 }
 0x4b9   : > { %v3015_v21 = vmax.f32 %v2801_v56, %v2977_v30  ;;  %10353 = vrot.lane.b32.xlu0 %v12386_v12, %s10686_s23  ;;  %v2979_v60 = vpop.f32.mrb[161].mxu1 }
 0x4ba   : > { %v3057_v25 = vld [vmem:[#allocation2 + $0x10] sm:$0xff] }
 0x4bb   : > { %3027 = vst.msk [vmem:[#allocation2 + $0x20] sm:$0xff] %vm3022_vm7, %v3015_v21 }
 0x4bc   : > { %v2982_v62 = vpop.f32.mrb[162].mxu1 }
 0x4bd   : > { %v3016_v17 = vmax.f32 %v2806_v10, %v2982_v62  ;;  %v2984_v1 = vpop.f32.mrb[163].mxu1 }
 0x4be   : > { %v3058_v24 = vld [vmem:[#allocation2 + $0x18] sm:$0xff] }
 0x4bf   : > { %3028 = vst.msk [vmem:[#allocation2 + $0x28] sm:$0xff] %vm3022_vm7, %v3016_v17  ;;  %v10357_v8 = vpack.i.bf16 %v3058_v24, %v3057_v25  ;;  %v12394_v27 = vpack.c.bf16 %v3058_v24, %v3057_v25 }
 0x4c0   : > { %v2987_v32 = vpop.f32.mrb[164].mxu1 }
 0x4c1   : > { %v3017_v36 = vmax.f32 %v2811_v14, %v2987_v32  ;;  %10358 = vrot.lane.b32.xlu1 %v10357_v8, %s10686_s23  ;;  %v2989_v35 = vpop.f32.mrb[165].mxu1 }
 0x4c2   : > { %v3059_v44 = vld [vmem:[#allocation2 + $0x20] sm:$0xff] }
 0x4c3   : > { %3029 = vst.msk [vmem:[#allocation2 + $0x30] sm:$0xff] %vm3022_vm7, %v3017_v36 }
 0x4c4   : > { %v2992_v45 = vpop.f32.mrb[166].mxu1 }
 0x4c5   : > { %v3018_v9 = vmax.f32 %v2816_v34, %v2992_v45  ;;  %v2994_v31 = vpop.f32.mrb[167].mxu1 }
 0x4c6   : > { %v3060_v42 = vld [vmem:[#allocation2 + $0x28] sm:$0xff] }
 0x4c7   : > { %3030 = vst.msk [vmem:[#allocation2 + $0x38] sm:$0xff] %vm3022_vm7, %v3018_v9  ;;  %v10362_v33 = vpack.i.bf16 %v3060_v42, %v3059_v44  ;;  %v12399_v7 = vpack.c.bf16 %v3060_v42, %v3059_v44 }
 0x4c8   : > { %v2997_v61 = vpop.f32.mrb[168].mxu1 }
 0x4c9   : > { %v3019_v4 = vmax.f32 %v2821_v23, %v2997_v61  ;;  %10363 = vrot.lane.b32.xlu0 %v10362_v33, %s10686_s23  ;;  %v2999_v47 = vpop.f32.mrb[169].mxu1  ;;  %v4486_v23 = vld [vmem:[%s13929_s6 + $0x8] sm:$0xff] }
 0x4ca   : > { %v3061_v38 = vld [vmem:[#allocation2 + $0x30] sm:$0xff] }
 0x4cb   : > { %3031 = vst.msk [vmem:[#allocation2 + $0x40] sm:$0xff] %vm3022_vm7, %v3019_v4  ;;  %v7314_v4 = vld [vmem:[%s13928_s5 + $0xa8] sm:$0xff]  ;;  %v7315_v47 = vld [vmem:[%s13928_s5 + $0xb0] sm:$0xff] }
 0x4cc   : > { %v3002_v43 = vpop.f32.mrb[170].mxu1 }
 0x4cd   : > { %v3020_v39 = vmax.f32 %v2826_v18, %v3002_v43  ;;  %v3004_v51 = vpop.f32.mrb[171].mxu1  ;;  %v4488_v18 = vld [vmem:[%s13929_s6 + $0x18] sm:$0xff] }
 0x4ce   : > { %v3062_v6 = vld [vmem:[#allocation2 + $0x38] sm:$0xff]  ;;  %v7319_v51 = vld [vmem:[%s13928_s5 + $0xd0] sm:$0xff] }
 0x4cf   : > { %3032 = vst.msk [vmem:[#allocation2 + $0x48] sm:$0xff] %vm3022_vm7, %v3020_v39  ;;  %v10367_v53 = vpack.i.bf16 %v3062_v6, %v3061_v38  ;;  %v12404_v63 = vpack.c.bf16 %v3062_v6, %v3061_v38  ;;  %v7316_v43 = vld [vmem:[%s13928_s5 + $0xb8] sm:$0xff]  ;;  %v7317_v39 = vld [vmem:[%s13928_s5 + $0xc0] sm:$0xff] }
 0x4d0   : > { %v3007_v54 = vpop.f32.mrb[172].mxu1  ;;  %v7321_v38 = vld [vmem:[%s13928_s5 + $0xe0] sm:$0xff] }
 0x4d1   : > { %v3021_v50 = vmax.f32 %v12380_v19, %v3007_v54  ;;  %10368 = vrot.lane.b32.xlu1 %v10367_v53, %s10686_s23  ;;  %v3009_v56 = vpop.f32.mrb[173].mxu1  ;;  %v4490_v19 = vld [vmem:[%s13929_s6 + $0x28] sm:$0xff] }
 0x4d2   : > { %v3063_v10 = vld [vmem:[#allocation2 + $0x40] sm:$0xff] }
 0x4d3   : > { %3034 = vst.msk [vmem:[#allocation2 + $0x50] sm:$0xf] %vm3033_vm8, %v3021_v50  ;;  %v7325_v56 = vld [vmem:[%s13928_s5 + $0x100] sm:$0xff] }
 0x4d6   : > { %v3064_v15 = vld [vmem:[#allocation2 + $0x48] sm:$0xff] }
 0x4d7   : > { %v10372_v14 = vpack.i.bf16 %v3064_v15, %v3063_v10  ;;  %v12412_v46 = vpack.c.bf16 %v3064_v15, %v3063_v10  ;;  %v7326_v10 = vld [vmem:[%s13928_s5 + $0x108] sm:$0xff]  ;;  %v7327_v15 = vld [vmem:[%s13928_s5 + $0x110] sm:$0xff] }
 0x4d9   : > { %10373 = vrot.lane.b32.xlu0 %v10372_v14, %s10686_s23 }
 0x4da   : > { %v12415_v34 = vld [vmem:[#allocation2 + $0x50] sm:$0xf] }
 0x4db   : > { %3118 = vrot.lane.b32.xlu1 %v12415_v34, %s10686_s23 }
 0x4dd   : > { %10378 = vrot.lane.b32.xlu0 %v12386_v12, %s10689_s24 }
 0x4df   : > { %10383 = vrot.lane.b32.xlu1 %v10357_v8, %s10689_s24 }
 0x4e1   : > { %10388 = vrot.lane.b32.xlu0 %v10362_v33, %s10689_s24 }
 0x4e3   : > { %10393 = vrot.lane.b32.xlu1 %v10367_v53, %s10689_s24 }
 0x4e5   : > { %10398 = vrot.lane.b32.xlu0 %v10372_v14, %s10689_s24 }
 0x4e7   : > { %3626 = vrot.lane.b32.xlu1 %v12415_v34, %s10689_s24 }
 0x4e9   : > { %10403 = vrot.lane.b32.xlu0 %v12386_v12, %s10690_s14 }
 0x4eb   : > { %10408 = vrot.lane.b32.xlu1 %v10357_v8, %s10690_s14 }
 0x4ed   : > { %10413 = vrot.lane.b32.xlu0 %v10362_v33, %s10690_s14 }
 0x4ef   : > { %10418 = vrot.lane.b32.xlu1 %v10367_v53, %s10690_s14 }
 0x4f1   : > { %10423 = vrot.lane.b32.xlu0 %v10372_v14, %s10690_s14 }
 0x4f3   : > { %3926 = vrot.lane.b32.xlu1 %v12415_v34, %s10690_s14 }
 0x4f5   : > { %10428 = vrot.lane.b32.xlu0 %v12386_v12, %s10691_s30 }
 0x4f7   : > { %10433 = vrot.lane.b32.xlu1 %v10357_v8, %s10691_s30 }
 0x4f9   : > { %10438 = vrot.lane.b32.xlu0 %v10362_v33, %s10691_s30 }
 0x4fb   : > { %10443 = vrot.lane.b32.xlu1 %v10367_v53, %s10691_s30  ;;  %v7323_v53 = vld [vmem:[%s13928_s5 + $0xf0] sm:$0xff] }
 0x4fd   : > { %10448 = vrot.lane.b32.xlu0 %v10372_v14, %s10691_s30  ;;  %v7328_v14 = vld [vmem:[%s13928_s5 + $0x118] sm:$0xff] }
 0x4ff   : > { %4226 = vrot.lane.b32.xlu1 %v12415_v34, %s10691_s30 }
 0x501   : > { %4507 = vperm.xlu0 %10350, %v4485_v16   ;;  %v7331_v16 = vld [vmem:[%s13928_s5 + $0x130] sm:$0xff] }
 0x503   : > { %4512 = vperm.xlu1 %10351, %v4486_v23  }
 0x505   : > { %4517 = vperm.xlu0 %10350, %v4487_v2   ;;  %v7332_v2 = vld [vmem:[%s13928_s5 + $0x138] sm:$0xff] }
 0x507   : > { %4522 = vperm.xlu1 %10351, %v4488_v18   ;;  %v3035_v18 = vld [vmem:[%s13928_s5] sm:$0xff] }
 0x509   : > { %4527 = vperm.xlu0 %10350, %v4489_v20  }
 0x50b   : > { %4532 = vperm.xlu1 %10351, %v4490_v19  }
 0x50d   : > { %4537 = vperm.xlu0 %10350, %v4491_v28  }
 0x50f   : > { %4542 = vperm.xlu1 %10351, %v4492_v29   ;;  %v3036_v29 = vld [vmem:[%s13928_s5 + $0x8] sm:$0xff] }
 0x511   : > { %4547 = vperm.xlu0 %10350, %v4493_v49   ;;  %v3037_v49 = vld [vmem:[%s13928_s5 + $0x10] sm:$0xff] }
 0x513   : > { %4552 = vperm.xlu1 %10351, %v4494_v11  }
 0x515   : > { %4557 = vperm.xlu0 %10350, %v4495_v48  }
 0x517   : > { %4562 = vperm.xlu1 %10351, %v4496_v41  }
 0x519   : > { %4567 = vperm.xlu0 %10350, %v4497_v37  }
 0x51b   : > { %4572 = vperm.xlu1 %10351, %v4498_v13   ;;  %v3038_v13 = vld [vmem:[%s13928_s5 + $0x18] sm:$0xff] }
 0x51d   : > { %4577 = vperm.xlu0 %10350, %v4499_v52   ;;  %v3039_v52 = vld [vmem:[%s13928_s5 + $0x20] sm:$0xff] }
 0x51f   : > { %4582 = vperm.xlu1 %10351, %v4500_v26  }
 0x521   : > { %4587 = vperm.xlu0 %10350, %v4501_v5  }
 0x523   : > { %4592 = vperm.xlu1 %10351, %v4502_v57  }
 0x525   : > { %4597 = vperm.xlu0 %10350, %v4503_v40  }
 0x527   : > { %4602 = vperm.xlu1 %10351, %v4504_v3   ;;  %v3040_v3 = vld [vmem:[%s13928_s5 + $0x28] sm:$0xff] }
 0x52b   : > { %v10354_v59 = vpop.permute.xlu0 %10353 }
 0x52c   : > { %v10356_v12 = vunpack.i.h.bf16 %v10354_v59  ;;  %v10355_v30 = vunpack.i.l.bf16 %v10354_v59  ;;  %v3041_v59 = vld [vmem:[%s13928_s5 + $0x30] sm:$0xff] }
 0x52e   : > { %v9774_v21 = vpack.c.bf16 %v10356_v12, %v10355_v30 }
 0x530   : > { %9775 = vmatprep.subr.bf16.mxu0 %v9774_v21 }
 0x531   : > { %9777 = vmatpush3.bf16.msra.mxu0 %v9774_v21 }
 0x533   : > { %v10359_v60 = vpop.permute.xlu1 %10358 }
 0x534   : > { %v10361_v62 = vunpack.i.h.bf16 %v10359_v60  ;;  %v10360_v17 = vunpack.i.l.bf16 %v10359_v60  ;;  %v3042_v60 = vld [vmem:[%s13928_s5 + $0x38] sm:$0xff] }
 0x536   : > { %v9778_v1 = vpack.c.bf16 %v10361_v62, %v10360_v17  ;;  %v3043_v62 = vld [vmem:[%s13928_s5 + $0x40] sm:$0xff] }
 0x538   : > { %9779 = vmatprep.subr.bf16.mxu0 %v9778_v1 }
 0x539   : > { %9781 = vmatpush3.bf16.msra.mxu0 %v9778_v1 }
 0x53b   : > { %v10364_v25 = vpop.permute.xlu0 %10363 }
 0x53c   : > { %v10366_v24 = vunpack.i.h.bf16 %v10364_v25  ;;  %v10365_v8 = vunpack.i.l.bf16 %v10364_v25  ;;  %v3044_v25 = vld [vmem:[%s13928_s5 + $0x48] sm:$0xff] }
 0x53e   : > { %v9782_v32 = vpack.c.bf16 %v10366_v24, %v10365_v8  ;;  %v3045_v24 = vld [vmem:[%s13928_s5 + $0x50] sm:$0xff] }
 0x540   : > { %9783 = vmatprep.subr.bf16.mxu0 %v9782_v32 }
 0x541   : > { %9785 = vmatpush3.bf16.msra.mxu0 %v9782_v32 }
 0x543   : > { %v10369_v36 = vpop.permute.xlu1 %10368 }
 0x544   : > { %v10371_v35 = vunpack.i.h.bf16 %v10369_v36  ;;  %v10370_v45 = vunpack.i.l.bf16 %v10369_v36 }
 0x546   : > { %v9786_v9 = vpack.c.bf16 %v10371_v35, %v10370_v45  ;;  %v3046_v35 = vld [vmem:[%s13928_s5 + $0x58] sm:$0xff]  ;;  %v3047_v45 = vld [vmem:[%s13928_s5 + $0x60] sm:$0xff] }
 0x548   : > { %9787 = vmatprep.subr.bf16.mxu0 %v9786_v9 }
 0x549   : > { %9789 = vmatpush3.bf16.msra.mxu0 %v9786_v9 }
 0x54b   : > { %v10374_v31 = vpop.permute.xlu0 %10373 }
 0x54c   : > { %v10376_v44 = vunpack.i.h.bf16 %v10374_v31  ;;  %v10375_v42 = vunpack.i.l.bf16 %v10374_v31  ;;  %v3048_v31 = vld [vmem:[%s13928_s5 + $0x68] sm:$0xff] }
 0x54d   : > { %v3119_v61 = vpop.permute.xlu1 %3118 }
 0x54e   : > { %v9790_v33 = vpack.c.bf16 %v10376_v44, %v10375_v42  ;;  %v3049_v44 = vld [vmem:[%s13928_s5 + $0x70] sm:$0xff]  ;;  %v3050_v42 = vld [vmem:[%s13928_s5 + $0x78] sm:$0xff] }
 0x54f   : > { %v10379_v6 = vpop.permute.xlu0 %10378 }
 0x550   : > { %9791 = vmatprep.subr.bf16.mxu0 %v9790_v33  ;;  %v10381_v54 = vunpack.i.h.bf16 %v10379_v6  ;;  %v10380_v50 = vunpack.i.l.bf16 %v10379_v6  ;;  %v7377_v6 = vld [vmem:[%s13928_s5 + $0x150] sm:$0xff] }
 0x551   : > { %9793 = vmatpush3.bf16.msra.mxu0 %v9790_v33  ;;  %v10384_v23 = vpop.permute.xlu1 %10383  ;;  %v3051_v33 = vld [vmem:[%s13928_s5 + $0x80] sm:$0xff] }
 0x552   : > { %8889 = vmatprep.subr.msk.mxu0 %vm2286_vm2, %v3119_v61  ;;  %v9814_v58 = vpack.c.bf16 %v10381_v54, %v10380_v50  ;;  %v10386_v20 = vunpack.i.h.bf16 %v10384_v23  ;;  %v10385_v19 = vunpack.i.l.bf16 %v10384_v23 }
 0x553   : > { %v10389_v28 = vpop.permute.xlu0 %10388 }
 0x554   : > { %v9818_v11 = vpack.c.bf16 %v10386_v20, %v10385_v19  ;;  %v10391_v48 = vunpack.i.h.bf16 %v10389_v28  ;;  %v10390_v41 = vunpack.i.l.bf16 %v10389_v28  ;;  %v7383_v20 = vld [vmem:[%s13928_s5 + $0x180] sm:$0xff] }
 0x555   : > { %8890 = vmatpush3.msk.msra.mxu0 %vm2286_vm2, %v3119_v61  ;;  %v10394_v37 = vpop.permute.xlu1 %10393  ;;  %v3052_v61 = vld [vmem:[%s13928_s5 + $0x88] sm:$0xff] }
 0x556   : > { %8892 = vmatmul.mubr.msk.f32.vlgmr.msra.gmra.mrb[164].mxu0 %vm3130_vm9, %v7314_v4  ;;  %9795 = vmatprep.subr.bf16.mxu0 %v12388_v55  ;;  %v9822_v26 = vpack.c.bf16 %v10391_v48, %v10390_v41  ;;  %v10396_v5 = vunpack.i.h.bf16 %v10394_v37  ;;  %v10395_v57 = vunpack.i.l.bf16 %v10394_v37  ;;  %v3053_v4 = vld [vmem:[%s13928_s5 + $0x90] sm:$0xff]  ;;  %v7386_v37 = vld [vmem:[%s13928_s5 + $0x198] sm:$0xff] }
 0x557   : > { %9797 = vmatpush3.bf16.msra.mxu0 %v12388_v55  ;;  %8894 = vmatprep.mubr.msk.f32.mxu0 %vm3130_vm9, %v7315_v47  ;;  %v7318_v55 = vld [vmem:[%s13928_s5 + $0xc8] sm:$0xff]  ;;  %v10399_v40 = vpop.permute.xlu0 %10398 }
 0x558   : > { %9799 = vmatprep.subr.bf16.mxu0 %v12394_v27  ;;  %v9826_v12 = vpack.c.bf16 %v10396_v5, %v10395_v57  ;;  %v10401_v30 = vunpack.i.h.bf16 %v10399_v40  ;;  %v10400_v21 = vunpack.i.l.bf16 %v10399_v40  ;;  %v7389_v5 = vld [vmem:[%s13928_s5 + $0x1b0] sm:$0xff]  ;;  %v7390_v57 = vld [vmem:[%s13928_s5 + $0x1b8] sm:$0xff]  ;;  %v7391_v40 = vld [vmem:[%s13928_s5 + $0x1c0] sm:$0xff] }
 0x559   : > { %v3627_v36 = vpop.permute.xlu1 %3626 }
 0x55a   : > { %8895 = vmatmul.mubr.msk.f32.gmra.mrb[166].mxu0 %vm3130_vm9, %v7316_v43  ;;  %v9830_v17 = vpack.c.bf16 %v10401_v30, %v10400_v21  ;;  %v3054_v43 = vld [vmem:[%s13928_s5 + $0x98] sm:$0xff]  ;;  %v7416_v21 = vld [vmem:[%s13928_s5 + $0x1e0] sm:$0xff] }
 0x55b   : > { %9801 = vmatpush3.bf16.msra.mxu0 %v12394_v27  ;;  %8897 = vmatprep.mubr.msk.f32.mxu0 %vm3130_vm9, %v7317_v39  ;;  %v7320_v27 = vld [vmem:[%s13928_s5 + $0xd8] sm:$0xff]  ;;  %v10404_v1 = vpop.permute.xlu0 %10403  ;;  %v7375_v39 = vld [vmem:[%s13928_s5 + $0x140] sm:$0xff] }
 0x55c   : > { %9803 = vmatprep.subr.bf16.mxu0 %v12399_v7  ;;  %v10406_v8 = vunpack.i.h.bf16 %v10404_v1  ;;  %v10405_v32 = vunpack.i.l.bf16 %v10404_v1  ;;  %v7394_v30 = vld [vmem:[%s13928_s5 + $0x1d8] sm:$0xff]  ;;  %v7417_v1 = vld [vmem:[%s13928_s5 + $0x1e8] sm:$0xff] }
 0x55d   : > { %v10409_v47 = vpop.permute.xlu1 %10408 }
 0x55e   : > { %8898 = vmatmul.mubr.msk.f32.gmra.mrb[168].mxu0 %vm3130_vm9, %v7318_v55  ;;  %v9834_v9 = vpack.c.bf16 %v10406_v8, %v10405_v32  ;;  %v10411_v55 = vunpack.i.h.bf16 %v10409_v47 }
 0x55f   : > { %9805 = vmatpush3.bf16.msra.mxu0 %v12399_v7  ;;  %8900 = vmatprep.mubr.msk.f32.mxu0 %vm3130_vm9, %v7319_v51  ;;  %v7322_v7 = vld [vmem:[%s13928_s5 + $0xe8] sm:$0xff]  ;;  %v10410_v51 = vunpack.i.l.bf16 %v10409_v47 }
 0x560   : > { %9807 = vmatprep.subr.bf16.mxu0 %v12404_v63 }
 0x561   : > { %v10419_v50 = vpop.permute.xlu1 %10418 }
 0x562   : > { %8901 = vmatmul.mubr.msk.f32.gmra.mrb[170].mxu0 %vm3130_vm9, %v7320_v27  ;;  %v10414_v27 = vpop.permute.xlu0 %10413 }
 0x563   : > { %9809 = vmatpush3.bf16.msra.mxu0 %v12404_v63  ;;  %8903 = vmatprep.mubr.msk.f32.mxu0 %vm3130_vm9, %v7321_v38  ;;  %v7324_v63 = vld [vmem:[%s13928_s5 + $0xf8] sm:$0xff]  ;;  %v7376_v38 = vld [vmem:[%s13928_s5 + $0x148] sm:$0xff]  ;;  %v10415_v54 = vunpack.i.l.bf16 %v10414_v27 }
 0x564   : > { %9811 = vmatprep.subr.bf16.mxu0 %v12412_v46 }
 0x565   : > { %v3927_v41 = vpop.permute.xlu1 %3926 }
 0x566   : > { %8904 = vmatmul.mubr.msk.f32.gmra.mrb[172].mxu0 %vm3130_vm9, %v7322_v7  ;;  %v9838_v7 = vpack.c.bf16 %v10411_v55, %v10410_v51  ;;  %v7424_v55 = vld [vmem:[%s13928_s5 + $0x220] sm:$0xff] }
 0x567   : > { %9813 = vmatpush3.bf16.msra.mxu0 %v12412_v46  ;;  %8906 = vmatprep.mubr.msk.f32.mxu0 %vm3130_vm9, %v7323_v53  ;;  %v7329_v46 = vld [vmem:[%s13928_s5 + $0x120] sm:$0xff]  ;;  %v10416_v53 = vunpack.i.h.bf16 %v10414_v27  ;;  %v7425_v27 = vld [vmem:[%s13928_s5 + $0x228] sm:$0xff] }
 0x568   : > { %8941 = vmatprep.subr.msk.mxu0 %vm2286_vm2, %v12415_v34 }
 0x56a   : > { %8907 = vmatmul.mubr.msk.f32.gmra.mrb[174].mxu0 %vm3130_vm9, %v7324_v63  ;;  %v7378_v63 = vld [vmem:[%s13928_s5 + $0x158] sm:$0xff] }
 0x56b   : > { %8942 = vmatpush3.msk.msra.mxu0 %vm2286_vm2, %v12415_v34  ;;  %8909 = vmatprep.mubr.msk.f32.mxu0 %vm3130_vm9, %v7325_v56  ;;  %v7330_v34 = vld [vmem:[%s13928_s5 + $0x128] sm:$0xff]  ;;  %v7379_v56 = vld [vmem:[%s13928_s5 + $0x160] sm:$0xff] }
 0x56c   : > { %9815 = vmatprep.subr.bf16.mxu0 %v9814_v58 }
 0x56e   : > { %8910 = vmatmul.mubr.msk.f32.gmra.mrb[176].mxu0 %vm3130_vm9, %v7326_v10  ;;  %v10421_v10 = vunpack.i.h.bf16 %v10419_v50 }
 0x56f   : > { %8912 = vmatprep.mubr.msk.f32.mxu0 %vm3130_vm9, %v7327_v15  ;;  %v10420_v15 = vunpack.i.l.bf16 %v10419_v50  ;;  %v7430_v50 = vld [vmem:[%s13928_s5 + $0x250] sm:$0xff] }
 0x572   : > { %8913 = vmatmul.mubr.msk.f32.gmra.mrb[178].mxu0 %vm3130_vm9, %v7328_v14  ;;  %v10424_v14 = vpop.permute.xlu0 %10423 }
 0x573   : > { %8915 = vmatprep.mubr.msk.f32.mxu0 %vm3130_vm9, %v7329_v46  ;;  %v7380_v46 = vld [vmem:[%s13928_s5 + $0x168] sm:$0xff]  ;;  %v10426_v23 = vunpack.i.h.bf16 %v10424_v14 }
 0x576   : > { %8916 = vmatmul.mubr.msk.f32.gmra.mrb[180].mxu0 %vm3130_vm9, %v7330_v34  ;;  %v7381_v34 = vld [vmem:[%s13928_s5 + $0x170] sm:$0xff]  ;;  %v10429_v28 = vpop.permute.xlu0 %10428 }
 0x577   : > { %8918 = vmatprep.mubr.msk.f32.mxu0 %vm3130_vm9, %v7331_v16  ;;  %v9846_v16 = vpack.c.bf16 %v10421_v10, %v10420_v15  ;;  %v10430_v48 = vunpack.i.l.bf16 %v10429_v28  ;;  %v7434_v10 = vld [vmem:[%s13928_s5 + $0x270] sm:$0xff]  ;;  %v7435_v15 = vld [vmem:[%s13928_s5 + $0x278] sm:$0xff] }
 0x57a   : > { %8919 = vmatmul.mubr.msk.f32.gmra.mrb[182].mxu0 %vm3130_vm9, %v7332_v2  ;;  %v10425_v2 = vunpack.i.l.bf16 %v10424_v14  ;;  %v7457_v14 = vld [vmem:[%s13928_s5 + $0x280] sm:$0xff] }
 0x57b   : > { %8943 = vmatprep.mubr.msk.f32.mxu0 %vm3130_vm9, %v3035_v18  ;;  %v7382_v18 = vld [vmem:[%s13928_s5 + $0x178] sm:$0xff] }
 0x57c   : > { %v9850_v19 = vpack.c.bf16 %v10426_v23, %v10425_v2  ;;  %v7461_v23 = vld [vmem:[%s13928_s5 + $0x2a0] sm:$0xff]  ;;  %v7462_v2 = vld [vmem:[%s13928_s5 + $0x2a8] sm:$0xff] }
 0x57e   : > { %8944 = vmatmul.mubr.msk.f32.vlgmr.msra.gmra.mrb[164].mxu0 %vm3130_vm9, %v3036_v29  ;;  %v7384_v29 = vld [vmem:[%s13928_s5 + $0x188] sm:$0xff] }
 0x57f   : > { %9817 = vmatpush3.bf16.msra.mxu0 %v9814_v58  ;;  %8946 = vmatprep.mubr.msk.f32.mxu0 %vm3130_vm9, %v3037_v49  ;;  %v9842_v58 = vpack.c.bf16 %v10416_v53, %v10415_v54  ;;  %v7385_v49 = vld [vmem:[%s13928_s5 + $0x190] sm:$0xff]  ;;  %v7428_v53 = vld [vmem:[%s13928_s5 + $0x240] sm:$0xff]  ;;  %v7429_v54 = vld [vmem:[%s13928_s5 + $0x248] sm:$0xff] }
 0x580   : > { %9819 = vmatprep.subr.bf16.mxu0 %v9818_v11 }
 0x582   : > { %8947 = vmatmul.mubr.msk.f32.gmra.mrb[166].mxu0 %vm3130_vm9, %v3038_v13  ;;  %v7387_v13 = vld [vmem:[%s13928_s5 + $0x1a0] sm:$0xff] }
 0x583   : > { %9821 = vmatpush3.bf16.msra.mxu0 %v9818_v11  ;;  %8949 = vmatprep.mubr.msk.f32.mxu0 %vm3130_vm9, %v3039_v52  ;;  %v10431_v11 = vunpack.i.h.bf16 %v10429_v28  ;;  %v7466_v28 = vld [vmem:[%s13928_s5 + $0x2c8] sm:$0xff] }
 0x584   : > { %9823 = vmatprep.subr.bf16.mxu0 %v9822_v26 }
 0x585   : > { %v9854_v52 = vpack.c.bf16 %v10431_v11, %v10430_v48  ;;  %v7469_v11 = vld [vmem:[%s13928_s5 + $0x2e0] sm:$0xff]  ;;  %v7470_v48 = vld [vmem:[%s13928_s5 + $0x2e8] sm:$0xff] }
 0x586   : > { %8950 = vmatmul.mubr.msk.f32.gmra.mrb[168].mxu0 %vm3130_vm9, %v3040_v3  ;;  %v7392_v3 = vld [vmem:[%s13928_s5 + $0x1c8] sm:$0xff] }
 0x587   : > { %9825 = vmatpush3.bf16.msra.mxu0 %v9822_v26  ;;  %8952 = vmatprep.mubr.msk.f32.mxu0 %vm3130_vm9, %v3041_v59  ;;  %v7388_v26 = vld [vmem:[%s13928_s5 + $0x1a8] sm:$0xff]  ;;  %v7393_v59 = vld [vmem:[%s13928_s5 + $0x1d0] sm:$0xff] }
 0x588   : > { %9827 = vmatprep.subr.bf16.mxu0 %v9826_v12 }
 0x58a   : > { %8953 = vmatmul.mubr.msk.f32.gmra.mrb[170].mxu0 %vm3130_vm9, %v3042_v60 }
 0x58b   : > { %9829 = vmatpush3.bf16.msra.mxu0 %v9826_v12  ;;  %8955 = vmatprep.mubr.msk.f32.mxu0 %vm3130_vm9, %v3043_v62  ;;  %v10434_v12 = vpop.permute.xlu1 %10433 }
 0x58c   : > { %9831 = vmatprep.subr.bf16.mxu0 %v9830_v17  ;;  %v10436_v60 = vunpack.i.h.bf16 %v10434_v12  ;;  %v10435_v62 = vunpack.i.l.bf16 %v10434_v12  ;;  %v7519_v12 = vld [vmem:[%s13930_s7 + $0x10] sm:$0xff] }
 0x58e   : > { %8956 = vmatmul.mubr.msk.f32.gmra.mrb[172].mxu0 %vm3130_vm9, %v3044_v25  ;;  %v7418_v25 = vld [vmem:[%s13928_s5 + $0x1f0] sm:$0xff] }
 0x58f   : > { %9833 = vmatpush3.bf16.msra.mxu0 %v9830_v17  ;;  %8958 = vmatprep.mubr.msk.f32.mxu0 %vm3130_vm9, %v3045_v24  ;;  %v10439_v17 = vpop.permute.xlu0 %10438  ;;  %v9858_v24 = vpack.c.bf16 %v10436_v60, %v10435_v62 }
 0x590   : > { %8993 = vmatprep.subr.msk.mxu0 %vm2286_vm2, %v3627_v36  ;;  %v10441_v8 = vunpack.i.h.bf16 %v10439_v17  ;;  %v10440_v32 = vunpack.i.l.bf16 %v10439_v17 }
 0x592   : > { %8959 = vmatmul.mubr.msk.f32.gmra.mrb[174].mxu0 %vm3130_vm9, %v3046_v35  ;;  %v7419_v35 = vld [vmem:[%s13928_s5 + $0x1f8] sm:$0xff] }
 0x593   : > { %8994 = vmatpush3.msk.msra.mxu0 %vm2286_vm2, %v3627_v36  ;;  %8961 = vmatprep.mubr.msk.f32.mxu0 %vm3130_vm9, %v3047_v45  ;;  %v10444_v36 = vpop.permute.xlu1 %10443  ;;  %v7420_v45 = vld [vmem:[%s13928_s5 + $0x200] sm:$0xff] }
 0x594   : > { %9835 = vmatprep.subr.bf16.mxu0 %v9834_v9 }
 0x596   : > { %8962 = vmatmul.mubr.msk.f32.gmra.mrb[176].mxu0 %vm3130_vm9, %v3048_v31  ;;  %v10446_v31 = vunpack.i.h.bf16 %v10444_v36 }
 0x597   : > { %8964 = vmatprep.mubr.msk.f32.mxu0 %vm3130_vm9, %v3049_v44  ;;  %v10445_v44 = vunpack.i.l.bf16 %v10444_v36 }
 0x59a   : > { %8965 = vmatmul.mubr.msk.f32.gmra.mrb[178].mxu0 %vm3130_vm9, %v3050_v42  ;;  %v10449_v42 = vpop.permute.xlu0 %10448 }
 0x59b   : > { %8967 = vmatprep.mubr.msk.f32.mxu0 %vm3130_vm9, %v3051_v33  ;;  %v7421_v33 = vld [vmem:[%s13928_s5 + $0x208] sm:$0xff]  ;;  %v10451_v47 = vunpack.i.h.bf16 %v10449_v42 }
 0x59e   : > { %8968 = vmatmul.mubr.msk.f32.gmra.mrb[180].mxu0 %vm3130_vm9, %v3052_v61  ;;  %v7422_v61 = vld [vmem:[%s13928_s5 + $0x210] sm:$0xff]  ;;  %v4508_v62 = vpop.permute.xlu0 %4507 }
 0x59f   : > { %8970 = vmatprep.mubr.msk.f32.mxu0 %vm3130_vm9, %v3053_v4  ;;  %v9866_v4 = vpack.c.bf16 %v10446_v31, %v10445_v44 }
 0x5a2   : > { %8971 = vmatmul.mubr.msk.f32.gmra.mrb[182].mxu0 %vm3130_vm9, %v3054_v43  ;;  %v10450_v43 = vunpack.i.l.bf16 %v10449_v42 }
 0x5a3   : > { %8995 = vmatprep.mubr.msk.f32.mxu0 %vm3130_vm9, %v7375_v39  ;;  %v7423_v39 = vld [vmem:[%s13928_s5 + $0x218] sm:$0xff] }
 0x5a4   : > { %v9870_v51 = vpack.c.bf16 %v10451_v47, %v10450_v43 }
 0x5a6   : > { %8996 = vmatmul.mubr.msk.f32.vlgmr.msra.gmra.mrb[164].mxu0 %vm3130_vm9, %v7376_v38  ;;  %v7426_v38 = vld [vmem:[%s13928_s5 + $0x230] sm:$0xff] }
 0x5a7   : > { %9837 = vmatpush3.bf16.msra.mxu0 %v9834_v9  ;;  %8998 = vmatprep.mubr.msk.f32.mxu0 %vm3130_vm9, %v7377_v6  ;;  %v9862_v9 = vpack.c.bf16 %v10441_v8, %v10440_v32  ;;  %v4227_v6 = vpop.permute.xlu1 %4226 }
 0x5a8   : > { %9839 = vmatprep.subr.bf16.mxu0 %v9838_v7 }
 0x5aa   : > { %8999 = vmatmul.mubr.msk.f32.gmra.mrb[166].mxu0 %vm3130_vm9, %v7378_v63  ;;  %v7431_v63 = vld [vmem:[%s13928_s5 + $0x258] sm:$0xff] }
 0x5ab   : > { %9841 = vmatpush3.bf16.msra.mxu0 %v9838_v7  ;;  %9001 = vmatprep.mubr.msk.f32.mxu0 %vm3130_vm9, %v7379_v56  ;;  %v7427_v7 = vld [vmem:[%s13928_s5 + $0x238] sm:$0xff]  ;;  %v7432_v56 = vld [vmem:[%s13928_s5 + $0x260] sm:$0xff]  ;;  %v4513_v60 = vpop.permute.xlu1 %4512 }
 0x5ac   : > { %9843 = vmatprep.subr.bf16.mxu0 %v9842_v58 }
 0x5ae   : > { %9002 = vmatmul.mubr.msk.f32.gmra.mrb[168].mxu0 %vm3130_vm9, %v7380_v46  ;;  %v7458_v46 = vld [vmem:[%s13928_s5 + $0x288] sm:$0xff] }
 0x5af   : > { %9845 = vmatpush3.bf16.msra.mxu0 %v9842_v58  ;;  %9004 = vmatprep.mubr.msk.f32.mxu0 %vm3130_vm9, %v7381_v34  ;;  %v7433_v58 = vld [vmem:[%s13928_s5 + $0x268] sm:$0xff]  ;;  %v7459_v34 = vld [vmem:[%s13928_s5 + $0x290] sm:$0xff]  ;;  %v4523_v17 = vpop.permute.xlu1 %4522 }
 0x5b0   : > { %9847 = vmatprep.subr.bf16.mxu0 %v9846_v16 }
 0x5b2   : > { %9005 = vmatmul.mubr.msk.f32.gmra.mrb[170].mxu0 %vm3130_vm9, %v7382_v18  ;;  %v7463_v18 = vld [vmem:[%s13928_s5 + $0x2b0] sm:$0xff] }
 0x5b3   : > { %9849 = vmatpush3.bf16.msra.mxu0 %v9846_v16  ;;  %9007 = vmatprep.mubr.msk.f32.mxu0 %vm3130_vm9, %v7383_v20  ;;  %v7460_v16 = vld [vmem:[%s13928_s5 + $0x298] sm:$0xff] }
 0x5b4   : > { %9851 = vmatprep.subr.bf16.mxu0 %v9850_v19  ;;  %v7464_v20 = vld [vmem:[%s13928_s5 + $0x2b8] sm:$0xff] }
 0x5b6   : > { %9008 = vmatmul.mubr.msk.f32.gmra.mrb[172].mxu0 %vm3130_vm9, %v7384_v29  ;;  %v7467_v29 = vld [vmem:[%s13928_s5 + $0x2d0] sm:$0xff] }
 0x5b7   : > { %9853 = vmatpush3.bf16.msra.mxu0 %v9850_v19  ;;  %9010 = vmatprep.mubr.msk.f32.mxu0 %vm3130_vm9, %v7385_v49  ;;  %v7465_v19 = vld [vmem:[%s13928_s5 + $0x2c0] sm:$0xff]  ;;  %v7468_v49 = vld [vmem:[%s13928_s5 + $0x2d8] sm:$0xff] }
 0x5b8   : > { %9045 = vmatprep.subr.msk.mxu0 %vm2286_vm2, %v3927_v41 }
 0x5ba   : > { %9011 = vmatmul.mubr.msk.f32.gmra.mrb[174].mxu0 %vm3130_vm9, %v7386_v37  ;;  %v7472_v37 = vld [vmem:[%s13928_s5 + $0x2f8] sm:$0xff] }
 0x5bb   : > { %9046 = vmatpush3.msk.msra.mxu0 %vm2286_vm2, %v3927_v41  ;;  %9013 = vmatprep.mubr.msk.f32.mxu0 %vm3130_vm9, %v7387_v13  ;;  %v7471_v41 = vld [vmem:[%s13928_s5 + $0x2f0] sm:$0xff]  ;;  %v7473_v13 = vld [vmem:[%s13928_s5 + $0x300] sm:$0xff] }
 0x5bc   : > { %9855 = vmatprep.subr.bf16.mxu0 %v9854_v52 }
 0x5be   : > { %9014 = vmatmul.mubr.msk.f32.gmra.mrb[176].mxu0 %vm3130_vm9, %v7388_v26  ;;  %v7475_v26 = vld [vmem:[%s13928_s5 + $0x310] sm:$0xff] }
 0x5bf   : > { %9016 = vmatprep.mubr.msk.f32.mxu0 %vm3130_vm9, %v7389_v5  ;;  %v7476_v5 = vld [vmem:[%s13928_s5 + $0x318] sm:$0xff] }
 0x5c2   : > { %9017 = vmatmul.mubr.msk.f32.gmra.mrb[178].mxu0 %vm3130_vm9, %v7390_v57  ;;  %v4645_v57 = vld [vmem:[%s13930_s7] sm:$0xff] }
 0x5c3   : > { %9019 = vmatprep.mubr.msk.f32.mxu0 %vm3130_vm9, %v7391_v40  ;;  %v4646_v40 = vld [vmem:[%s13930_s7 + $0x8] sm:$0x3] }
 0x5c6   : > { %9020 = vmatmul.mubr.msk.f32.gmra.mrb[180].mxu0 %vm3130_vm9, %v7392_v3  ;;  %v9874_v3 = vpack.c.bf16 %v4646_v40, %v4645_v57 }
 0x5c7   : > { %9022 = vmatprep.mubr.msk.f32.mxu0 %vm3130_vm9, %v7393_v59 }
 0x5c8   : > { %9876 = vmatprep.subr.msk.bf16.mxu1 %vm12931_vm11, %v9874_v3 }
 0x5c9   : > { %9879 = vmatpush3.bf16.msk.msra.mxu1 %vm12931_vm11, %v9874_v3 }
 0x5ca   : > { %9023 = vmatmul.mubr.msk.f32.gmra.mrb[182].mxu0 %vm3130_vm9, %v7394_v30  ;;  %v7520_v30 = vld [vmem:[%s13930_s7 + $0x18] sm:$0x3] }
 0x5cb   : > { %9047 = vmatprep.mubr.msk.f32.mxu0 %vm3130_vm9, %v7416_v21  ;;  %v9880_v21 = vpack.c.bf16 %v7520_v30, %v7519_v12 }
 0x5cd   : > { %9882 = vmatprep.subr.msk.bf16.mxu1 %vm12931_vm11, %v9880_v21 }
 0x5ce   : > { %9048 = vmatmul.mubr.msk.f32.vlgmr.msra.gmra.mrb[164].mxu0 %vm3130_vm9, %v7417_v1  ;;  %v4518_v1 = vpop.permute.xlu0 %4517 }
 0x5cf   : > { %9857 = vmatpush3.bf16.msra.mxu0 %v9854_v52  ;;  %9050 = vmatprep.mubr.msk.f32.mxu0 %vm3130_vm9, %v7418_v25  ;;  %v7474_v52 = vld [vmem:[%s13928_s5 + $0x308] sm:$0xff]  ;;  %v4533_v25 = vpop.permute.xlu1 %4532 }
 0x5d0   : > { %9859 = vmatprep.subr.bf16.mxu0 %v9858_v24 }
 0x5d2   : > { %9051 = vmatmul.mubr.msk.f32.gmra.mrb[166].mxu0 %vm3130_vm9, %v7419_v35 }
 0x5d3   : > { %9861 = vmatpush3.bf16.msra.mxu0 %v9858_v24  ;;  %9053 = vmatprep.mubr.msk.f32.mxu0 %vm3130_vm9, %v7420_v45  ;;  %v4528_v24 = vpop.permute.xlu0 %4527  ;;  %v4543_v8 = vpop.permute.xlu1 %4542 }
 0x5d4   : > { %9863 = vmatprep.subr.bf16.mxu0 %v9862_v9 }
 0x5d6   : > { %9054 = vmatmul.mubr.msk.f32.gmra.mrb[168].mxu0 %vm3130_vm9, %v7421_v33 }
 0x5d7   : > { %9865 = vmatpush3.bf16.msra.mxu0 %v9862_v9  ;;  %9056 = vmatprep.mubr.msk.f32.mxu0 %vm3130_vm9, %v7422_v61  ;;  %v4538_v36 = vpop.permute.xlu0 %4537 }
 0x5d8   : > { %9867 = vmatprep.subr.bf16.mxu0 %v9866_v4 }
 0x5da   : > { %9057 = vmatmul.mubr.msk.f32.gmra.mrb[170].mxu0 %vm3130_vm9, %v7423_v39 }
 0x5db   : > { %9869 = vmatpush3.bf16.msra.mxu0 %v9866_v4  ;;  %9059 = vmatprep.mubr.msk.f32.mxu0 %vm3130_vm9, %v7424_v55  ;;  %v4553_v4 = vpop.permute.xlu1 %4552  ;;  %v4548_v43 = vpop.permute.xlu0 %4547 }
 0x5dc   : > { %9871 = vmatprep.subr.bf16.mxu0 %v9870_v51 }
 0x5de   : > { %9060 = vmatmul.mubr.msk.f32.gmra.mrb[172].mxu0 %vm3130_vm9, %v7425_v27 }
 0x5df   : > { %9873 = vmatpush3.bf16.msra.mxu0 %v9870_v51  ;;  %9062 = vmatprep.mubr.msk.f32.mxu0 %vm3130_vm9, %v7426_v38 }
 0x5e0   : > { %9097 = vmatprep.subr.msk.mxu0 %vm2286_vm2, %v4227_v6 }
 0x5e2   : > { %9063 = vmatmul.mubr.msk.f32.gmra.mrb[174].mxu0 %vm3130_vm9, %v7427_v7  ;;  %v4563_v7 = vpop.permute.xlu1 %4562 }
 0x5e3   : > { %9098 = vmatpush3.msk.msra.mxu0 %vm2286_vm2, %v4227_v6  ;;  %9065 = vmatprep.mubr.msk.f32.mxu0 %vm3130_vm9, %v7428_v53 }
 0x5e4   : > { %9961 = vmatprep.subr.bf16.mxu0 %v10685_v0 }
 0x5e6   : > { %9066 = vmatmul.mubr.msk.f32.gmra.mrb[176].mxu0 %vm3130_vm9, %v7429_v54 }
 0x5e7   : > { %9068 = vmatprep.mubr.msk.f32.mxu0 %vm3130_vm9, %v7430_v50  ;;  %v4558_v50 = vpop.permute.xlu0 %4557 }
 0x5ea   : > { %9069 = vmatmul.mubr.msk.f32.gmra.mrb[178].mxu0 %vm3130_vm9, %v7431_v63 }
 0x5eb   : > { %9071 = vmatprep.mubr.msk.f32.mxu0 %vm3130_vm9, %v7432_v56 }
 0x5ee   : > { %9072 = vmatmul.mubr.msk.f32.gmra.mrb[180].mxu0 %vm3130_vm9, %v7433_v58 }
 0x5ef   : > { %9074 = vmatprep.mubr.msk.f32.mxu0 %vm3130_vm9, %v7434_v10 }
 0x5f2   : > { %9075 = vmatmul.mubr.msk.f32.gmra.mrb[182].mxu0 %vm3130_vm9, %v7435_v15 }
 0x5f3   : > { %9099 = vmatprep.mubr.msk.f32.mxu0 %vm3130_vm9, %v7457_v14 }
 0x5f6   : > { %9100 = vmatmul.mubr.msk.f32.vlgmr.msra.gmra.mrb[164].mxu0 %vm3130_vm9, %v7458_v46 }
 0x5f7   : > { %9102 = vmatprep.mubr.msk.f32.mxu0 %vm3130_vm9, %v7459_v34 }
 0x5fa   : > { %9103 = vmatmul.mubr.msk.f32.gmra.mrb[166].mxu0 %vm3130_vm9, %v7460_v16 }
 0x5fb   : > { %9105 = vmatprep.mubr.msk.f32.mxu0 %vm3130_vm9, %v7461_v23  ;;  %v4573_v23 = vpop.permute.xlu1 %4572 }
 0x5fe   : > { %9106 = vmatmul.mubr.msk.f32.gmra.mrb[168].mxu0 %vm3130_vm9, %v7462_v2 }
 0x5ff   : > { %9108 = vmatprep.mubr.msk.f32.mxu0 %vm3130_vm9, %v7463_v18  ;;  %v4568_v18 = vpop.permute.xlu0 %4567 }
 0x602   : > { %9109 = vmatmul.mubr.msk.f32.gmra.mrb[170].mxu0 %vm3130_vm9, %v7464_v20 }
 0x603   : > { %9111 = vmatprep.mubr.msk.f32.mxu0 %vm3130_vm9, %v7465_v19 }
 0x606   : > { %9112 = vmatmul.mubr.msk.f32.gmra.mrb[172].mxu0 %vm3130_vm9, %v7466_v28 }
 0x607   : > { %9114 = vmatprep.mubr.msk.f32.mxu0 %vm3130_vm9, %v7467_v29 }
 0x60a   : > { %9115 = vmatmul.mubr.msk.f32.gmra.mrb[174].mxu0 %vm3130_vm9, %v7468_v49 }
 0x60b   : > { %9117 = vmatprep.mubr.msk.f32.mxu0 %vm3130_vm9, %v7469_v11 }
 0x60e   : > { %9118 = vmatmul.mubr.msk.f32.gmra.mrb[176].mxu0 %vm3130_vm9, %v7470_v48  ;;  %v4583_v48 = vpop.permute.xlu1 %4582 }
 0x60f   : > { %9120 = vmatprep.mubr.msk.f32.mxu0 %vm3130_vm9, %v7471_v41 }
 0x612   : > { %9121 = vmatmul.mubr.msk.f32.gmra.mrb[178].mxu0 %vm3130_vm9, %v7472_v37 }
 0x613   : > { %9123 = vmatprep.mubr.msk.f32.mxu0 %vm3130_vm9, %v7473_v13  ;;  %v4578_v13 = vpop.permute.xlu0 %4577 }
 0x616   : > { %9124 = vmatmul.mubr.msk.f32.gmra.mrb[180].mxu0 %vm3130_vm9, %v7474_v52 }
 0x617   : > { %9126 = vmatprep.mubr.msk.f32.mxu0 %vm3130_vm9, %v7475_v26 }
 0x61a   : > { %9127 = vmatmul.mubr.msk.f32.gmra.mrb[182].mxu0 %vm3130_vm9, %v7476_v5 }
 0x61b   : > { %9282 = vmatprep.mubr.msk.f32.mxu0 %vm10687_vm0, %v10688_v22 }
 0x6c9   : > { %v9101_v32 = vpop.f32.mrb[164].mxu0 }
 0x6ca   : > { %v12947_v35 = vadd.f32 %v9101_v32, %v4513_v60  ;;  %v4366_v45 = vpop.f32.mrb[165].mxu0 }
 0x6cb   : > { %v12949_v9 = vadd.f32 %v4508_v62, %v4366_v45  ;;  %v4588_v62 = vpop.permute.xlu0 %4587 }
 0x6cc   : > { %v4626_v42 = vmax.f32 %v12947_v35, 0.0  ;;  %v5069_v35 = vld [vmem:[#allocation6 + $0x8] sm:$0xff] }
 0x6cd   : > { %v4625_v31 = vmax.f32 %v12949_v9, 0.0  ;;  %v9104_v44 = vpop.f32.mrb[166].mxu0 }
 0x6ce   : > { %v12953_v33 = vadd.f32 %v9104_v44, %v4523_v17  ;;  %v4376_v61 = vpop.f32.mrb[167].mxu0 }
 0x6cf   : > { %v12955_v47 = vadd.f32 %v4518_v1, %v4376_v61  ;;  %9133 = vmatprep.mubr.msk.f32.mxu1 %vm4647_vm12, %v4625_v31  ;;  %v4598_v61 = vpop.permute.xlu0 %4597 }
 0x6d0   : > { %9134 = vmatmul.mubr.msk.f32.vlgmr.msra.gmra.mrb[174].mxu1 %vm4647_vm12, %v4626_v42  ;;  %v4628_v51 = vmax.f32 %v12953_v33, 0.0 }
 0x6d1   : > { %v4627_v39 = vmax.f32 %v12955_v47, 0.0  ;;  %v9107_v55 = vpop.f32.mrb[168].mxu0  ;;  %9885 = vmatpush3.bf16.msk.msra.mxu1 %vm12931_vm11, %v9880_v21  ;;  %v4593_v21 = vpop.permute.xlu1 %4592 }
 0x6d2   : > { %v12967_v27 = vadd.f32 %v9107_v55, %v4533_v25  ;;  %v4386_v38 = vpop.f32.mrb[169].mxu0  ;;  %9886 = vmatprep.subr.bf16.mxu1 %v10685_v0 }
 0x6d3   : > { %v12970_v6 = vadd.f32 %v4528_v24, %v4386_v38  ;;  %9136 = vmatprep.mubr.msk.f32.mxu1 %vm4647_vm12, %v4627_v39 }
 0x6d4   : > { %9137 = vmatmul.mubr.msk.f32.gmra.mrb[176].mxu1 %vm4647_vm12, %v4628_v51  ;;  %v4630_v63 = vmax.f32 %v12967_v27, 0.0 }
 0x6d5   : > { %v4629_v53 = vmax.f32 %v12970_v6, 0.0  ;;  %v9110_v54 = vpop.f32.mrb[170].mxu0 }
 0x6d6   : > { %v12980_v56 = vadd.f32 %v9110_v54, %v4543_v8  ;;  %v4396_v58 = vpop.f32.mrb[171].mxu0 }
 0x6d7   : > { %v12982_v10 = vadd.f32 %v4538_v36, %v4396_v58  ;;  %9139 = vmatprep.mubr.msk.f32.mxu1 %vm4647_vm12, %v4629_v53  ;;  %v4603_v36 = vpop.permute.xlu1 %4602 }
 0x6d8   : > { %9140 = vmatmul.mubr.msk.f32.gmra.mrb[178].mxu1 %vm4647_vm12, %v4630_v63  ;;  %v4632_v46 = vmax.f32 %v12980_v56, 0.0 }
 0x6d9   : > { %v4631_v15 = vmax.f32 %v12982_v10, 0.0  ;;  %v9113_v14 = vpop.f32.mrb[172].mxu0 }
 0x6da   : > { %v12992_v34 = vadd.f32 %v9113_v14, %v4553_v4  ;;  %v4406_v16 = vpop.f32.mrb[173].mxu0 }
 0x6db   : > { %v12994_v2 = vadd.f32 %v4548_v43, %v4406_v16  ;;  %9142 = vmatprep.mubr.msk.f32.mxu1 %vm4647_vm12, %v4631_v15 }
 0x6dc   : > { %9143 = vmatmul.mubr.msk.f32.gmra.mrb[180].mxu1 %vm4647_vm12, %v4632_v46  ;;  %v4634_v28 = vmax.f32 %v12992_v34, 0.0 }
 0x6dd   : > { %v4633_v20 = vmax.f32 %v12994_v2, 0.0  ;;  %v9116_v19 = vpop.f32.mrb[174].mxu0 }
 0x6de   : > { %v4616_v29 = vadd.f32 %v9116_v19, %v4563_v7  ;;  %v4416_v49 = vpop.f32.mrb[175].mxu0 }
 0x6df   : > { %v4615_v11 = vadd.f32 %v4558_v50, %v4416_v49  ;;  %9145 = vmatprep.mubr.msk.f32.mxu1 %vm4647_vm12, %v4633_v20 }
 0x6e0   : > { %9146 = vmatmul.mubr.msk.f32.gmra.mrb[182].mxu1 %vm4647_vm12, %v4634_v28  ;;  %v4636_v52 = vmax.f32 %v4616_v29, 0.0 }
 0x6e1   : > { %v4635_v41 = vmax.f32 %v4615_v11, 0.0  ;;  %v9119_v37 = vpop.f32.mrb[176].mxu0 }
 0x6e2   : > { %v4618_v26 = vadd.f32 %v9119_v37, %v4573_v23  ;;  %v4426_v5 = vpop.f32.mrb[177].mxu0 }
 0x6e3   : > { %v4617_v57 = vadd.f32 %v4568_v18, %v4426_v5  ;;  %9148 = vmatprep.mubr.msk.f32.mxu1 %vm4647_vm12, %v4635_v41 }
 0x6e4   : > { %9149 = vmatmul.mubr.msk.f32.gmra.mrb[184].mxu1 %vm4647_vm12, %v4636_v52  ;;  %v4638_v59 = vmax.f32 %v4618_v26, 0.0 }
 0x6e5   : > { %v4637_v40 = vmax.f32 %v4617_v57, 0.0  ;;  %v9122_v3 = vpop.f32.mrb[178].mxu0 }
 0x6e6   : > { %v4620_v12 = vadd.f32 %v9122_v3, %v4583_v48  ;;  %v4436_v30 = vpop.f32.mrb[179].mxu0 }
 0x6e7   : > { %v4619_v60 = vadd.f32 %v4578_v13, %v4436_v30  ;;  %9151 = vmatprep.mubr.msk.f32.mxu1 %vm4647_vm12, %v4637_v40 }
 0x6e8   : > { %9152 = vmatmul.mubr.msk.f32.gmra.mrb[186].mxu1 %vm4647_vm12, %v4638_v59  ;;  %v4640_v25 = vmax.f32 %v4620_v12, 0.0 }
 0x6e9   : > { %v4639_v17 = vmax.f32 %v4619_v60, 0.0  ;;  %v9125_v1 = vpop.f32.mrb[180].mxu0 }
 0x6ea   : > { %v4622_v24 = vadd.f32 %v9125_v1, %v4593_v21  ;;  %v4446_v8 = vpop.f32.mrb[181].mxu0 }
 0x6eb   : > { %v4621_v32 = vadd.f32 %v4588_v62, %v4446_v8  ;;  %9154 = vmatprep.mubr.msk.f32.mxu1 %vm4647_vm12, %v4639_v17 }
 0x6ec   : > { %9155 = vmatmul.mubr.msk.f32.gmra.mrb[188].mxu1 %vm4647_vm12, %v4640_v25  ;;  %v4642_v4 = vmax.f32 %v4622_v24, 0.0 }
 0x6ed   : > { %v4641_v45 = vmax.f32 %v4621_v32, 0.0  ;;  %v9128_v44 = vpop.f32.mrb[182].mxu0 }
 0x6ee   : > { %v4624_v43 = vadd.f32 %v9128_v44, %v4603_v36  ;;  %v4456_v55 = vpop.f32.mrb[183].mxu0 }
 0x6ef   : > { %v4623_v38 = vadd.f32 %v4598_v61, %v4456_v55  ;;  %9157 = vmatprep.mubr.msk.f32.mxu1 %vm4647_vm12, %v4641_v45 }
 0x6f0   : > { %9158 = vmatmul.mubr.msk.f32.gmra.mrb[190].mxu1 %vm4647_vm12, %v4642_v4  ;;  %v4644_v54 = vmax.f32 %v4624_v43, 0.0 }
 0x6f1   : > { %v4643_v7 = vmax.f32 %v4623_v38, 0.0 }
 0x6f3   : > { %9160 = vmatprep.mubr.msk.f32.mxu1 %vm4647_vm12, %v4643_v7 }
 0x6f4   : > { %9161 = vmatmul.mubr.msk.f32.gmra.mrb[192].mxu1 %vm4647_vm12, %v4644_v54 }
 0x6f5   : > { %9167 = vmatprep.mubr.msk.f32.mxu1 %vm4647_vm12, %v4625_v31 }
 0x6f8   : > { %9168 = vmatmul.mubr.msk.f32.vlgmr.msra.gmra.mrb[194].mxu1 %vm4647_vm12, %v4626_v42 }
 0x6f9   : > { %9170 = vmatprep.mubr.msk.f32.mxu1 %vm4647_vm12, %v4627_v39 }
 0x6fc   : > { %9171 = vmatmul.mubr.msk.f32.gmra.mrb[196].mxu1 %vm4647_vm12, %v4628_v51 }
 0x6fd   : > { %9173 = vmatprep.mubr.msk.f32.mxu1 %vm4647_vm12, %v4629_v53 }
 0x700   : > { %9174 = vmatmul.mubr.msk.f32.gmra.mrb[198].mxu1 %vm4647_vm12, %v4630_v63 }
 0x701   : > { %9176 = vmatprep.mubr.msk.f32.mxu1 %vm4647_vm12, %v4631_v15 }
 0x704   : > { %9177 = vmatmul.mubr.msk.f32.gmra.mrb[200].mxu1 %vm4647_vm12, %v4632_v46 }
 0x705   : > { %9179 = vmatprep.mubr.msk.f32.mxu1 %vm4647_vm12, %v4633_v20 }
 0x708   : > { %9180 = vmatmul.mubr.msk.f32.gmra.mrb[202].mxu1 %vm4647_vm12, %v4634_v28 }
 0x709   : > { %9182 = vmatprep.mubr.msk.f32.mxu1 %vm4647_vm12, %v4635_v41 }
 0x70c   : > { %9183 = vmatmul.mubr.msk.f32.gmra.mrb[204].mxu1 %vm4647_vm12, %v4636_v52 }
 0x70d   : > { %9185 = vmatprep.mubr.msk.f32.mxu1 %vm4647_vm12, %v4637_v40 }
 0x710   : > { %9186 = vmatmul.mubr.msk.f32.gmra.mrb[206].mxu1 %vm4647_vm12, %v4638_v59 }
 0x711   : > { %9188 = vmatprep.mubr.msk.f32.mxu1 %vm4647_vm12, %v4639_v17 }
 0x714   : > { %9189 = vmatmul.mubr.msk.f32.gmra.mrb[208].mxu1 %vm4647_vm12, %v4640_v25 }
 0x715   : > { %9191 = vmatprep.mubr.msk.f32.mxu1 %vm4647_vm12, %v4641_v45 }
 0x718   : > { %9192 = vmatmul.mubr.msk.f32.gmra.mrb[210].mxu1 %vm4647_vm12, %v4642_v4 }
 0x719   : > { %9194 = vmatprep.mubr.msk.f32.mxu1 %vm4647_vm12, %v4643_v7 }
 0x71c   : > { %9195 = vmatmul.mubr.msk.f32.gmra.mrb[212].mxu1 %vm4647_vm12, %v4644_v54 }
 0x71d   : > { %7542 = vmatprep.mubr.msk.f32.mxu1 %vm5088_vm13, %v5069_v35 }
 0x7a3   : > { %v9135_v9 = vpop.f32.mrb[174].mxu1 }
 0x7a4   : > { %v4778_v31 = vpop.f32.mrb[175].mxu1 }
 0x7a7   : > { %v9138_v42 = vpop.f32.mrb[176].mxu1 }
 0x7a8   : > { %v4788_v33 = vpop.f32.mrb[177].mxu1 }
 0x7ab   : > { %v9141_v47 = vpop.f32.mrb[178].mxu1 }
 0x7ac   : > { %v4798_v39 = vpop.f32.mrb[179].mxu1 }
 0x7af   : > { %v9144_v51 = vpop.f32.mrb[180].mxu1 }
 0x7b0   : > { %v4808_v27 = vpop.f32.mrb[181].mxu1 }
 0x7b3   : > { %v9147_v6 = vpop.f32.mrb[182].mxu1 }
 0x7b4   : > { %v4818_v53 = vpop.f32.mrb[183].mxu1 }
 0x7b7   : > { %v9150_v50 = vpop.f32.mrb[184].mxu1 }
 0x7b8   : > { %v4828_v63 = vpop.f32.mrb[185].mxu1 }
 0x7bb   : > { %v9153_v56 = vpop.f32.mrb[186].mxu1 }
 0x7bc   : > { %v4838_v58 = vpop.f32.mrb[187].mxu1 }
 0x7bf   : > { %v9156_v10 = vpop.f32.mrb[188].mxu1 }
 0x7c0   : > { %v4848_v15 = vpop.f32.mrb[189].mxu1 }
 0x7c3   : > { %v13053_v14 = vpop.f32.mrb[190].mxu1 }
 0x7c4   : > { %v13055_v46 = vpop.f32.mrb[191].mxu1 }
 0x7c7   : > { %v13057_v34 = vpop.f32.mrb[192].mxu1 }
 0x7c8   : > { %v13059_v16 = vpop.f32.mrb[193].mxu1 }
 0x7cb   : > { %v9169_v23 = vpop.f32.mrb[194].mxu1 }
 0x7cc   : > { %v5049_v2 = vmax.f32 %v9135_v9, %v9169_v23  ;;  %v4949_v18 = vpop.f32.mrb[195].mxu1  ;;  %v5080_v23 = vld [vmem:[#allocation6 + $0x60] sm:$0xff] }
 0x7cd   : > { %v5048_v20 = vmax.f32 %v4778_v31, %v4949_v18  ;;  %v5082_v18 = vld [vmem:[#allocation6 + $0x70] sm:$0xff] }
 0x7cf   : > { %v13061_v19 = vpack.c.bf16 %v5049_v2, %v5048_v20  ;;  %v9172_v28 = vpop.f32.mrb[196].mxu1  ;;  %v5083_v2 = vld [vmem:[#allocation6 + $0x78] sm:$0xff]  ;;  %v5085_v20 = vld [vmem:[#allocation6 + $0x88] sm:$0xff] }
 0x7d0   : > { %v5051_v29 = vmax.f32 %v9138_v42, %v9172_v28  ;;  %v4959_v49 = vpop.f32.mrb[197].mxu1  ;;  %v5087_v28 = vld [vmem:[#allocation6 + $0x98] sm:$0xff] }
 0x7d1   : > { %v5050_v11 = vmax.f32 %v4788_v33, %v4959_v49  ;;  %9888 = vmatpush1.bf16.msra.mxu1 %v13061_v19  ;;  %v5236_v49 = vld [vmem:[#allocation6 + $0xa8] sm:$0xff] }
 0x7d2   : > { %9889 = vmatprep.subr.bf16.mxu1 %v10685_v0 }
 0x7d3   : > { %v13065_v48 = vpack.c.bf16 %v5051_v29, %v5050_v11  ;;  %v9175_v41 = vpop.f32.mrb[198].mxu1  ;;  %v5086_v29 = vld [vmem:[#allocation6 + $0x90] sm:$0xff]  ;;  %v5235_v11 = vld [vmem:[#allocation6 + $0xa0] sm:$0xff] }
 0x7d4   : > { %v5053_v37 = vmax.f32 %v9141_v47, %v9175_v41  ;;  %v4969_v13 = vpop.f32.mrb[199].mxu1  ;;  %v5237_v41 = vld [vmem:[#allocation6 + $0xb0] sm:$0xff] }
 0x7d5   : > { %v5052_v52 = vmax.f32 %v4798_v39, %v4969_v13  ;;  %9891 = vmatpush1.bf16.msra.mxu1 %v13065_v48  ;;  %v5239_v13 = vld [vmem:[#allocation6 + $0xc0] sm:$0xff] }
 0x7d6   : > { %9892 = vmatprep.subr.bf16.mxu1 %v10685_v0 }
 0x7d7   : > { %v13069_v26 = vpack.c.bf16 %v5053_v37, %v5052_v52  ;;  %v9178_v5 = vpop.f32.mrb[200].mxu1  ;;  %v5240_v37 = vld [vmem:[#allocation6 + $0xc8] sm:$0xff]  ;;  %v5242_v52 = vld [vmem:[#allocation6 + $0xd8] sm:$0xff] }
 0x7d8   : > { %v5055_v57 = vmax.f32 %v9144_v51, %v9178_v5  ;;  %v4979_v40 = vpop.f32.mrb[201].mxu1  ;;  %v5244_v5 = vld [vmem:[#allocation6 + $0xe8] sm:$0xff] }
 0x7d9   : > { %v5054_v3 = vmax.f32 %v4808_v27, %v4979_v40  ;;  %9894 = vmatpush1.bf16.msra.mxu1 %v13069_v26  ;;  %v5246_v40 = vld [vmem:[#allocation6 + $0xf8] sm:$0xff] }
 0x7da   : > { %9895 = vmatprep.subr.bf16.mxu1 %v10685_v0 }
 0x7db   : > { %v13073_v59 = vpack.c.bf16 %v5055_v57, %v5054_v3  ;;  %v9181_v12 = vpop.f32.mrb[202].mxu1  ;;  %v5243_v57 = vld [vmem:[#allocation6 + $0xe0] sm:$0xff]  ;;  %v5245_v3 = vld [vmem:[#allocation6 + $0xf0] sm:$0xff] }
 0x7dc   : > { %v5057_v30 = vmax.f32 %v9147_v6, %v9181_v12  ;;  %v4989_v21 = vpop.f32.mrb[203].mxu1  ;;  %v5068_v6 = vld [vmem:[#allocation6] sm:$0xff] }
 0x7dd   : > { %v5056_v60 = vmax.f32 %v4818_v53, %v4989_v21  ;;  %9897 = vmatpush1.bf16.msra.mxu1 %v13073_v59  ;;  %v5071_v53 = vld [vmem:[#allocation6 + $0x18] sm:$0xff]  ;;  %v5247_v12 = vld [vmem:[#allocation6 + $0x100] sm:$0xff]  ;;  %v5249_v21 = vld [vmem:[#allocation6 + $0x110] sm:$0xff] }
 0x7de   : > { %9898 = vmatprep.subr.bf16.mxu1 %v10685_v0 }
 0x7df   : > { %v13077_v62 = vpack.c.bf16 %v5057_v30, %v5056_v60  ;;  %v9184_v17 = vpop.f32.mrb[204].mxu1  ;;  %v5250_v30 = vld [vmem:[#allocation6 + $0x118] sm:$0xff]  ;;  %v5252_v60 = vld [vmem:[#allocation6 + $0x128] sm:$0xff] }
 0x7e0   : > { %v5059_v1 = vmax.f32 %v9150_v50, %v9184_v17  ;;  %v4999_v25 = vpop.f32.mrb[205].mxu1  ;;  %v5070_v50 = vld [vmem:[#allocation6 + $0x10] sm:$0xff]  ;;  %v5254_v17 = vld [vmem:[#allocation6 + $0x138] sm:$0xff] }
 0x7e1   : > { %v5058_v24 = vmax.f32 %v4828_v63, %v4999_v25  ;;  %9900 = vmatpush1.bf16.msra.mxu1 %v13077_v62  ;;  %v5073_v63 = vld [vmem:[#allocation6 + $0x28] sm:$0xff] }
 0x7e2   : > { %9901 = vmatprep.subr.bf16.mxu1 %v10685_v0 }
 0x7e3   : > { %v13081_v8 = vpack.c.bf16 %v5059_v1, %v5058_v24  ;;  %v9187_v32 = vpop.f32.mrb[206].mxu1  ;;  %v5253_v1 = vld [vmem:[#allocation6 + $0x130] sm:$0xff] }
 0x7e4   : > { %v5061_v36 = vmax.f32 %v9153_v56, %v9187_v32  ;;  %v5009_v45 = vpop.f32.mrb[207].mxu1  ;;  %v5072_v56 = vld [vmem:[#allocation6 + $0x20] sm:$0xff] }
 0x7e5   : > { %v5060_v44 = vmax.f32 %v4838_v58, %v5009_v45  ;;  %9903 = vmatpush1.bf16.msra.mxu1 %v13081_v8  ;;  %v5075_v58 = vld [vmem:[#allocation6 + $0x38] sm:$0xff] }
 0x7e6   : > { %9904 = vmatprep.subr.bf16.mxu1 %v10685_v0 }
 0x7e7   : > { %v9905_v61 = vpack.c.bf16 %v5061_v36, %v5060_v44  ;;  %v9190_v4 = vpop.f32.mrb[208].mxu1 }
 0x7e8   : > { %v5063_v43 = vmax.f32 %v9156_v10, %v9190_v4  ;;  %v5019_v55 = vpop.f32.mrb[209].mxu1  ;;  %v5074_v10 = vld [vmem:[#allocation6 + $0x30] sm:$0xff] }
 0x7e9   : > { %v5062_v38 = vmax.f32 %v4848_v15, %v5019_v55  ;;  %9906 = vmatpush1.bf16.msra.mxu1 %v9905_v61  ;;  %v5077_v15 = vld [vmem:[#allocation6 + $0x48] sm:$0xff] }
 0x7ea   : > { %9907 = vmatprep.subr.bf16.mxu1 %v10685_v0 }
 0x7eb   : > { %v9908_v7 = vpack.c.bf16 %v5063_v43, %v5062_v38  ;;  %v9193_v54 = vpop.f32.mrb[210].mxu1 }
 0x7ec   : > { %v5065_v35 = vmax.f32 %v13053_v14, %v9193_v54  ;;  %v5029_v9 = vpop.f32.mrb[211].mxu1  ;;  %v5076_v14 = vld [vmem:[#allocation6 + $0x40] sm:$0xff] }
 0x7ed   : > { %v5064_v31 = vmax.f32 %v13055_v46, %v5029_v9  ;;  %9909 = vmatpush1.bf16.msra.mxu1 %v9908_v7  ;;  %v5079_v46 = vld [vmem:[#allocation6 + $0x58] sm:$0xff] }
 0x7ee   : > { %9910 = vmatprep.subr.bf16.mxu1 %v10685_v0 }
 0x7ef   : > { %v9911_v42 = vpack.c.bf16 %v5065_v35, %v5064_v31  ;;  %v9196_v33 = vpop.f32.mrb[212].mxu1 }
 0x7f0   : > { %v5067_v47 = vmax.f32 %v13057_v34, %v9196_v33  ;;  %v5039_v39 = vpop.f32.mrb[213].mxu1  ;;  %v5078_v34 = vld [vmem:[#allocation6 + $0x50] sm:$0xff] }
 0x7f1   : > { %v5066_v51 = vmax.f32 %v13059_v16, %v5039_v39  ;;  %9912 = vmatpush1.bf16.msra.mxu1 %v9911_v42  ;;  %v5081_v16 = vld [vmem:[#allocation6 + $0x68] sm:$0xff] }
 0x7f2   : > { %9913 = vmatprep.subr.bf16.mxu1 %v10685_v0 }
 0x7f3   : > { %v9914_v27 = vpack.c.bf16 %v5067_v47, %v5066_v51 }
 0x7f5   : > { %9915 = vmatpush1.bf16.msra.mxu1 %v9914_v27 }
 0x7f6   : > { %9916 = vmatprep.subr.bf16.mxu1 %v10685_v0 }
 0x7f8   : > { %5184 = vmatmul.mubr.f32.vlgmr.msra.gmra.mrb[214].mxu1 %v5068_v6 }
 0x7f9   : > { %9918 = vmatpush1.bf16.msra.mxu1 %v13061_v19  ;;  %7543 = vmatprep.mubr.msk.f32.mxu1 %vm5088_vm13, %v5071_v53  ;;  %v5084_v19 = vld [vmem:[#allocation6 + $0x80] sm:$0xff] }
 0x7fa   : > { %9919 = vmatprep.subr.bf16.mxu1 %v10685_v0 }
 0x7fc   : > { %5189 = vmatmul.mubr.f32.gmra.mrb[216].mxu1 %v5070_v50 }
 0x7fd   : > { %9921 = vmatpush1.bf16.msra.mxu1 %v13065_v48  ;;  %7544 = vmatprep.mubr.msk.f32.mxu1 %vm5088_vm13, %v5073_v63  ;;  %v5238_v48 = vld [vmem:[#allocation6 + $0xb8] sm:$0xff] }
 0x7fe   : > { %9922 = vmatprep.subr.bf16.mxu1 %v10685_v0 }
 0x800   : > { %5194 = vmatmul.mubr.f32.gmra.mrb[218].mxu1 %v5072_v56 }
 0x801   : > { %9924 = vmatpush1.bf16.msra.mxu1 %v13069_v26  ;;  %7545 = vmatprep.mubr.msk.f32.mxu1 %vm5088_vm13, %v5075_v58  ;;  %v5241_v26 = vld [vmem:[#allocation6 + $0xd0] sm:$0xff] }
 0x802   : > { %9925 = vmatprep.subr.bf16.mxu1 %v10685_v0 }
 0x804   : > { %5199 = vmatmul.mubr.f32.gmra.mrb[220].mxu1 %v5074_v10 }
 0x805   : > { %9927 = vmatpush1.bf16.msra.mxu1 %v13073_v59  ;;  %7546 = vmatprep.mubr.msk.f32.mxu1 %vm5088_vm13, %v5077_v15  ;;  %v5248_v59 = vld [vmem:[#allocation6 + $0x108] sm:$0xff] }
 0x806   : > { %9928 = vmatprep.subr.bf16.mxu1 %v10685_v0 }
 0x808   : > { %5204 = vmatmul.mubr.f32.gmra.mrb[222].mxu1 %v5076_v14 }
 0x809   : > { %9930 = vmatpush1.bf16.msra.mxu1 %v13077_v62  ;;  %7547 = vmatprep.mubr.msk.f32.mxu1 %vm5088_vm13, %v5079_v46  ;;  %v5251_v62 = vld [vmem:[#allocation6 + $0x120] sm:$0xff] }
 0x80a   : > { %9931 = vmatprep.subr.bf16.mxu1 %v10685_v0 }
 0x80c   : > { %5209 = vmatmul.mubr.f32.gmra.mrb[224].mxu1 %v5078_v34 }
 0x80d   : > { %9933 = vmatpush1.bf16.msra.mxu1 %v13081_v8  ;;  %7548 = vmatprep.mubr.msk.f32.mxu1 %vm5088_vm13, %v5081_v16 }
 0x80e   : > { %9934 = vmatprep.subr.bf16.mxu1 %v10685_v0 }
 0x810   : > { %5214 = vmatmul.mubr.f32.gmra.mrb[226].mxu1 %v5080_v23 }
 0x811   : > { %9936 = vmatpush1.bf16.msra.mxu1 %v9905_v61  ;;  %7549 = vmatprep.mubr.msk.f32.mxu1 %vm5088_vm13, %v5083_v2 }
 0x812   : > { %9937 = vmatprep.subr.bf16.mxu1 %v10685_v0 }
 0x814   : > { %5219 = vmatmul.mubr.f32.gmra.mrb[228].mxu1 %v5082_v18 }
 0x815   : > { %9939 = vmatpush1.bf16.msra.mxu1 %v9908_v7  ;;  %7550 = vmatprep.mubr.msk.f32.mxu1 %vm5088_vm13, %v5085_v20 }
 0x816   : > { %9940 = vmatprep.subr.bf16.mxu1 %v10685_v0 }
 0x818   : > { %5224 = vmatmul.mubr.f32.gmra.mrb[230].mxu1 %v5084_v19 }
 0x819   : > { %9942 = vmatpush1.bf16.msra.mxu1 %v9911_v42  ;;  %7551 = vmatprep.mubr.msk.f32.mxu1 %vm5088_vm13, %v5087_v28 }
 0x81a   : > { %9943 = vmatprep.subr.bf16.mxu1 %v10685_v0 }
 0x81c   : > { %5229 = vmatmul.mubr.f32.gmra.mrb[232].mxu1 %v5086_v29 }
 0x81d   : > { %9945 = vmatpush1.bf16.msra.mxu1 %v9914_v27  ;;  %7552 = vmatprep.mubr.msk.f32.mxu1 %vm5088_vm13, %v5236_v49 }
 0x81e   : > { %9946 = vmatprep.subr.bf16.mxu1 %v10685_v0 }
 0x820   : > { %5350 = vmatmul.mubr.f32.vlgmr.msra.gmra.mrb[234].mxu1 %v5235_v11 }
 0x821   : > { %7553 = vmatprep.mubr.msk.f32.mxu1 %vm5088_vm13, %v5238_v48 }
 0x824   : > { %5355 = vmatmul.mubr.f32.gmra.mrb[236].mxu1 %v5237_v41 }
 0x825   : > { %7554 = vmatprep.mubr.msk.f32.mxu1 %vm5088_vm13, %v5240_v37 }
 0x828   : > { %5360 = vmatmul.mubr.f32.gmra.mrb[238].mxu1 %v5239_v13 }
 0x829   : > { %7555 = vmatprep.mubr.msk.f32.mxu1 %vm5088_vm13, %v5242_v52 }
 0x82c   : > { %5365 = vmatmul.mubr.f32.gmra.mrb[240].mxu1 %v5241_v26 }
 0x82d   : > { %7556 = vmatprep.mubr.msk.f32.mxu1 %vm5088_vm13, %v5244_v5 }
 0x830   : > { %5370 = vmatmul.mubr.f32.gmra.mrb[242].mxu1 %v5243_v57 }
 0x831   : > { %7557 = vmatprep.mubr.msk.f32.mxu1 %vm5088_vm13, %v5246_v40 }
 0x834   : > { %5375 = vmatmul.mubr.f32.gmra.mrb[244].mxu1 %v5245_v3 }
 0x835   : > { %7558 = vmatprep.mubr.msk.f32.mxu1 %vm5088_vm13, %v5248_v59 }
 0x838   : > { %5380 = vmatmul.mubr.f32.gmra.mrb[246].mxu1 %v5247_v12 }
 0x839   : > { %7559 = vmatprep.mubr.msk.f32.mxu1 %vm5088_vm13, %v5250_v30 }
 0x83c   : > { %5385 = vmatmul.mubr.f32.gmra.mrb[248].mxu1 %v5249_v21 }
 0x83d   : > { %7560 = vmatprep.mubr.msk.f32.mxu1 %vm5088_vm13, %v5252_v60 }
 0x840   : > { %5390 = vmatmul.mubr.f32.gmra.mrb[250].mxu1 %v5251_v62 }
 0x841   : > { %7561 = vmatprep.mubr.msk.f32.mxu1 %vm5088_vm13, %v5254_v17 }
 0x844   : > { %5395 = vmatmul.mubr.f32.gmra.mrb[252].mxu1 %v5253_v1 }
 0x845   : > { %9217 = vmatprep.mubr.msk.f32.mxu1 %vm10687_vm0, %v10688_v22 }
 0x8cb   : > { %v5185_v25 = vpop.f32.mrb[214].mxu1 }
 0x8cc   : > { %v5187_v24 = vpop.f32.mrb[215].mxu1 }
 0x8cf   : > { %v5190_v8 = vpop.f32.mrb[216].mxu1 }
 0x8d0   : > { %v5192_v32 = vpop.f32.mrb[217].mxu1 }
 0x8d3   : > { %v5195_v36 = vpop.f32.mrb[218].mxu1 }
 0x8d4   : > { %v5197_v45 = vpop.f32.mrb[219].mxu1 }
 0x8d7   : > { %v5200_v44 = vpop.f32.mrb[220].mxu1 }
 0x8d8   : > { %v5202_v61 = vpop.f32.mrb[221].mxu1 }
 0x8db   : > { %v5205_v4 = vpop.f32.mrb[222].mxu1 }
 0x8dc   : > { %v5207_v43 = vpop.f32.mrb[223].mxu1 }
 0x8dd   : > { %v5422_v43 = vld [vmem:[%s13932_s9 + $0x8] sm:$0xff] }
 0x8df   : > { %v5210_v55 = vpop.f32.mrb[224].mxu1 }
 0x8e0   : > { %v5212_v38 = vpop.f32.mrb[225].mxu1 }
 0x8e1   : > { %v5424_v38 = vld [vmem:[%s13932_s9 + $0x18] sm:$0xff] }
 0x8e3   : > { %v5215_v7 = vpop.f32.mrb[226].mxu1 }
 0x8e4   : > { %v5217_v54 = vpop.f32.mrb[227].mxu1 }
 0x8e5   : > { %v5426_v54 = vld [vmem:[%s13932_s9 + $0x28] sm:$0xff] }
 0x8e7   : > { %v5220_v35 = vpop.f32.mrb[228].mxu1 }
 0x8e8   : > { %v5222_v9 = vpop.f32.mrb[229].mxu1 }
 0x8e9   : > { %v5428_v9 = vld [vmem:[%s13932_s9 + $0x38] sm:$0xff] }
 0x8eb   : > { %v5225_v31 = vpop.f32.mrb[230].mxu1 }
 0x8ec   : > { %v5227_v42 = vpop.f32.mrb[231].mxu1 }
 0x8ed   : > { %v5430_v42 = vld [vmem:[%s13932_s9 + $0x48] sm:$0xff] }
 0x8ef   : > { %v13130_v33 = vpop.f32.mrb[232].mxu1 }
 0x8f0   : > { %v5232_v47 = vpop.f32.mrb[233].mxu1 }
 0x8f1   : > { %v5432_v47 = vld [vmem:[%s13932_s9 + $0x58] sm:$0xff] }
 0x8f3   : > { %v5351_v39 = vpop.f32.mrb[234].mxu1 }
 0x8f4   : > { %v5400_v51 = vmax.f32 %v5185_v25, %v5351_v39  ;;  %v5353_v27 = vpop.f32.mrb[235].mxu1  ;;  %v5433_v39 = vld [vmem:[%s13932_s9 + $0x60] sm:$0xff] }
 0x8f5   : > { %v5435_v27 = vld [vmem:[%s13932_s9 + $0x70] sm:$0xff] }
 0x8f6   : > { %5411 = vst.msk [vmem:[#allocation3] sm:$0xff] %vm5410_vm14, %v5400_v51  ;;  %v5434_v51 = vld [vmem:[%s13932_s9 + $0x68] sm:$0xff] }
 0x8f7   : > { %v5356_v6 = vpop.f32.mrb[236].mxu1 }
 0x8f8   : > { %v5401_v53 = vmax.f32 %v5190_v8, %v5356_v6  ;;  %v5358_v50 = vpop.f32.mrb[237].mxu1 }
 0x8fa   : > { %5412 = vst.msk [vmem:[#allocation3 + $0x8] sm:$0xff] %vm5410_vm14, %v5401_v53 }
 0x8fb   : > { %v5361_v63 = vpop.f32.mrb[238].mxu1 }
 0x8fc   : > { %v5402_v56 = vmax.f32 %v5195_v36, %v5361_v63  ;;  %v5363_v58 = vpop.f32.mrb[239].mxu1 }
 0x8fd   : > { %v5436_v46 = vld [vmem:[#allocation3] sm:$0xff] }
 0x8fe   : > { %5413 = vst.msk [vmem:[#allocation3 + $0x10] sm:$0xff] %vm5410_vm14, %v5402_v56 }
 0x8ff   : > { %v5366_v10 = vpop.f32.mrb[240].mxu1 }
 0x900   : > { %v5403_v15 = vmax.f32 %v5200_v44, %v5366_v10  ;;  %v5368_v14 = vpop.f32.mrb[241].mxu1 }
 0x901   : > { %v5437_v34 = vld [vmem:[#allocation3 + $0x8] sm:$0xff] }
 0x902   : > { %5414 = vst.msk [vmem:[#allocation3 + $0x18] sm:$0xff] %vm5410_vm14, %v5403_v15  ;;  %v13136_v16 = vpack.i.bf16 %v5437_v34, %v5436_v46  ;;  %v9962_v23 = vpack.c.bf16 %v5437_v34, %v5436_v46 }
 0x903   : > { %v5371_v2 = vpop.f32.mrb[242].mxu1 }
 0x904   : > { %v5404_v18 = vmax.f32 %v5205_v4, %v5371_v2  ;;  %10453 = vrot.lane.b32.xlu0 %v13136_v16, %s10686_s23  ;;  %9963 = vmatpush3.bf16.msra.mxu0 %v9962_v23  ;;  %v5373_v20 = vpop.f32.mrb[243].mxu1  ;;  %v5421_v4 = vld [vmem:[%s13932_s9] sm:$0xff] }
 0x905   : > { %9964 = vmatprep.subr.bf16.mxu0 %v10685_v0  ;;  %v5438_v49 = vld [vmem:[#allocation3 + $0x10] sm:$0xff] }
 0x906   : > { %5415 = vst.msk [vmem:[#allocation3 + $0x20] sm:$0xff] %vm5410_vm14, %v5404_v18 }
 0x907   : > { %v5376_v19 = vpop.f32.mrb[244].mxu1 }
 0x908   : > { %v5405_v28 = vmax.f32 %v5210_v55, %v5376_v19  ;;  %v5378_v29 = vpop.f32.mrb[245].mxu1  ;;  %v5423_v55 = vld [vmem:[%s13932_s9 + $0x10] sm:$0xff] }
 0x909   : > { %v5439_v11 = vld [vmem:[#allocation3 + $0x18] sm:$0xff] }
 0x90a   : > { %5416 = vst.msk [vmem:[#allocation3 + $0x28] sm:$0xff] %vm5410_vm14, %v5405_v28  ;;  %v10457_v48 = vpack.i.bf16 %v5439_v11, %v5438_v49  ;;  %v9965_v41 = vpack.c.bf16 %v5439_v11, %v5438_v49 }
 0x90b   : > { %v5381_v37 = vpop.f32.mrb[246].mxu1 }
 0x90c   : > { %v5406_v13 = vmax.f32 %v5215_v7, %v5381_v37  ;;  %10458 = vrot.lane.b32.xlu1 %v10457_v48, %s10686_s23  ;;  %9966 = vmatpush3.bf16.msra.mxu0 %v9965_v41  ;;  %v5383_v52 = vpop.f32.mrb[247].mxu1  ;;  %v5425_v7 = vld [vmem:[%s13932_s9 + $0x20] sm:$0xff] }
 0x90d   : > { %9967 = vmatprep.subr.bf16.mxu0 %v10685_v0  ;;  %v5440_v40 = vld [vmem:[#allocation3 + $0x20] sm:$0xff] }
 0x90e   : > { %5417 = vst.msk [vmem:[#allocation3 + $0x30] sm:$0xff] %vm5410_vm14, %v5406_v13  ;;  %v7562_v13 = vld [vmem:[%s13932_s9 + $0x78] sm:$0xff] }
 0x90f   : > { %v5386_v26 = vpop.f32.mrb[248].mxu1 }
 0x910   : > { %v5407_v5 = vmax.f32 %v5220_v35, %v5386_v26  ;;  %v5388_v57 = vpop.f32.mrb[249].mxu1  ;;  %v5427_v35 = vld [vmem:[%s13932_s9 + $0x30] sm:$0xff] }
 0x911   : > { %v5441_v3 = vld [vmem:[#allocation3 + $0x28] sm:$0xff] }
 0x912   : > { %5418 = vst.msk [vmem:[#allocation3 + $0x38] sm:$0xff] %vm5410_vm14, %v5407_v5  ;;  %v10462_v59 = vpack.i.bf16 %v5441_v3, %v5440_v40  ;;  %v9968_v12 = vpack.c.bf16 %v5441_v3, %v5440_v40  ;;  %v7563_v3 = vld [vmem:[%s13932_s9 + $0x80] sm:$0xff] }
 0x913   : > { %v5391_v30 = vpop.f32.mrb[250].mxu1 }
 0x914   : > { %v5408_v21 = vmax.f32 %v5225_v31, %v5391_v30  ;;  %10463 = vrot.lane.b32.xlu0 %v10462_v59, %s10686_s23  ;;  %9969 = vmatpush3.bf16.msra.mxu0 %v9968_v12  ;;  %v5393_v60 = vpop.f32.mrb[251].mxu1  ;;  %v5429_v31 = vld [vmem:[%s13932_s9 + $0x40] sm:$0xff] }
 0x915   : > { %9970 = vmatprep.subr.bf16.mxu0 %v10685_v0  ;;  %v5442_v25 = vld [vmem:[#allocation3 + $0x30] sm:$0xff] }
 0x916   : > { %5419 = vst.msk [vmem:[#allocation3 + $0x40] sm:$0xff] %vm5410_vm14, %v5408_v21 }
 0x917   : > { %v5396_v62 = vpop.f32.mrb[252].mxu1 }
 0x918   : > { %v5409_v17 = vmax.f32 %v13130_v33, %v5396_v62  ;;  %v5398_v1 = vpop.f32.mrb[253].mxu1  ;;  %v5431_v33 = vld [vmem:[%s13932_s9 + $0x50] sm:$0xff] }
 0x919   : > { %v5443_v24 = vld [vmem:[#allocation3 + $0x38] sm:$0xff] }
 0x91a   : > { %5420 = vst.msk [vmem:[#allocation3 + $0x48] sm:$0xff] %vm5410_vm14, %v5409_v17  ;;  %v10467_v8 = vpack.i.bf16 %v5443_v24, %v5442_v25  ;;  %v9971_v32 = vpack.c.bf16 %v5443_v24, %v5442_v25  ;;  %v7564_v17 = vld [vmem:[%s13932_s9 + $0x88] sm:$0xff] }
 0x91c   : > { %10468 = vrot.lane.b32.xlu1 %v10467_v8, %s10686_s23  ;;  %9972 = vmatpush3.bf16.msra.mxu0 %v9971_v32 }
 0x91d   : > { %9973 = vmatprep.subr.bf16.mxu0 %v10685_v0  ;;  %v5444_v36 = vld [vmem:[#allocation3 + $0x40] sm:$0xff] }
 0x920   : > { %10478 = vrot.lane.b32.xlu1 %v13136_v16, %s10689_s24 }
 0x921   : > { %v5445_v45 = vld [vmem:[#allocation3 + $0x48] sm:$0xff] }
 0x922   : > { %v10472_v44 = vpack.i.bf16 %v5445_v45, %v5444_v36  ;;  %v9974_v61 = vpack.c.bf16 %v5445_v45, %v5444_v36 }
 0x924   : > { %10488 = vrot.lane.b32.xlu1 %v10462_v59, %s10689_s24  ;;  %10473 = vrot.lane.b32.xlu0 %v10472_v44, %s10686_s23 }
 0x925   : > { %9975 = vmatpush3.bf16.msra.mxu0 %v9974_v61  ;;  %v7565_v61 = vld [vmem:[%s13932_s9 + $0x90] sm:$0xff] }
 0x926   : > { %9991 = vmatprep.subr.bf16.mxu0 %v10685_v0 }
 0x928   : > { %10498 = vrot.lane.b32.xlu1 %v10472_v44, %s10689_s24  ;;  %10483 = vrot.lane.b32.xlu0 %v10457_v48, %s10689_s24 }
 0x929   : > { %9283 = vmatmul.mubr.msk.f32.vlgmr.msra.gmra.mrb[184].mxu0 %vm5502_vm15, %v5421_v4 }
 0x92a   : > { %9285 = vmatprep.mubr.msk.f32.mxu0 %vm10687_vm0, %v10688_v22 }
 0x92c   : > { %10508 = vrot.lane.b32.xlu1 %v13136_v16, %s10691_s30  ;;  %10493 = vrot.lane.b32.xlu0 %v10467_v8, %s10689_s24  ;;  %s13967_s24 = sld [smem:[#allocation13_spill]] }
 0x92d   : > { %9286 = vmatmul.mubr.msk.f32.gmra.mrb[186].mxu0 %vm5502_vm15, %v5422_v43 }
 0x92e   : > { %9288 = vmatprep.mubr.msk.f32.mxu0 %vm10687_vm0, %v10688_v22 }
 0x930   : > { %10518 = vrot.lane.b32.xlu1 %v10457_v48, %s10691_s30  ;;  %10503 = vrot.lane.b32.xlu0 %v13136_v16, %s10690_s14 }
 0x931   : > { %9289 = vmatmul.mubr.msk.f32.gmra.mrb[188].mxu0 %vm5502_vm15, %v5423_v55 }
 0x932   : > { %9291 = vmatprep.mubr.msk.f32.mxu0 %vm10687_vm0, %v10688_v22 }
 0x934   : > { %10528 = vrot.lane.b32.xlu1 %v10462_v59, %s10691_s30  ;;  %10513 = vrot.lane.b32.xlu0 %v10457_v48, %s10690_s14 }
 0x935   : > { %9292 = vmatmul.mubr.msk.f32.gmra.mrb[190].mxu0 %vm5502_vm15, %v5424_v38 }
 0x936   : > { %9294 = vmatprep.mubr.msk.f32.mxu0 %vm10687_vm0, %v10688_v22 }
 0x938   : > { %10538 = vrot.lane.b32.xlu1 %v10467_v8, %s10691_s30  ;;  %10523 = vrot.lane.b32.xlu0 %v10462_v59, %s10690_s14 }
 0x939   : > { %9295 = vmatmul.mubr.msk.f32.gmra.mrb[192].mxu0 %vm5502_vm15, %v5425_v7 }
 0x93a   : > { %9297 = vmatprep.mubr.msk.f32.mxu0 %vm10687_vm0, %v10688_v22 }
 0x93c   : > { %10548 = vrot.lane.b32.xlu1 %v10472_v44, %s10691_s30  ;;  %10533 = vrot.lane.b32.xlu0 %v10467_v8, %s10690_s14 }
 0x93d   : > { %9298 = vmatmul.mubr.msk.f32.gmra.mrb[194].mxu0 %vm5502_vm15, %v5426_v54 }
 0x93e   : > { %9300 = vmatprep.mubr.msk.f32.mxu0 %vm10687_vm0, %v10688_v22 }
 0x940   : > { %10543 = vrot.lane.b32.xlu0 %v10472_v44, %s10690_s14  ;;  %s13966_s14 = smov %s13965_s21 }
 0x941   : > { %9301 = vmatmul.mubr.msk.f32.gmra.mrb[196].mxu0 %vm5502_vm15, %v5427_v35 }
 0x942   : > { %9303 = vmatprep.mubr.msk.f32.mxu0 %vm10687_vm0, %v10688_v22 }
 0x945   : > { %9304 = vmatmul.mubr.msk.f32.gmra.mrb[198].mxu0 %vm5502_vm15, %v5428_v9  ;;  %v7566_v9 = vld [vmem:[%s13932_s9 + $0x98] sm:$0xff] }
 0x946   : > { %9306 = vmatprep.mubr.msk.f32.mxu0 %vm10687_vm0, %v10688_v22 }
 0x949   : > { %9307 = vmatmul.mubr.msk.f32.gmra.mrb[200].mxu0 %vm5502_vm15, %v5429_v31 }
 0x94a   : > { %9309 = vmatprep.mubr.msk.f32.mxu0 %vm10687_vm0, %v10688_v22 }
 0x94d   : > { %9310 = vmatmul.mubr.msk.f32.gmra.mrb[202].mxu0 %vm5502_vm15, %v5430_v42 }
 0x94e   : > { %9312 = vmatprep.mubr.msk.f32.mxu0 %vm10687_vm0, %v10688_v22 }
 0x951   : > { %9313 = vmatmul.mubr.msk.f32.gmra.mrb[204].mxu0 %vm5502_vm15, %v5431_v33 }
 0x952   : > { %9315 = vmatprep.mubr.msk.f32.mxu0 %vm10687_vm0, %v10688_v22 }
 0x955   : > { %9316 = vmatmul.mubr.msk.f32.gmra.mrb[206].mxu0 %vm5502_vm15, %v5432_v47 }
 0x956   : > { %9318 = vmatprep.mubr.msk.f32.mxu0 %vm10687_vm0, %v10688_v22 }
 0x959   : > { %9319 = vmatmul.mubr.msk.f32.gmra.mrb[208].mxu0 %vm5502_vm15, %v5433_v39 }
 0x95a   : > { %9321 = vmatprep.mubr.msk.f32.mxu0 %vm10687_vm0, %v10688_v22 }
 0x95d   : > { %9322 = vmatmul.mubr.msk.f32.gmra.mrb[210].mxu0 %vm5502_vm15, %v5434_v51  ;;  %v7567_v51 = vld [vmem:[%s13932_s9 + $0xa0] sm:$0xff] }
 0x95e   : > { %9324 = vmatprep.mubr.msk.f32.mxu0 %vm10687_vm0, %v10688_v22 }
 0x961   : > { %9325 = vmatmul.mubr.msk.f32.gmra.mrb[212].mxu0 %vm5502_vm15, %v5435_v27 }
 0x962   : > { %9412 = vmatprep.mubr.msk.f32.mxu0 %vm10687_vm0, %v10688_v22 }
 0x976   : > { %v10454_v6 = vpop.permute.xlu0 %10453 }
 0x977   : > { %v10456_v53 = vunpack.i.h.bf16 %v10454_v6  ;;  %v10455_v50 = vunpack.i.l.bf16 %v10454_v6 }
 0x979   : > { %v9947_v63 = vpack.c.bf16 %v10456_v53, %v10455_v50 }
 0x97b   : > { %9948 = vmatpush3.bf16.msra.mxu1 %v9947_v63  ;;  %v7568_v63 = vld [vmem:[%s13932_s9 + $0xa8] sm:$0xff] }
 0x97c   : > { %9949 = vmatprep.subr.bf16.mxu1 %v10685_v0 }
 0x97e   : > { %v10459_v56 = vpop.permute.xlu1 %10458 }
 0x97f   : > { %v10461_v58 = vunpack.i.h.bf16 %v10459_v56  ;;  %v10460_v10 = vunpack.i.l.bf16 %v10459_v56 }
 0x981   : > { %v9950_v15 = vpack.c.bf16 %v10461_v58, %v10460_v10  ;;  %v7569_v58 = vld [vmem:[%s13932_s9 + $0xb0] sm:$0xff]  ;;  %v7637_v10 = vld [vmem:[%s13932_s9 + $0x168] sm:$0xff] }
 0x983   : > { %9951 = vmatpush3.bf16.msra.mxu1 %v9950_v15  ;;  %v7570_v15 = vld [vmem:[%s13932_s9 + $0xb8] sm:$0xff] }
 0x984   : > { %9952 = vmatprep.subr.bf16.mxu1 %v10685_v0 }
 0x986   : > { %v10464_v14 = vpop.permute.xlu0 %10463 }
 0x987   : > { %v10466_v46 = vunpack.i.h.bf16 %v10464_v14  ;;  %v10465_v34 = vunpack.i.l.bf16 %v10464_v14  ;;  %v7638_v14 = vld [vmem:[%s13932_s9 + $0x170] sm:$0xff] }
 0x989   : > { %v9953_v16 = vpack.c.bf16 %v10466_v46, %v10465_v34  ;;  %v7571_v46 = vld [vmem:[%s13932_s9 + $0xc0] sm:$0xff]  ;;  %v7639_v34 = vld [vmem:[%s13932_s9 + $0x178] sm:$0xff] }
 0x98b   : > { %9954 = vmatpush3.bf16.msra.mxu1 %v9953_v16  ;;  %v7572_v16 = vld [vmem:[%s13932_s9 + $0xc8] sm:$0xff] }
 0x98c   : > { %9955 = vmatprep.subr.bf16.mxu1 %v10685_v0 }
 0x98e   : > { %v10469_v23 = vpop.permute.xlu1 %10468 }
 0x98f   : > { %v10471_v2 = vunpack.i.h.bf16 %v10469_v23  ;;  %v10470_v18 = vunpack.i.l.bf16 %v10469_v23  ;;  %v7640_v23 = vld [vmem:[%s13932_s9 + $0x180] sm:$0xff] }
 0x991   : > { %v9956_v20 = vpack.c.bf16 %v10471_v2, %v10470_v18  ;;  %v7573_v2 = vld [vmem:[%s13932_s9 + $0xd0] sm:$0xff]  ;;  %v7641_v18 = vld [vmem:[%s13932_s9 + $0x188] sm:$0xff] }
 0x992   : > { %v10479_v19 = vpop.permute.xlu1 %10478 }
 0x993   : > { %9957 = vmatpush3.bf16.msra.mxu1 %v9956_v20  ;;  %v10481_v11 = vunpack.i.h.bf16 %v10479_v19  ;;  %v10480_v48 = vunpack.i.l.bf16 %v10479_v19  ;;  %v7574_v19 = vld [vmem:[%s13932_s9 + $0xd8] sm:$0xff] }
 0x994   : > { %9958 = vmatprep.subr.bf16.mxu1 %v10685_v0 }
 0x995   : > { %v9977_v52 = vpack.c.bf16 %v10481_v11, %v10480_v48  ;;  %v7576_v48 = vld [vmem:[%s13932_s9 + $0xe8] sm:$0xff] }
 0x996   : > { %v10474_v28 = vpop.permute.xlu0 %10473  ;;  %v10489_v57 = vpop.permute.xlu1 %10488 }
 0x997   : > { %v10476_v29 = vunpack.i.h.bf16 %v10474_v28  ;;  %v10475_v49 = vunpack.i.l.bf16 %v10474_v28  ;;  %v10491_v59 = vunpack.i.h.bf16 %v10489_v57  ;;  %v10490_v12 = vunpack.i.l.bf16 %v10489_v57  ;;  %v7642_v28 = vld [vmem:[%s13932_s9 + $0x190] sm:$0xff] }
 0x999   : > { %v9959_v41 = vpack.c.bf16 %v10476_v29, %v10475_v49  ;;  %v9983_v1 = vpack.c.bf16 %v10491_v59, %v10490_v12  ;;  %v7575_v29 = vld [vmem:[%s13932_s9 + $0xe0] sm:$0xff]  ;;  %v7643_v49 = vld [vmem:[%s13932_s9 + $0x198] sm:$0xff]  ;;  %v7646_v12 = vld [vmem:[%s13932_s9 + $0x1b0] sm:$0xff] }
 0x99a   : > { %v10484_v37 = vpop.permute.xlu0 %10483  ;;  %v10499_v32 = vpop.permute.xlu1 %10498  ;;  %v7608_v59 = vld [vmem:[%s13932_s9 + $0xf8] sm:$0xff] }
 0x99b   : > { %9960 = vmatpush3.bf16.msra.mxu1 %v9959_v41  ;;  %v10486_v26 = vunpack.i.h.bf16 %v10484_v37  ;;  %v10485_v5 = vunpack.i.l.bf16 %v10484_v37  ;;  %v10501_v4 = vunpack.i.h.bf16 %v10499_v32  ;;  %v10500_v43 = vunpack.i.l.bf16 %v10499_v32  ;;  %v7644_v41 = vld [vmem:[%s13932_s9 + $0x1a0] sm:$0xff] }
 0x99c   : > { %9976 = vmatprep.subr.bf16.mxu1 %v10685_v0 }
 0x99d   : > { %v9980_v30 = vpack.c.bf16 %v10486_v26, %v10485_v5  ;;  %v9989_v31 = vpack.c.bf16 %v10501_v4, %v10500_v43  ;;  %v7607_v26 = vld [vmem:[%s13932_s9 + $0xf0] sm:$0xff]  ;;  %v7645_v5 = vld [vmem:[%s13932_s9 + $0x1a8] sm:$0xff] }
 0x99e   : > { %v10494_v40 = vpop.permute.xlu0 %10493  ;;  %9218 = vmatmul.mubr.msk.f32.vlgmr.msra.gmra.mrb[254].mxu1 %vm5502_vm15, %v7562_v13  ;;  %v10509_v20 = vpop.permute.xlu1 %10508  ;;  %v7611_v43 = vld [vmem:[%s13932_s9 + $0x110] sm:$0xff] }
 0x99f   : > { %9978 = vmatpush3.bf16.msra.mxu1 %v9977_v52  ;;  %9220 = vmatprep.mubr.msk.f32.mxu1 %vm10687_vm0, %v10688_v22  ;;  %v10496_v25 = vunpack.i.h.bf16 %v10494_v40  ;;  %v10495_v24 = vunpack.i.l.bf16 %v10494_v40  ;;  %v10511_v37 = vunpack.i.h.bf16 %v10509_v20  ;;  %v10510_v13 = vunpack.i.l.bf16 %v10509_v20 }
 0x9a0   : > { %9979 = vmatprep.subr.bf16.mxu1 %v10685_v0 }
 0x9a1   : > { %v9986_v55 = vpack.c.bf16 %v10496_v25, %v10495_v24  ;;  %v10007_v57 = vpack.c.bf16 %v10511_v37, %v10510_v13 }
 0x9a2   : > { %v10504_v21 = vpop.permute.xlu0 %10503  ;;  %9221 = vmatmul.mubr.msk.f32.gmra.mrb[0].mxu1 %vm5502_vm15, %v7563_v3  ;;  %v10519_v11 = vpop.permute.xlu1 %10518 }
 0x9a3   : > { %v10506_v60 = vunpack.i.h.bf16 %v10504_v21  ;;  %v10505_v62 = vunpack.i.l.bf16 %v10504_v21  ;;  %9981 = vmatpush3.bf16.msra.mxu1 %v9980_v30  ;;  %9223 = vmatprep.mubr.msk.f32.mxu1 %vm10687_vm0, %v10688_v22  ;;  %v10521_v40 = vunpack.i.h.bf16 %v10519_v11  ;;  %v10520_v3 = vunpack.i.l.bf16 %v10519_v11 }
 0x9a4   : > { %9982 = vmatprep.subr.bf16.mxu1 %v10685_v0 }
 0x9a5   : > { %v9992_v8 = vpack.c.bf16 %v10506_v60, %v10505_v62  ;;  %v10010_v21 = vpack.c.bf16 %v10521_v40, %v10520_v3 }
 0x9a6   : > { %v10514_v36 = vpop.permute.xlu0 %10513  ;;  %9224 = vmatmul.mubr.msk.f32.gmra.mrb[2].mxu1 %vm5502_vm15, %v7564_v17  ;;  %v10529_v52 = vpop.permute.xlu1 %10528  ;;  %v7609_v17 = vld [vmem:[%s13932_s9 + $0x100] sm:$0xff] }
 0x9a7   : > { %v10516_v45 = vunpack.i.h.bf16 %v10514_v36  ;;  %v10515_v44 = vunpack.i.l.bf16 %v10514_v36  ;;  %9984 = vmatpush3.bf16.msra.mxu1 %v9983_v1  ;;  %9993 = vmatpush3.bf16.msra.mxu0 %v9992_v8  ;;  %v10531_v60 = vunpack.i.h.bf16 %v10529_v52  ;;  %v10530_v62 = vunpack.i.l.bf16 %v10529_v52  ;;  %v7647_v1 = vld [vmem:[%s13932_s9 + $0x1b8] sm:$0xff]  ;;  %v7610_v36 = vld [vmem:[%s13932_s9 + $0x108] sm:$0xff]  ;;  %v7671_v52 = vld [vmem:[%s13932_s9 + $0x200] sm:$0xff] }
 0x9a8   : > { %9226 = vmatprep.mubr.msk.f32.mxu1 %vm10687_vm0, %v10688_v22  ;;  %9985 = vmatprep.subr.bf16.mxu1 %v10685_v0 }
 0x9a9   : > { %v9995_v38 = vpack.c.bf16 %v10516_v45, %v10515_v44  ;;  %9994 = vmatprep.subr.bf16.mxu0 %v10685_v0  ;;  %v10013_v25 = vpack.c.bf16 %v10531_v60, %v10530_v62  ;;  %v7648_v45 = vld [vmem:[%s13932_s9 + $0x1c0] sm:$0xff] }
 0x9aa   : > { %v10524_v7 = vpop.permute.xlu0 %10523  ;;  %9227 = vmatmul.mubr.msk.f32.gmra.mrb[4].mxu1 %vm5502_vm15, %v7565_v61  ;;  %v10539_v30 = vpop.permute.xlu1 %10538 }
 0x9ab   : > { %v10526_v54 = vunpack.i.h.bf16 %v10524_v7  ;;  %v10525_v35 = vunpack.i.l.bf16 %v10524_v7  ;;  %9987 = vmatpush3.bf16.msra.mxu1 %v9986_v55  ;;  %9996 = vmatpush3.bf16.msra.mxu0 %v9995_v38  ;;  %v10541_v24 = vunpack.i.h.bf16 %v10539_v30  ;;  %v10540_v8 = vunpack.i.l.bf16 %v10539_v30  ;;  %v7649_v55 = vld [vmem:[%s13932_s9 + $0x1c8] sm:$0xff]  ;;  %v7612_v7 = vld [vmem:[%s13932_s9 + $0x118] sm:$0xff] }
 0x9ac   : > { %9229 = vmatprep.mubr.msk.f32.mxu1 %vm10687_vm0, %v10688_v22  ;;  %9988 = vmatprep.subr.bf16.mxu1 %v10685_v0 }
 0x9ad   : > { %v9998_v42 = vpack.c.bf16 %v10526_v54, %v10525_v35  ;;  %9997 = vmatprep.subr.bf16.mxu0 %v10685_v0  ;;  %v10016_v44 = vpack.c.bf16 %v10541_v24, %v10540_v8  ;;  %v7650_v54 = vld [vmem:[%s13932_s9 + $0x1d0] sm:$0xff]  ;;  %v7613_v35 = vld [vmem:[%s13932_s9 + $0x120] sm:$0xff]  ;;  %v7676_v24 = vld [vmem:[%s13932_s9 + $0x228] sm:$0xff] }
 0x9ae   : > { %v10534_v33 = vpop.permute.xlu0 %10533  ;;  %9230 = vmatmul.mubr.msk.f32.gmra.mrb[6].mxu1 %vm5502_vm15, %v7566_v9  ;;  %v10549_v32 = vpop.permute.xlu1 %10548  ;;  %v7651_v9 = vld [vmem:[%s13932_s9 + $0x1d8] sm:$0xff]  ;;  %v7677_v8 = vld [vmem:[%s13932_s9 + $0x230] sm:$0xff] }
 0x9af   : > { %v10536_v47 = vunpack.i.h.bf16 %v10534_v33  ;;  %v10535_v39 = vunpack.i.l.bf16 %v10534_v33  ;;  %9990 = vmatpush3.bf16.msra.mxu1 %v9989_v31  ;;  %9999 = vmatpush3.bf16.msra.mxu0 %v9998_v42  ;;  %v10551_v61 = vunpack.i.h.bf16 %v10549_v32  ;;  %v10550_v4 = vunpack.i.l.bf16 %v10549_v32  ;;  %v7614_v31 = vld [vmem:[%s13932_s9 + $0x128] sm:$0xff]  ;;  %v7615_v42 = vld [vmem:[%s13932_s9 + $0x130] sm:$0xff]  ;;  %v7616_v33 = vld [vmem:[%s13932_s9 + $0x138] sm:$0xff] }
 0x9b0   : > { %9232 = vmatprep.mubr.msk.f32.mxu1 %vm10687_vm0, %v10688_v22  ;;  %10000 = vmatprep.subr.bf16.mxu0 %v10685_v0  ;;  %v7678_v32 = vld [vmem:[%s13932_s9 + $0x238] sm:$0xff] }
 0x9b1   : > { %v10001_v27 = vpack.c.bf16 %v10536_v47, %v10535_v39  ;;  %10006 = vmatprep.subr.bf16.mxu1 %v10685_v0  ;;  %v10019_v38 = vpack.c.bf16 %v10551_v61, %v10550_v4 }
 0x9b2   : > { %v10544_v6 = vpop.permute.xlu0 %10543  ;;  %9233 = vmatmul.mubr.msk.f32.gmra.mrb[8].mxu1 %vm5502_vm15, %v7567_v51  ;;  %v7617_v51 = vld [vmem:[%s13932_s9 + $0x140] sm:$0xff] }
 0x9b3   : > { %v10546_v53 = vunpack.i.h.bf16 %v10544_v6  ;;  %v10545_v50 = vunpack.i.l.bf16 %v10544_v6  ;;  %10002 = vmatpush3.bf16.msra.mxu0 %v10001_v27  ;;  %9235 = vmatprep.mubr.msk.f32.mxu1 %vm10687_vm0, %v10688_v22 }
 0x9b4   : > { %10003 = vmatprep.subr.bf16.mxu0 %v10685_v0 }
 0x9b5   : > { %v10004_v56 = vpack.c.bf16 %v10546_v53, %v10545_v50  ;;  %v7618_v53 = vld [vmem:[%s13932_s9 + $0x148] sm:$0xff] }
 0x9b6   : > { %9236 = vmatmul.mubr.msk.f32.gmra.mrb[10].mxu1 %vm5502_vm15, %v7568_v63 }
 0x9b7   : > { %10005 = vmatpush3.bf16.msra.mxu0 %v10004_v56  ;;  %9238 = vmatprep.mubr.msk.f32.mxu1 %vm10687_vm0, %v10688_v22  ;;  %v7619_v56 = vld [vmem:[%s13932_s9 + $0x150] sm:$0xff] }
 0x9b8   : > { %10021 = vmatprep.subr.bf16.mxu0 %v10685_v0 }
 0x9ba   : > { %9239 = vmatmul.mubr.msk.f32.gmra.mrb[12].mxu1 %vm5502_vm15, %v7569_v58  ;;  %9413 = vmatmul.mubr.msk.f32.vlgmr.msra.gmra.mrb[214].mxu0 %vm5502_vm15, %v7637_v10 }
 0x9bb   : > { %9241 = vmatprep.mubr.msk.f32.mxu1 %vm10687_vm0, %v10688_v22  ;;  %9415 = vmatprep.mubr.msk.f32.mxu0 %vm10687_vm0, %v10688_v22 }
 0x9be   : > { %9242 = vmatmul.mubr.msk.f32.gmra.mrb[14].mxu1 %vm5502_vm15, %v7570_v15  ;;  %9416 = vmatmul.mubr.msk.f32.gmra.mrb[216].mxu0 %vm5502_vm15, %v7638_v14  ;;  %v7620_v15 = vld [vmem:[%s13932_s9 + $0x158] sm:$0xff] }
 0x9bf   : > { %9244 = vmatprep.mubr.msk.f32.mxu1 %vm10687_vm0, %v10688_v22  ;;  %9418 = vmatprep.mubr.msk.f32.mxu0 %vm10687_vm0, %v10688_v22 }
 0x9c2   : > { %9245 = vmatmul.mubr.msk.f32.gmra.mrb[16].mxu1 %vm5502_vm15, %v7571_v46  ;;  %9419 = vmatmul.mubr.msk.f32.gmra.mrb[218].mxu0 %vm5502_vm15, %v7639_v34  ;;  %v7621_v34 = vld [vmem:[%s13932_s9 + $0x160] sm:$0xff] }
 0x9c3   : > { %9247 = vmatprep.mubr.msk.f32.mxu1 %vm10687_vm0, %v10688_v22  ;;  %9421 = vmatprep.mubr.msk.f32.mxu0 %vm10687_vm0, %v10688_v22 }
 0x9c6   : > { %9248 = vmatmul.mubr.msk.f32.gmra.mrb[18].mxu1 %vm5502_vm15, %v7572_v16  ;;  %9422 = vmatmul.mubr.msk.f32.gmra.mrb[220].mxu0 %vm5502_vm15, %v7640_v23 }
 0x9c7   : > { %9250 = vmatprep.mubr.msk.f32.mxu1 %vm10687_vm0, %v10688_v22  ;;  %9424 = vmatprep.mubr.msk.f32.mxu0 %vm10687_vm0, %v10688_v22 }
 0x9ca   : > { %9251 = vmatmul.mubr.msk.f32.gmra.mrb[20].mxu1 %vm5502_vm15, %v7573_v2  ;;  %9425 = vmatmul.mubr.msk.f32.gmra.mrb[222].mxu0 %vm5502_vm15, %v7641_v18  ;;  %v7667_v2 = vld [vmem:[%s13932_s9 + $0x1e0] sm:$0xff] }
 0x9cb   : > { %9253 = vmatprep.mubr.msk.f32.mxu1 %vm10687_vm0, %v10688_v22  ;;  %9427 = vmatprep.mubr.msk.f32.mxu0 %vm10687_vm0, %v10688_v22 }
 0x9ce   : > { %9254 = vmatmul.mubr.msk.f32.gmra.mrb[22].mxu1 %vm5502_vm15, %v7574_v19  ;;  %9428 = vmatmul.mubr.msk.f32.gmra.mrb[224].mxu0 %vm5502_vm15, %v7642_v28  ;;  %v7668_v19 = vld [vmem:[%s13932_s9 + $0x1e8] sm:$0xff] }
 0x9cf   : > { %9256 = vmatprep.mubr.msk.f32.mxu1 %vm10687_vm0, %v10688_v22  ;;  %9430 = vmatprep.mubr.msk.f32.mxu0 %vm10687_vm0, %v10688_v22 }
 0x9d2   : > { %9257 = vmatmul.mubr.msk.f32.gmra.mrb[24].mxu1 %vm5502_vm15, %v7575_v29  ;;  %9431 = vmatmul.mubr.msk.f32.gmra.mrb[226].mxu0 %vm5502_vm15, %v7643_v49  ;;  %v7669_v49 = vld [vmem:[%s13932_s9 + $0x1f0] sm:$0xff] }
 0x9d3   : > { %9259 = vmatprep.mubr.msk.f32.mxu1 %vm10687_vm0, %v10688_v22  ;;  %9433 = vmatprep.mubr.msk.f32.mxu0 %vm10687_vm0, %v10688_v22 }
 0x9d6   : > { %9260 = vmatmul.mubr.msk.f32.gmra.mrb[26].mxu1 %vm5502_vm15, %v7576_v48  ;;  %9434 = vmatmul.mubr.msk.f32.gmra.mrb[228].mxu0 %vm5502_vm15, %v7644_v41  ;;  %v7670_v41 = vld [vmem:[%s13932_s9 + $0x1f8] sm:$0xff] }
 0x9d7   : > { %9347 = vmatprep.mubr.msk.f32.mxu1 %vm10687_vm0, %v10688_v22  ;;  %9436 = vmatprep.mubr.msk.f32.mxu0 %vm10687_vm0, %v10688_v22 }
 0x9da   : > { %9348 = vmatmul.mubr.msk.f32.vlgmr.msra.gmra.mrb[28].mxu1 %vm5502_vm15, %v7607_v26  ;;  %9437 = vmatmul.mubr.msk.f32.gmra.mrb[230].mxu0 %vm5502_vm15, %v7645_v5 }
 0x9db   : > { %10008 = vmatpush3.bf16.msra.mxu1 %v10007_v57  ;;  %9350 = vmatprep.mubr.msk.f32.mxu1 %vm10687_vm0, %v10688_v22  ;;  %v7672_v57 = vld [vmem:[%s13932_s9 + $0x208] sm:$0xff] }
 0x9dc   : > { %10009 = vmatprep.subr.bf16.mxu1 %v10685_v0  ;;  %9439 = vmatprep.mubr.msk.f32.mxu0 %vm10687_vm0, %v10688_v22 }
 0x9de   : > { %9351 = vmatmul.mubr.msk.f32.gmra.mrb[30].mxu1 %vm5502_vm15, %v7608_v59  ;;  %9440 = vmatmul.mubr.msk.f32.gmra.mrb[232].mxu0 %vm5502_vm15, %v7646_v12  ;;  %v7673_v59 = vld [vmem:[%s13932_s9 + $0x210] sm:$0xff] }
 0x9df   : > { %10011 = vmatpush3.bf16.msra.mxu1 %v10010_v21  ;;  %9353 = vmatprep.mubr.msk.f32.mxu1 %vm10687_vm0, %v10688_v22  ;;  %v7674_v21 = vld [vmem:[%s13932_s9 + $0x218] sm:$0xff] }
 0x9e0   : > { %10012 = vmatprep.subr.bf16.mxu1 %v10685_v0  ;;  %9442 = vmatprep.mubr.msk.f32.mxu0 %vm10687_vm0, %v10688_v22 }
 0x9e2   : > { %9354 = vmatmul.mubr.msk.f32.gmra.mrb[32].mxu1 %vm5502_vm15, %v7609_v17  ;;  %9443 = vmatmul.mubr.msk.f32.gmra.mrb[234].mxu0 %vm5502_vm15, %v7647_v1  ;;  %v7675_v17 = vld [vmem:[%s13932_s9 + $0x220] sm:$0xff] }
 0x9e3   : > { %10014 = vmatpush3.bf16.msra.mxu1 %v10013_v25  ;;  %9356 = vmatprep.mubr.msk.f32.mxu1 %vm10687_vm0, %v10688_v22 }
 0x9e4   : > { %10015 = vmatprep.subr.bf16.mxu1 %v10685_v0  ;;  %9445 = vmatprep.mubr.msk.f32.mxu0 %vm10687_vm0, %v10688_v22 }
 0x9e6   : > { %9357 = vmatmul.mubr.msk.f32.gmra.mrb[34].mxu1 %vm5502_vm15, %v7610_v36  ;;  %9446 = vmatmul.mubr.msk.f32.gmra.mrb[236].mxu0 %vm5502_vm15, %v7648_v45  ;;  %v7679_v36 = vld [vmem:[%s13932_s9 + $0x240] sm:$0xff]  ;;  %v7680_v45 = vld [vmem:[%s13932_s9 + $0x248] sm:$0xff] }
 0x9e7   : > { %10017 = vmatpush3.bf16.msra.mxu1 %v10016_v44  ;;  %9359 = vmatprep.mubr.msk.f32.mxu1 %vm10687_vm0, %v10688_v22  ;;  %v7681_v44 = vld [vmem:[%s13932_s9 + $0x250] sm:$0xff] }
 0x9e8   : > { %10018 = vmatprep.subr.bf16.mxu1 %v10685_v0  ;;  %9448 = vmatprep.mubr.msk.f32.mxu0 %vm10687_vm0, %v10688_v22 }
 0x9ea   : > { %9360 = vmatmul.mubr.msk.f32.gmra.mrb[36].mxu1 %vm5502_vm15, %v7611_v43  ;;  %9449 = vmatmul.mubr.msk.f32.gmra.mrb[238].mxu0 %vm5502_vm15, %v7649_v55 }
 0x9eb   : > { %10020 = vmatpush3.bf16.msra.mxu1 %v10019_v38  ;;  %9362 = vmatprep.mubr.msk.f32.mxu1 %vm10687_vm0, %v10688_v22 }
 0x9ec   : > { %9451 = vmatprep.mubr.msk.f32.mxu0 %vm10687_vm0, %v10688_v22 }
 0x9ee   : > { %9363 = vmatmul.mubr.msk.f32.gmra.mrb[38].mxu1 %vm5502_vm15, %v7612_v7  ;;  %9452 = vmatmul.mubr.msk.f32.gmra.mrb[240].mxu0 %vm5502_vm15, %v7650_v54 }
 0x9ef   : > { %9365 = vmatprep.mubr.msk.f32.mxu1 %vm10687_vm0, %v10688_v22  ;;  %9454 = vmatprep.mubr.msk.f32.mxu0 %vm10687_vm0, %v10688_v22 }
 0x9f2   : > { %9366 = vmatmul.mubr.msk.f32.gmra.mrb[40].mxu1 %vm5502_vm15, %v7613_v35  ;;  %9455 = vmatmul.mubr.msk.f32.gmra.mrb[242].mxu0 %vm5502_vm15, %v7651_v9 }
 0x9f3   : > { %9368 = vmatprep.mubr.msk.f32.mxu1 %vm10687_vm0, %v10688_v22  ;;  %9552 = vmatprep.mubr.msk.f32.mxu0 %vm10687_vm0, %v10688_v22 }
 0x9f6   : > { %9369 = vmatmul.mubr.msk.f32.gmra.mrb[42].mxu1 %vm5502_vm15, %v7614_v31 }
 0x9f7   : > { %9371 = vmatprep.mubr.msk.f32.mxu1 %vm10687_vm0, %v10688_v22 }
 0x9fa   : > { %9372 = vmatmul.mubr.msk.f32.gmra.mrb[44].mxu1 %vm5502_vm15, %v7615_v42 }
 0x9fb   : > { %9374 = vmatprep.mubr.msk.f32.mxu1 %vm10687_vm0, %v10688_v22 }
 0x9fc   : > { %v13520_v47 = vpop.f32.mrb[184].mxu0 }
 0x9fd   : > { %v9284_v39 = vpop.f32.mrb[185].mxu0 }
 0x9fe   : > { %9375 = vmatmul.mubr.msk.f32.gmra.mrb[46].mxu1 %vm5502_vm15, %v7616_v33 }
 0x9ff   : > { %9377 = vmatprep.mubr.msk.f32.mxu1 %vm10687_vm0, %v10688_v22 }
 0xa00   : > { %v13528_v27 = vpop.f32.mrb[186].mxu0 }
 0xa01   : > { %v9287_v6 = vpop.f32.mrb[187].mxu0 }
 0xa02   : > { %9378 = vmatmul.mubr.msk.f32.gmra.mrb[48].mxu1 %vm5502_vm15, %v7617_v51 }
 0xa03   : > { %9380 = vmatprep.mubr.msk.f32.mxu1 %vm10687_vm0, %v10688_v22 }
 0xa04   : > { %v13536_v50 = vpop.f32.mrb[188].mxu0 }
 0xa05   : > { %v9290_v63 = vpop.f32.mrb[189].mxu0 }
 0xa06   : > { %9381 = vmatmul.mubr.msk.f32.gmra.mrb[50].mxu1 %vm5502_vm15, %v7618_v53 }
 0xa07   : > { %9383 = vmatprep.mubr.msk.f32.mxu1 %vm10687_vm0, %v10688_v22 }
 0xa08   : > { %v13544_v58 = vpop.f32.mrb[190].mxu0 }
 0xa09   : > { %v9293_v10 = vpop.f32.mrb[191].mxu0 }
 0xa0a   : > { %9384 = vmatmul.mubr.msk.f32.gmra.mrb[52].mxu1 %vm5502_vm15, %v7619_v56 }
 0xa0b   : > { %9386 = vmatprep.mubr.msk.f32.mxu1 %vm10687_vm0, %v10688_v22 }
 0xa0c   : > { %v13552_v14 = vpop.f32.mrb[192].mxu0 }
 0xa0d   : > { %v9296_v46 = vpop.f32.mrb[193].mxu0 }
 0xa0e   : > { %9387 = vmatmul.mubr.msk.f32.gmra.mrb[54].mxu1 %vm5502_vm15, %v7620_v15 }
 0xa0f   : > { %9389 = vmatprep.mubr.msk.f32.mxu1 %vm10687_vm0, %v10688_v22 }
 0xa10   : > { %v13560_v16 = vpop.f32.mrb[194].mxu0 }
 0xa11   : > { %v9299_v23 = vpop.f32.mrb[195].mxu0 }
 0xa12   : > { %9390 = vmatmul.mubr.msk.f32.gmra.mrb[56].mxu1 %vm5502_vm15, %v7621_v34 }
 0xa13   : > { %9477 = vmatprep.mubr.msk.f32.mxu1 %vm10687_vm0, %v10688_v22 }
 0xa14   : > { %v13568_v18 = vpop.f32.mrb[196].mxu0 }
 0xa15   : > { %v9302_v20 = vpop.f32.mrb[197].mxu0 }
 0xa16   : > { %9478 = vmatmul.mubr.msk.f32.vlgmr.msra.gmra.mrb[58].mxu1 %vm5502_vm15, %v7667_v2 }
 0xa17   : > { %9480 = vmatprep.mubr.msk.f32.mxu1 %vm10687_vm0, %v10688_v22 }
 0xa18   : > { %v13576_v28 = vpop.f32.mrb[198].mxu0 }
 0xa19   : > { %v9305_v29 = vpop.f32.mrb[199].mxu0 }
 0xa1a   : > { %9481 = vmatmul.mubr.msk.f32.gmra.mrb[60].mxu1 %vm5502_vm15, %v7668_v19 }
 0xa1b   : > { %9483 = vmatprep.mubr.msk.f32.mxu1 %vm10687_vm0, %v10688_v22 }
 0xa1c   : > { %v13584_v11 = vpop.f32.mrb[200].mxu0 }
 0xa1d   : > { %v9308_v48 = vpop.f32.mrb[201].mxu0 }
 0xa1e   : > { %9484 = vmatmul.mubr.msk.f32.gmra.mrb[62].mxu1 %vm5502_vm15, %v7669_v49 }
 0xa1f   : > { %9486 = vmatprep.mubr.msk.f32.mxu1 %vm10687_vm0, %v10688_v22 }
 0xa20   : > { %v13592_v37 = vpop.f32.mrb[202].mxu0 }
 0xa21   : > { %v9311_v13 = vpop.f32.mrb[203].mxu0 }
 0xa22   : > { %9487 = vmatmul.mubr.msk.f32.gmra.mrb[64].mxu1 %vm5502_vm15, %v7670_v41 }
 0xa23   : > { %9489 = vmatprep.mubr.msk.f32.mxu1 %vm10687_vm0, %v10688_v22 }
 0xa24   : > { %v13600_v26 = vpop.f32.mrb[204].mxu0 }
 0xa25   : > { %v9314_v5 = vpop.f32.mrb[205].mxu0 }
 0xa26   : > { %9490 = vmatmul.mubr.msk.f32.gmra.mrb[66].mxu1 %vm5502_vm15, %v7671_v52 }
 0xa27   : > { %9492 = vmatprep.mubr.msk.f32.mxu1 %vm10687_vm0, %v10688_v22 }
 0xa28   : > { %v13608_v40 = vpop.f32.mrb[206].mxu0 }
 0xa29   : > { %v9317_v3 = vpop.f32.mrb[207].mxu0 }
 0xa2a   : > { %9493 = vmatmul.mubr.msk.f32.gmra.mrb[68].mxu1 %vm5502_vm15, %v7672_v57 }
 0xa2b   : > { %9495 = vmatprep.mubr.msk.f32.mxu1 %vm10687_vm0, %v10688_v22 }
 0xa2c   : > { %v13616_v12 = vpop.f32.mrb[208].mxu0 }
 0xa2d   : > { %v9320_v30 = vpop.f32.mrb[209].mxu0 }
 0xa2e   : > { %9496 = vmatmul.mubr.msk.f32.gmra.mrb[70].mxu1 %vm5502_vm15, %v7673_v59 }
 0xa2f   : > { %9498 = vmatprep.mubr.msk.f32.mxu1 %vm10687_vm0, %v10688_v22 }
 0xa30   : > { %v13624_v60 = vpop.f32.mrb[210].mxu0 }
 0xa31   : > { %v9323_v62 = vpop.f32.mrb[211].mxu0 }
 0xa32   : > { %9499 = vmatmul.mubr.msk.f32.gmra.mrb[72].mxu1 %vm5502_vm15, %v7674_v21 }
 0xa33   : > { %9501 = vmatprep.mubr.msk.f32.mxu1 %vm10687_vm0, %v10688_v22 }
 0xa34   : > { %v13632_v1 = vpop.f32.mrb[212].mxu0 }
 0xa35   : > { %v9326_v25 = vpop.f32.mrb[213].mxu0 }
 0xa36   : > { %9502 = vmatmul.mubr.msk.f32.gmra.mrb[74].mxu1 %vm5502_vm15, %v7675_v17 }
 0xa37   : > { %9504 = vmatprep.mubr.msk.f32.mxu1 %vm10687_vm0, %v10688_v22 }
 0xa3a   : > { %9505 = vmatmul.mubr.msk.f32.gmra.mrb[76].mxu1 %vm5502_vm15, %v7676_v24 }
 0xa3b   : > { %9507 = vmatprep.mubr.msk.f32.mxu1 %vm10687_vm0, %v10688_v22 }
 0xa3e   : > { %9508 = vmatmul.mubr.msk.f32.gmra.mrb[78].mxu1 %vm5502_vm15, %v7677_v8 }
 0xa3f   : > { %9510 = vmatprep.mubr.msk.f32.mxu1 %vm10687_vm0, %v10688_v22 }
 0xa42   : > { %9511 = vmatmul.mubr.msk.f32.gmra.mrb[80].mxu1 %vm5502_vm15, %v7678_v32 }
 0xa43   : > { %9513 = vmatprep.mubr.msk.f32.mxu1 %vm10687_vm0, %v10688_v22 }
 0xa46   : > { %9514 = vmatmul.mubr.msk.f32.gmra.mrb[82].mxu1 %vm5502_vm15, %v7679_v36 }
 0xa47   : > { %9516 = vmatprep.mubr.msk.f32.mxu1 %vm10687_vm0, %v10688_v22 }
 0xa4a   : > { %9517 = vmatmul.mubr.msk.f32.gmra.mrb[84].mxu1 %vm5502_vm15, %v7680_v45 }
 0xa4b   : > { %9519 = vmatprep.mubr.msk.f32.mxu1 %vm10687_vm0, %v10688_v22 }
 0xa4e   : > { %9520 = vmatmul.mubr.msk.f32.gmra.mrb[86].mxu1 %vm5502_vm15, %v7681_v44 }
 0xa71   : > { %v5614_v61 = vpop.f32.mrb[254].mxu1 }
 0xa72   : > { %v9219_v4 = vpop.f32.mrb[255].mxu1  ;;  %v5800_v43 = vadd.f32 %v13520_v47, %v5614_v61 }
 0xa75   : > { %v5619_v55 = vpop.f32.mrb[0].mxu1 }
 0xa76   : > { %v9222_v38 = vpop.f32.mrb[1].mxu1  ;;  %v13673_v7 = vadd.f32 %v13528_v27, %v5619_v55 }
 0xa79   : > { %v5624_v54 = vpop.f32.mrb[2].mxu1 }
 0xa7a   : > { %v9225_v35 = vpop.f32.mrb[3].mxu1  ;;  %v13676_v9 = vadd.f32 %v13536_v50, %v5624_v54 }
 0xa7d   : > { %v5629_v31 = vpop.f32.mrb[4].mxu1 }
 0xa7e   : > { %v9228_v42 = vpop.f32.mrb[5].mxu1  ;;  %v13679_v33 = vadd.f32 %v13544_v58, %v5629_v31 }
 0xa81   : > { %v5634_v39 = vpop.f32.mrb[6].mxu1 }
 0xa82   : > { %v9231_v51 = vpop.f32.mrb[7].mxu1  ;;  %v13682_v6 = vadd.f32 %v13552_v14, %v5634_v39 }
 0xa85   : > { %v5639_v47 = vpop.f32.mrb[8].mxu1 }
 0xa86   : > { %v9234_v53 = vpop.f32.mrb[9].mxu1  ;;  %v13685_v27 = vadd.f32 %v13560_v16, %v5639_v47 }
 0xa89   : > { %v5644_v63 = vpop.f32.mrb[10].mxu1 }
 0xa8a   : > { %v9237_v56 = vpop.f32.mrb[11].mxu1  ;;  %v13688_v50 = vadd.f32 %v13568_v18, %v5644_v63 }
 0xa8d   : > { %v5649_v10 = vpop.f32.mrb[12].mxu1  ;;  %v6276_v15 = vpop.f32.mrb[214].mxu0 }
 0xa8e   : > { %v9240_v46 = vpop.f32.mrb[13].mxu1  ;;  %v13691_v58 = vadd.f32 %v13576_v28, %v5649_v10  ;;  %v9414_v34 = vpop.f32.mrb[215].mxu0 }
 0xa91   : > { %v5654_v23 = vpop.f32.mrb[14].mxu1  ;;  %v6281_v14 = vpop.f32.mrb[216].mxu0 }
 0xa92   : > { %v9243_v2 = vpop.f32.mrb[15].mxu1  ;;  %v13694_v20 = vadd.f32 %v13584_v11, %v5654_v23  ;;  %v9417_v16 = vpop.f32.mrb[217].mxu0 }
 0xa95   : > { %v5659_v19 = vpop.f32.mrb[16].mxu1  ;;  %v6286_v29 = vpop.f32.mrb[218].mxu0 }
 0xa96   : > { %v9246_v49 = vpop.f32.mrb[17].mxu1  ;;  %v13697_v18 = vadd.f32 %v13592_v37, %v5659_v19  ;;  %v9420_v48 = vpop.f32.mrb[219].mxu0 }
 0xa99   : > { %v5664_v41 = vpop.f32.mrb[18].mxu1  ;;  %v6291_v13 = vpop.f32.mrb[220].mxu0 }
 0xa9a   : > { %v9249_v52 = vpop.f32.mrb[19].mxu1  ;;  %v13700_v28 = vadd.f32 %v13600_v26, %v5664_v41  ;;  %v9423_v5 = vpop.f32.mrb[221].mxu0 }
 0xa9d   : > { %v5669_v57 = vpop.f32.mrb[20].mxu1  ;;  %v6296_v3 = vpop.f32.mrb[222].mxu0 }
 0xa9e   : > { %v9252_v59 = vpop.f32.mrb[21].mxu1  ;;  %v13703_v11 = vadd.f32 %v13608_v40, %v5669_v57  ;;  %v9426_v30 = vpop.f32.mrb[223].mxu0 }
 0xaa1   : > { %v5674_v21 = vpop.f32.mrb[22].mxu1  ;;  %v6301_v62 = vpop.f32.mrb[224].mxu0 }
 0xaa2   : > { %v9255_v17 = vpop.f32.mrb[23].mxu1  ;;  %v13706_v37 = vadd.f32 %v13616_v12, %v5674_v21  ;;  %v9429_v25 = vpop.f32.mrb[225].mxu0 }
 0xaa5   : > { %v5679_v24 = vpop.f32.mrb[24].mxu1  ;;  %v6306_v8 = vpop.f32.mrb[226].mxu0 }
 0xaa6   : > { %v9258_v32 = vpop.f32.mrb[25].mxu1  ;;  %v13709_v26 = vadd.f32 %v13624_v60, %v5679_v24  ;;  %v9432_v36 = vpop.f32.mrb[227].mxu0 }
 0xaa9   : > { %v5684_v45 = vpop.f32.mrb[26].mxu1  ;;  %v6311_v44 = vpop.f32.mrb[228].mxu0 }
 0xaaa   : > { %v9261_v61 = vpop.f32.mrb[27].mxu1  ;;  %v13712_v40 = vadd.f32 %v13632_v1, %v5684_v45  ;;  %v9435_v4 = vpop.f32.mrb[229].mxu0 }
 0xaad   : > { %v6030_v55 = vpop.f32.mrb[28].mxu1  ;;  %v6316_v38 = vpop.f32.mrb[230].mxu0 }
 0xaae   : > { %v6104_v54 = vadd.f32 %v6030_v55, %v5800_v43  ;;  %v9349_v12 = vpop.f32.mrb[29].mxu1  ;;  %v9438_v35 = vpop.f32.mrb[231].mxu0 }
 0xab0   : > { %v13714_v31 = vadd.f32 %v6276_v15, %v6104_v54 }
 0xab1   : > { %v6035_v42 = vpop.f32.mrb[30].mxu1  ;;  %v6321_v39 = vpop.f32.mrb[232].mxu0 }
 0xab2   : > { %v6105_v60 = vadd.f32 %v6035_v42, %v13673_v7  ;;  %v9352_v51 = vpop.f32.mrb[31].mxu1  ;;  %v9441_v47 = vpop.f32.mrb[233].mxu0 }
 0xab4   : > { %v13717_v53 = vadd.f32 %v6281_v14, %v6105_v60 }
 0xab5   : > { %v6040_v63 = vpop.f32.mrb[32].mxu1  ;;  %v6326_v56 = vpop.f32.mrb[234].mxu0 }
 0xab6   : > { %v6106_v1 = vadd.f32 %v6040_v63, %v13676_v9  ;;  %v9355_v10 = vpop.f32.mrb[33].mxu1  ;;  %v9444_v46 = vpop.f32.mrb[235].mxu0 }
 0xab8   : > { %v13720_v34 = vadd.f32 %v6286_v29, %v6106_v1 }
 0xab9   : > { %v6045_v43 = vpop.f32.mrb[34].mxu1  ;;  %v6331_v23 = vpop.f32.mrb[236].mxu0 }
 0xaba   : > { %v6107_v15 = vadd.f32 %v6045_v43, %v13679_v33  ;;  %v9358_v2 = vpop.f32.mrb[35].mxu1  ;;  %v9447_v16 = vpop.f32.mrb[237].mxu0 }
 0xabc   : > { %v13723_v19 = vadd.f32 %v6291_v13, %v6107_v15 }
 0xabd   : > { %v6050_v7 = vpop.f32.mrb[36].mxu1  ;;  %v6336_v49 = vpop.f32.mrb[238].mxu0 }
 0xabe   : > { %v6108_v14 = vadd.f32 %v6050_v7, %v13682_v6  ;;  %v9361_v48 = vpop.f32.mrb[37].mxu1  ;;  %v9450_v41 = vpop.f32.mrb[239].mxu0 }
 0xac0   : > { %v13726_v52 = vadd.f32 %v6296_v3, %v6108_v14 }
 0xac1   : > { %v6055_v9 = vpop.f32.mrb[38].mxu1  ;;  %v6341_v5 = vpop.f32.mrb[240].mxu0 }
 0xac2   : > { %v6109_v29 = vadd.f32 %v6055_v9, %v13685_v27  ;;  %v9364_v57 = vpop.f32.mrb[39].mxu1  ;;  %v9453_v59 = vpop.f32.mrb[241].mxu0 }
 0xac3   : > { %v6614_v59 = vld [vmem:[%s13966_s14 + $0x18] sm:$0xff] }
 0xac4   : > { %v13729_v30 = vadd.f32 %v6301_v62, %v6109_v29 }
 0xac5   : > { %v6060_v33 = vpop.f32.mrb[40].mxu1  ;;  %v6346_v21 = vpop.f32.mrb[242].mxu0 }
 0xac6   : > { %v6110_v13 = vadd.f32 %v6060_v33, %v13688_v50  ;;  %v9367_v17 = vpop.f32.mrb[41].mxu1  ;;  %v9456_v25 = vpop.f32.mrb[243].mxu0 }
 0xac8   : > { %v13732_v24 = vadd.f32 %v6306_v8, %v6110_v13 }
 0xac9   : > { %v6065_v6 = vpop.f32.mrb[42].mxu1 }
 0xaca   : > { %v6111_v3 = vadd.f32 %v6065_v6, %v13691_v58  ;;  %v9370_v32 = vpop.f32.mrb[43].mxu1 }
 0xacb   : > { %v6615_v32 = vld [vmem:[%s13966_s14 + $0x20] sm:$0xff] }
 0xacc   : > { %v13735_v36 = vadd.f32 %v6311_v44, %v6111_v3 }
 0xacd   : > { %v6070_v45 = vpop.f32.mrb[44].mxu1 }
 0xace   : > { %v6112_v27 = vadd.f32 %v6070_v45, %v13694_v20  ;;  %v9373_v61 = vpop.f32.mrb[45].mxu1 }
 0xad0   : > { %v13738_v62 = vadd.f32 %v6316_v38, %v6112_v27 }
 0xad1   : > { %v6075_v4 = vpop.f32.mrb[46].mxu1 }
 0xad2   : > { %v6113_v55 = vadd.f32 %v6075_v4, %v13697_v18  ;;  %v9376_v50 = vpop.f32.mrb[47].mxu1 }
 0xad4   : > { %v13741_v54 = vadd.f32 %v6321_v39, %v6113_v55 }
 0xad5   : > { %v6080_v8 = vpop.f32.mrb[48].mxu1 }
 0xad6   : > { %v6114_v12 = vadd.f32 %v6080_v8, %v13700_v28  ;;  %v9379_v35 = vpop.f32.mrb[49].mxu1 }
 0xad8   : > { %v13744_v58 = vadd.f32 %v6326_v56, %v6114_v12 }
 0xad9   : > { %v6085_v44 = vpop.f32.mrb[50].mxu1 }
 0xada   : > { %v6115_v42 = vadd.f32 %v6085_v44, %v13703_v11  ;;  %v9382_v60 = vpop.f32.mrb[51].mxu1 }
 0xadc   : > { %v13747_v20 = vadd.f32 %v6331_v23, %v6115_v42  ;;  %v6617_v42 = vld [vmem:[%s13966_s14 + $0x30] sm:$0xff] }
 0xadd   : > { %v6090_v38 = vpop.f32.mrb[52].mxu1 }
 0xade   : > { %v6116_v51 = vadd.f32 %v6090_v38, %v13706_v37  ;;  %v9385_v47 = vpop.f32.mrb[53].mxu1  ;;  %v6611_v37 = vld [vmem:[%s13965_s21] sm:$0xff]  ;;  %s543_s21 = scalar_lea.vmem %s13970_s13, %s7713_s10 }
 0xae0   : > { %v13750_v18 = vadd.f32 %v6336_v49, %v6116_v51 }
 0xae1   : > { %v6095_v39 = vpop.f32.mrb[54].mxu1 }
 0xae2   : > { %v6117_v63 = vadd.f32 %v6095_v39, %v13709_v26  ;;  %v9388_v1 = vpop.f32.mrb[55].mxu1  ;;  %v6612_v26 = vld [vmem:[%s13966_s14 + $0x8] sm:$0xff] }
 0xae4   : > { %v13753_v28 = vadd.f32 %v6341_v5, %v6117_v63  ;;  %v6613_v5 = vld [vmem:[%s13966_s14 + $0x10] sm:$0xff] }
 0xae5   : > { %v6100_v56 = vpop.f32.mrb[56].mxu1 }
 0xae6   : > { %v6118_v10 = vadd.f32 %v6100_v56, %v13712_v40  ;;  %v9391_v46 = vpop.f32.mrb[57].mxu1 }
 0xae8   : > { %v13756_v11 = vadd.f32 %v6346_v21, %v6118_v10 }
 0xae9   : > { %v6522_v43 = vpop.f32.mrb[58].mxu1 }
 0xaea   : > { %v6596_v23 = vadd.f32 %v6522_v43, %v13714_v31  ;;  %v9479_v15 = vpop.f32.mrb[59].mxu1  ;;  %v6619_v43 = vld [vmem:[%s13966_s14 + $0x40] sm:$0xff] }
 0xaec   : > { %v6626_v16 = vadd.f32 %v6611_v37, %v6596_v23 }
 0xaed   : > { %v6527_v2 = vpop.f32.mrb[60].mxu1 }
 0xaee   : > { %v6597_v7 = vadd.f32 %v6527_v2, %v13717_v53  ;;  %v9482_v40 = vpop.f32.mrb[61].mxu1  ;;  %v6641_v48 = vmax.f32 %v6626_v16, 0.0 }
 0xaf0   : > { %v6627_v49 = vadd.f32 %v6612_v26, %v6597_v7 }
 0xaf1   : > { %v6532_v14 = vpop.f32.mrb[62].mxu1 }
 0xaf2   : > { %v6642_v41 = vmax.f32 %v6627_v49, 0.0  ;;  %v6598_v31 = vadd.f32 %v6532_v14, %v13720_v34  ;;  %v9485_v9 = vpop.f32.mrb[63].mxu1 }
 0xaf4   : > { %v10022_v29 = vpack.c.bf16 %v6642_v41, %v6641_v48  ;;  %v6628_v33 = vadd.f32 %v6613_v5, %v6598_v31  ;;  %v6621_v48 = vld [vmem:[%s13966_s14 + $0x50] sm:$0xff] }
 0xaf5   : > { %v6537_v57 = vpop.f32.mrb[64].mxu1 }
 0xaf6   : > { %v6599_v53 = vadd.f32 %v6537_v57, %v13723_v19  ;;  %10023 = vmatpush3.bf16.msra.mxu0 %v10022_v29  ;;  %v9488_v21 = vpop.f32.mrb[65].mxu1  ;;  %v6643_v17 = vmax.f32 %v6628_v33, 0.0  ;;  %v6616_v19 = vld [vmem:[%s13966_s14 + $0x28] sm:$0xff] }
 0xaf7   : > { %10024 = vmatprep.subr.bf16.mxu0 %v10685_v0 }
 0xaf8   : > { %v6629_v13 = vadd.f32 %v6614_v59, %v6599_v53 }
 0xaf9   : > { %v6542_v34 = vpop.f32.mrb[66].mxu1 }
 0xafa   : > { %v6644_v25 = vmax.f32 %v6629_v13, 0.0  ;;  %v6600_v6 = vadd.f32 %v6542_v34, %v13726_v52  ;;  %v9491_v3 = vpop.f32.mrb[67].mxu1  ;;  %v6623_v13 = vld [vmem:[%s13966_s14 + $0x60] sm:$0xff] }
 0xafc   : > { %v10025_v45 = vpack.c.bf16 %v6644_v25, %v6643_v17  ;;  %v6630_v61 = vadd.f32 %v6615_v32, %v6600_v6 }
 0xafd   : > { %v6547_v27 = vpop.f32.mrb[68].mxu1 }
 0xafe   : > { %v6601_v4 = vadd.f32 %v6547_v27, %v13729_v30  ;;  %10026 = vmatpush3.bf16.msra.mxu0 %v10025_v45  ;;  %v9494_v55 = vpop.f32.mrb[69].mxu1  ;;  %v6645_v8 = vmax.f32 %v6630_v61, 0.0  ;;  %v6618_v30 = vld [vmem:[%s13966_s14 + $0x38] sm:$0xff]  ;;  %v6625_v45 = vld [vmem:[%s13966_s14 + $0x70] sm:$0xff] }
 0xaff   : > { %10027 = vmatprep.subr.bf16.mxu0 %v10685_v0 }
 0xb00   : > { %v6631_v50 = vadd.f32 %v6616_v19, %v6601_v4 }
 0xb01   : > { %v6552_v52 = vpop.f32.mrb[70].mxu1 }
 0xb02   : > { %v6646_v12 = vmax.f32 %v6631_v50, 0.0  ;;  %v6602_v35 = vadd.f32 %v6552_v52, %v13732_v24  ;;  %v9497_v44 = vpop.f32.mrb[71].mxu1  ;;  %v6656_v52 = vld [vmem:[#allocation8] sm:$0xff] }
 0xb03   : > { %v6662_v44 = vld [vmem:[#allocation8 + $0x30] sm:$0xff] }
 0xb04   : > { %v10028_v60 = vpack.c.bf16 %v6646_v12, %v6645_v8  ;;  %v6632_v51 = vadd.f32 %v6617_v42, %v6602_v35  ;;  %v6659_v8 = vld [vmem:[#allocation8 + $0x18] sm:$0xff]  ;;  %v6660_v12 = vld [vmem:[#allocation8 + $0x20] sm:$0xff]  ;;  %v6661_v35 = vld [vmem:[#allocation8 + $0x28] sm:$0xff] }
 0xb05   : > { %v6557_v38 = vpop.f32.mrb[72].mxu1  ;;  %v6663_v42 = vld [vmem:[#allocation8 + $0x38] sm:$0xff] }
 0xb06   : > { %v6603_v47 = vadd.f32 %v6557_v38, %v13735_v36  ;;  %10029 = vmatpush3.bf16.msra.mxu0 %v10028_v60  ;;  %v9500_v39 = vpop.f32.mrb[73].mxu1  ;;  %v6647_v1 = vmax.f32 %v6632_v51, 0.0  ;;  %v6620_v36 = vld [vmem:[%s13966_s14 + $0x48] sm:$0xff]  ;;  %v6665_v38 = vld [vmem:[#allocation8 + $0x48] sm:$0xff]  ;;  %v6843_v51 = vld [vmem:[%s13967_s24] sm:$0xff] }
 0xb07   : > { %10030 = vmatprep.subr.bf16.mxu0 %v10685_v0  ;;  %v6664_v60 = vld [vmem:[#allocation8 + $0x40] sm:$0xff]  ;;  %9607 = vmatprep.mubr.msk.f32.mxu1 %vm3130_vm9, %v6843_v51 }
 0xb08   : > { %v6633_v63 = vadd.f32 %v6618_v30, %v6603_v47  ;;  %v6666_v30 = vld [vmem:[#allocation8 + $0x50] sm:$0xf]  ;;  %v6667_v47 = vld [vmem:[%s13968_s15] sm:$0xff] }
 0xb09   : > { %v6562_v24 = vpop.f32.mrb[74].mxu1 }
 0xb0a   : > { %v6648_v56 = vmax.f32 %v6633_v63, 0.0  ;;  %v6604_v10 = vadd.f32 %v6562_v24, %v13738_v62  ;;  %v9503_v46 = vpop.f32.mrb[75].mxu1  ;;  %v6668_v24 = vld [vmem:[%s13968_s15 + $0x8] sm:$0xff] }
 0xb0c   : > { %v10031_v23 = vpack.c.bf16 %v6648_v56, %v6647_v1  ;;  %v6634_v37 = vadd.f32 %v6619_v43, %v6604_v10 }
 0xb0d   : > { %v6567_v15 = vpop.f32.mrb[76].mxu1 }
 0xb0e   : > { %v6605_v2 = vadd.f32 %v6567_v15, %v13741_v54  ;;  %10032 = vmatpush3.bf16.msra.mxu0 %v10031_v23  ;;  %v9506_v26 = vpop.f32.mrb[77].mxu1  ;;  %v6649_v7 = vmax.f32 %v6634_v37, 0.0  ;;  %v6622_v54 = vld [vmem:[%s13966_s14 + $0x58] sm:$0xff]  ;;  %v6669_v23 = vld [vmem:[%s13968_s15 + $0x10] sm:$0xff] }
 0xb0f   : > { %10033 = vmatprep.subr.bf16.mxu0 %v10685_v0 }
 0xb10   : > { %v6635_v16 = vadd.f32 %v6620_v36, %v6605_v2  ;;  %v6670_v2 = vld [vmem:[%s13968_s15 + $0x18] sm:$0xff] }
 0xb11   : > { %v6572_v62 = vpop.f32.mrb[78].mxu1 }
 0xb12   : > { %v6650_v40 = vmax.f32 %v6635_v16, 0.0  ;;  %v6606_v49 = vadd.f32 %v6572_v62, %v13744_v58  ;;  %v9509_v14 = vpop.f32.mrb[79].mxu1 }
 0xb13   : > { %v6671_v14 = vld [vmem:[%s13968_s15 + $0x20] sm:$0xff] }
 0xb14   : > { %v10034_v41 = vpack.c.bf16 %v6650_v40, %v6649_v7  ;;  %v6636_v9 = vadd.f32 %v6621_v48, %v6606_v49 }
 0xb15   : > { %v6577_v31 = vpop.f32.mrb[80].mxu1 }
 0xb16   : > { %v6607_v5 = vadd.f32 %v6577_v31, %v13747_v20  ;;  %10035 = vmatpush3.bf16.msra.mxu0 %v10034_v41  ;;  %v9512_v29 = vpop.f32.mrb[81].mxu1  ;;  %v6651_v59 = vmax.f32 %v6636_v9, 0.0  ;;  %v6624_v20 = vld [vmem:[%s13966_s14 + $0x68] sm:$0xff] }
 0xb17   : > { %10036 = vmatprep.subr.bf16.mxu0 %v10685_v0 }
 0xb18   : > { %v6637_v57 = vadd.f32 %v6622_v54, %v6607_v5  ;;  %v6672_v54 = vld [vmem:[%s13968_s15 + $0x28] sm:$0xff] }
 0xb19   : > { %v6582_v58 = vpop.f32.mrb[82].mxu1 }
 0xb1a   : > { %v6652_v33 = vmax.f32 %v6637_v57, 0.0  ;;  %v6608_v53 = vadd.f32 %v6582_v58, %v13750_v18  ;;  %v9515_v21 = vpop.f32.mrb[83].mxu1 }
 0xb1c   : > { %v10037_v34 = vpack.c.bf16 %v6652_v33, %v6651_v59  ;;  %v6638_v25 = vadd.f32 %v6623_v13, %v6608_v53  ;;  %v6673_v33 = vld [vmem:[%s13968_s15 + $0x30] sm:$0xff] }
 0xb1d   : > { %v6587_v17 = vpop.f32.mrb[84].mxu1 }
 0xb1e   : > { %v6609_v6 = vadd.f32 %v6587_v17, %v13753_v28  ;;  %10038 = vmatpush3.bf16.msra.mxu0 %v10037_v34  ;;  %v9518_v3 = vpop.f32.mrb[85].mxu1  ;;  %v6653_v27 = vmax.f32 %v6638_v25, 0.0  ;;  %v6674_v34 = vld [vmem:[%s13968_s15 + $0x38] sm:$0xff] }
 0xb1f   : > { %10039 = vmatprep.subr.bf16.mxu0 %v10685_v0  ;;  %v6657_v0 = vld [vmem:[#allocation8 + $0x8] sm:$0xff] }
 0xb20   : > { %v6639_v32 = vadd.f32 %v6624_v20, %v6609_v6 }
 0xb21   : > { %v6592_v18 = vpop.f32.mrb[86].mxu1 }
 0xb22   : > { %v6654_v19 = vmax.f32 %v6639_v32, 0.0  ;;  %v6610_v61 = vadd.f32 %v6592_v18, %v13756_v11  ;;  %v9521_v4 = vpop.f32.mrb[87].mxu1  ;;  %v6658_v11 = vld [vmem:[#allocation8 + $0x10] sm:$0xff]  ;;  %v6675_v18 = vld [vmem:[%s13968_s15 + $0x40] sm:$0xff] }
 0xb24   : > { %v10040_v55 = vpack.c.bf16 %v6654_v19, %v6653_v27  ;;  %v6640_v50 = vadd.f32 %v6625_v45, %v6610_v61  ;;  %v6676_v61 = vld [vmem:[%s13968_s15 + $0x48] sm:$0xff] }
 0xb26   : > { %10041 = vmatpush3.bf16.msra.mxu0 %v10040_v55  ;;  %v6655_v28 = vmax.f32 %v6640_v50, 0.0 }
 0xb27   : > { %9550 = vmatprep.subr.mxu0 %v10688_v22 }
 0xb2a   : > { %9551 = vmatpush3.msra.mxu0 %v6655_v28 }
 0xb2b   : > { %9553 = vmatmul.mubr.msk.f32.vlgmr.msra.gmra.mrb[244].mxu0 %vm6678_vm1, %v6656_v52  ;;  %v6677_v52 = vld [vmem:[%s13968_s15 + $0x50] sm:$0xf] }
 0xb2c   : > { %9555 = vmatprep.mubr.msk.f32.mxu0 %vm10687_vm0, %v10688_v22 }
 0xb2f   : > { %9556 = vmatmul.mubr.msk.f32.gmra.mrb[246].mxu0 %vm6678_vm1, %v6657_v0 }
 0xb30   : > { %9558 = vmatprep.mubr.msk.f32.mxu0 %vm10687_vm0, %v10688_v22 }
 0xb33   : > { %9559 = vmatmul.mubr.msk.f32.gmra.mrb[248].mxu0 %vm6678_vm1, %v6658_v11 }
 0xb34   : > { %9561 = vmatprep.mubr.msk.f32.mxu0 %vm10687_vm0, %v10688_v22 }
 0xb37   : > { %9562 = vmatmul.mubr.msk.f32.gmra.mrb[250].mxu0 %vm6678_vm1, %v6659_v8 }
 0xb38   : > { %9564 = vmatprep.mubr.msk.f32.mxu0 %vm10687_vm0, %v10688_v22 }
 0xb3b   : > { %9565 = vmatmul.mubr.msk.f32.gmra.mrb[252].mxu0 %vm6678_vm1, %v6660_v12 }
 0xb3c   : > { %9567 = vmatprep.mubr.msk.f32.mxu0 %vm10687_vm0, %v10688_v22 }
 0xb3f   : > { %9568 = vmatmul.mubr.msk.f32.gmra.mrb[254].mxu0 %vm6678_vm1, %v6661_v35 }
 0xb40   : > { %9570 = vmatprep.mubr.msk.f32.mxu0 %vm10687_vm0, %v10688_v22 }
 0xb43   : > { %9571 = vmatmul.mubr.msk.f32.gmra.mrb[0].mxu0 %vm6678_vm1, %v6662_v44 }
 0xb44   : > { %9573 = vmatprep.mubr.msk.f32.mxu0 %vm10687_vm0, %v10688_v22 }
 0xb47   : > { %9574 = vmatmul.mubr.msk.f32.gmra.mrb[2].mxu0 %vm6678_vm1, %v6663_v42 }
 0xb48   : > { %9576 = vmatprep.mubr.msk.f32.mxu0 %vm10687_vm0, %v10688_v22 }
 0xb4b   : > { %9577 = vmatmul.mubr.msk.f32.gmra.mrb[4].mxu0 %vm6678_vm1, %v6664_v60  ;;  %v6844_v60 = vld [vmem:[%s13967_s24 + $0x8] sm:$0x3] }
 0xb4c   : > { %9579 = vmatprep.mubr.msk.f32.mxu0 %vm10687_vm0, %v10688_v22 }
 0xb4f   : > { %9580 = vmatmul.mubr.msk.f32.gmra.mrb[6].mxu0 %vm6678_vm1, %v6665_v38  ;;  %v6846_v38 = vld [vmem:[%s13969_s29 + $0x8] sm:$0x3] }
 0xb50   : > { %9582 = vmatprep.mubr.msk.f32.mxu0 %vm10687_vm0, %v10688_v22  ;;  %vm6933_vm0 = vcmask 1024  }
 0xb53   : > { %9583 = vmatmul.mubr.msk.f32.gmra.mrb[8].mxu0 %vm6678_vm1, %v6666_v30  ;;  %v6845_v30 = vld [vmem:[%s13969_s29] sm:$0xff] }
 0xbfe   : > { %v6778_v39 = vpop.f32.mrb[244].mxu0 }
 0xbff   : > { %v9554_v63 = vpop.f32.mrb[245].mxu0  ;;  %v6779_v22 = vadd.f32 %v6778_v39, %v6667_v47 }
 0xc01   : > { %v6832_v46 = vmax.f32 %v6779_v22, 0.0 }
 0xc02   : > { %v6783_v1 = vpop.f32.mrb[246].mxu0 }
 0xc03   : > { %v6784_v56 = vadd.f32 %v6783_v1, %v6668_v24  ;;  %v9557_v10 = vpop.f32.mrb[247].mxu0 }
 0xc05   : > { %v6833_v43 = vmax.f32 %v6784_v56, 0.0 }
 0xc06   : > { %v6788_v15 = vpop.f32.mrb[248].mxu0 }
 0xc07   : > { %v10042_v36 = vpack.c.bf16 %v6833_v43, %v6832_v46  ;;  %v9560_v37 = vpop.f32.mrb[249].mxu0  ;;  %v6789_v26 = vadd.f32 %v6788_v15, %v6669_v23 }
 0xc09   : > { %10043 = vmatprep.subr.bf16.mxu1 %v10042_v36  ;;  %v6834_v40 = vmax.f32 %v6789_v26, 0.0 }
 0xc0a   : > { %10045 = vmatpush3.bf16.msra.mxu1 %v10042_v36  ;;  %v6793_v16 = vpop.f32.mrb[250].mxu0 }
 0xc0b   : > { %v6794_v62 = vadd.f32 %v6793_v16, %v6670_v2  ;;  %v9563_v7 = vpop.f32.mrb[251].mxu0 }
 0xc0d   : > { %v6835_v49 = vmax.f32 %v6794_v62, 0.0 }
 0xc0e   : > { %v6798_v48 = vpop.f32.mrb[252].mxu0 }
 0xc0f   : > { %v10046_v41 = vpack.c.bf16 %v6835_v49, %v6834_v40  ;;  %v9566_v31 = vpop.f32.mrb[253].mxu0  ;;  %v6799_v9 = vadd.f32 %v6798_v48, %v6671_v14 }
 0xc11   : > { %10047 = vmatprep.subr.bf16.mxu1 %v10046_v41  ;;  %v6836_v58 = vmax.f32 %v6799_v9, 0.0 }
 0xc12   : > { %10049 = vmatpush3.bf16.msra.mxu1 %v10046_v41  ;;  %v6803_v5 = vpop.f32.mrb[254].mxu0 }
 0xc13   : > { %v6804_v29 = vadd.f32 %v6803_v5, %v6672_v54  ;;  %v9569_v57 = vpop.f32.mrb[255].mxu0 }
 0xc15   : > { %v6837_v59 = vmax.f32 %v6804_v29, 0.0 }
 0xc16   : > { %v6808_v53 = vpop.f32.mrb[0].mxu0 }
 0xc17   : > { %v10050_v21 = vpack.c.bf16 %v6837_v59, %v6836_v58  ;;  %v9572_v13 = vpop.f32.mrb[1].mxu0  ;;  %v6809_v17 = vadd.f32 %v6808_v53, %v6673_v33 }
 0xc19   : > { %10051 = vmatprep.subr.bf16.mxu1 %v10050_v21  ;;  %v6838_v3 = vmax.f32 %v6809_v17, 0.0 }
 0xc1a   : > { %10053 = vmatpush3.bf16.msra.mxu1 %v10050_v21  ;;  %v6813_v20 = vpop.f32.mrb[2].mxu0 }
 0xc1b   : > { %v6814_v25 = vadd.f32 %v6813_v20, %v6674_v34  ;;  %v9575_v6 = vpop.f32.mrb[3].mxu0 }
 0xc1d   : > { %v6839_v32 = vmax.f32 %v6814_v25, 0.0 }
 0xc1e   : > { %v6818_v45 = vpop.f32.mrb[4].mxu0 }
 0xc1f   : > { %v10054_v27 = vpack.c.bf16 %v6839_v32, %v6838_v3  ;;  %v9578_v19 = vpop.f32.mrb[5].mxu0  ;;  %v6819_v4 = vadd.f32 %v6818_v45, %v6675_v18 }
 0xc21   : > { %10055 = vmatprep.subr.bf16.mxu1 %v10054_v27  ;;  %v6840_v0 = vmax.f32 %v6819_v4, 0.0 }
 0xc22   : > { %10057 = vmatpush3.bf16.msra.mxu1 %v10054_v27  ;;  %v6823_v55 = vpop.f32.mrb[6].mxu0 }
 0xc23   : > { %v6824_v50 = vadd.f32 %v6823_v55, %v6676_v61  ;;  %v9581_v28 = vpop.f32.mrb[7].mxu0 }
 0xc25   : > { %v6841_v11 = vmax.f32 %v6824_v50, 0.0 }
 0xc26   : > { %v6828_v8 = vpop.f32.mrb[8].mxu0 }
 0xc27   : > { %v10058_v12 = vpack.c.bf16 %v6841_v11, %v6840_v0  ;;  %v6829_v35 = vadd.f32 %v6828_v8, %v6677_v52  ;;  %v9584_v44 = vpop.f32.mrb[9].mxu0 }
 0xc29   : > { %10059 = vmatprep.subr.bf16.mxu1 %v10058_v12  ;;  %v6842_v42 = vmax.f32 %v6829_v35, 0.0 }
 0xc2a   : > { %10061 = vmatpush3.bf16.msra.mxu1 %v10058_v12 }
 0xc2b   : > { %9605 = vmatprep.subr.msk.mxu1 %vm2286_vm2, %v6842_v42 }
 0xc2e   : > { %9606 = vmatpush3.msk.msra.mxu1 %vm2286_vm2, %v6842_v42  ;;  %vm6931_vm2 = vcmask 7168  }
 0xc2f   : > { %9608 = vmatmul.mubr.msk.f32.vlgmr.msra.gmra.mrb[88].mxu1 %vm3130_vm9, %v6844_v60 }
 0xd02   : > { %v9609_v51 = vpop.f32.mrb[88].mxu1 }
 0xd03   : > { %v6928_v47 = vadd.f32 %v9609_v51, %v6846_v38  ;;  %v6922_v39 = vpop.f32.mrb[89].mxu1 }
 0xd04   : > { %v6923_v63 = vadd.f32 %v6922_v39, %v6845_v30 }
 0xd05   : > { %6934 = vst.msk [vmem:[%s543_s21 + $0x8] sm:$0x3] %vm6933_vm0, %v6928_v47 }
 0xd06   : > { %6932 = vst.msk [vmem:[%s543_s21] sm:$0xff] %vm6931_vm2, %v6923_v63 }
 0xd07 PF: > { %p26_p9 = scmp.ge.s32.totalorder %s10870_s16, 4   ;;  %s13971_s18 = smov %s10668_s19 }
 0xd08   : > { %s13972_s19 = smov %s10672_s20  ;;  %s13973_s20 = smov %s10879_s17 }
 0xd09   : > { %s13974_s21 = smov %s10870_s16  ;;  %28 = sbr.rel (!%p26_p9) target bundleno = 10 (0xa), region = 144 }
 0xd10   :  { %6956 = vsyncpa [#allocation5], 1 }
 0xd11   :  { %6958 = vsyncpa [#allocation5 + $0x1], 1 }
 0xd12   :  { %6959 = vsyncpa [#allocation7], 1 }

</bundles_post_ra>
